<compile_context>
chip_gen: v7x
topology: tpu7x:2x2x1
jax: 0.10.0
libtpu: 0.0.40
codegen_flags: <defaults>
</compile_context>

<pallas_src>
import jax
import jax.numpy as jnp
from jax.experimental import pallas as pl
from jax.experimental.pallas import tpu as pltpu

K = 5  # Conv1d kernel width for all three conv layers.


# ----------------------------- Pallas kernel ------------------------------- #

def vae_kernel(x_ref, w1_ref, b1_ref, w2_ref, b2_ref, w3_ref, b3_ref,
               wf_ref, bf_ref, out_ref):
    """Forward for one batch tile.

    x_ref  : (TB, L)        f32  VMEM   (batch on sublanes, length on lanes)
    wN_ref : (Cout*Cin*K,)  f32  SMEM   (row-major flattened Conv1d weight)
    bN_ref : (Cout,)        f32  SMEM
    wf_ref : (bsize, F)     f32  VMEM   (Linear weight, F = L - 12)
    bf_ref : (1, bsize)     f32  VMEM
    out_ref: (TB, bsize)    f32  VMEM
    """
    x = x_ref[...]

    def conv_relu(hs, w_ref, b_ref, cout):
        # hs: list of cin activation slabs, each (TB, Lin). Returns cout slabs.
        cin = len(hs)
        lin = hs[0].shape[1]
        lout = lin - K + 1

        def w(co, ci, k):
            return w_ref[(co * cin + ci) * K + k]

        if cin <= cout:
            # Shift the (fewer) input slabs: cin*(K-1) lane shifts, each shared
            # by every output channel. Bias folded into the first tap.
            accs = [None] * cout
            for ci in range(cin):
                for k in range(K):
                    sh = hs[ci][:, k:k + lout]          # one shifted view per (ci, k)
                    for co in range(cout):
                        t = sh * w(co, ci, k)
                        accs[co] = (t + b_ref[co]) if accs[co] is None else (accs[co] + t)
            outs = accs
        else:
            # Shift the (fewer) output-side per-tap sums: form the unshifted
            # channel sum s_k = sum_ci h[ci]*w[co,ci,k] first, then one lane
            # shift per (co, k) -> cout*(K-1) shifts instead of cin*(K-1).
            outs = []
            for co in range(cout):
                acc = None
                for k in range(K):
                    s = hs[0] * w(co, 0, k)
                    for ci in range(1, cin):
                        s = s + hs[ci] * w(co, ci, k)
                    sh = s[:, k:k + lout]
                    acc = (sh + b_ref[co]) if acc is None else (acc + sh)
                outs.append(acc)
        return [jnp.maximum(o, 0.0) for o in outs]

    h = conv_relu([x], w1_ref, b1_ref, cout=8)   # 8 x (TB, L-4)   input-side shifts
    h = conv_relu(h, w2_ref, b2_ref, cout=5)     # 5 x (TB, L-8)   output-side shifts
    h = conv_relu(h, w3_ref, b3_ref, cout=1)     # 1 x (TB, L-12)  output-side shifts
    feat = h[0]                                  # (TB, F)

    # Linear on the MXU: contract F of feat with F of wf (NT matmul, f32 acc).
    mu = jax.lax.dot_general(
        feat, wf_ref[...], (((1,), (1,)), ((), ())),
        preferred_element_type=jnp.float32)      # (TB, bsize)
    out_ref[...] = mu + bf_ref[...]


# ------------------------------ Host wrapper -------------------------------- #

def _round_up(v, m):
    return ((v + m - 1) // m) * m


def vae_forward(x, params):
    """x: (B, L) f32. Returns torch.squeeze(mu) equivalent."""
    B, L = x.shape
    feature_dim = L - 3 * (K - 1)
    bsize = params["wf"].shape[0]
    assert params["wf"].shape == (bsize, feature_dim)

    x = x.astype(jnp.float32)

    # Flat SMEM conv params (row-major (Cout, Cin, K) flatten).
    w1 = params["w1"].reshape(-1).astype(jnp.float32)   # (40,)
    w2 = params["w2"].reshape(-1).astype(jnp.float32)   # (200,)
    w3 = params["w3"].reshape(-1).astype(jnp.float32)   # (25,)
    b1 = params["b1"].astype(jnp.float32)               # (8,)
    b2 = params["b2"].astype(jnp.float32)               # (5,)
    b3 = params["b3"].astype(jnp.float32)               # (1,)
    wf = params["wf"].astype(jnp.float32)               # (bsize, F)
    bf = params["bf"].astype(jnp.float32)[None, :]      # (1, bsize)

    # Batch tile: cap at 32 rows (vreg-pressure / spill control), multiple of 8,
    # and >= 2 grid steps whenever B >= 16 (v7x 2-TC sharding). Small batches
    # run as a single full-batch block.
    if B <= 8:
        TB = B
    else:
        TB = min(32, _round_up(pl.cdiv(B, 2), 8))
    grid = (pl.cdiv(B, TB),)

    smem = pl.BlockSpec(memory_space=pltpu.MemorySpace.SMEM)

    mu = pl.pallas_call(
        vae_kernel,
        out_shape=jax.ShapeDtypeStruct((B, bsize), jnp.float32),
        grid=grid,
        in_specs=[
            pl.BlockSpec((TB, L), lambda i: (i, 0)),            # x: batch-tiled
            smem, smem,                                          # w1, b1
            smem, smem,                                          # w2, b2
            smem, smem,                                          # w3, b3
            pl.BlockSpec((bsize, feature_dim), lambda i: (0, 0)),  # wf: resident, no re-DMA
            pl.BlockSpec((1, bsize), lambda i: (0, 0)),            # bf: resident, no re-DMA
        ],
        out_specs=pl.BlockSpec((TB, bsize), lambda i: (i, 0)),   # lane-dense output
        compiler_params=pltpu.CompilerParams(
            dimension_semantics=("parallel",),                   # shard batch axis
            vmem_limit_bytes=32 * 1024 * 1024,
        ),
    )(x, w1, b1, w2, b2, w3, b3, wf, bf)

    return jnp.squeeze(mu)                                       # torch.squeeze(mu)


# ------------------------- Deterministic parameters ------------------------- #

def init_params(key, img_channels=1, feature_dim=244, bsize=8):
    """PyTorch-style uniform(-1/sqrt(fan_in), 1/sqrt(fan_in)) init, deterministic."""
    ks = jax.random.split(key, 8)

    def u(k, shape, fan_in):
        bound = 1.0 / float(fan_in) ** 0.5
        return jax.random.uniform(k, shape, jnp.float32, -bound, bound)

    return dict(
        w1=u(ks[0], (8, img_channels, 5), img_channels * 5),
        b1=u(ks[1], (8,), img_channels * 5),
        w2=u(ks[2], (5, 8, 5), 8 * 5),
        b2=u(ks[3], (5,), 8 * 5),
        w3=u(ks[4], (1, 5, 5), 5 * 5),
        b3=u(ks[5], (1,), 5 * 5),
        wf=u(ks[6], (bsize, feature_dim), feature_dim),
        bf=u(ks[7], (bsize,), feature_dim),
    )


# ------------------------------ JAX reference ------------------------------- #

def vae_reference(x, params):
    h = x[:, None, :]

    def conv(h, w, b):
        out = jax.lax.conv_general_dilated(
            h, w, window_strides=(1,), padding="VALID",
            dimension_numbers=("NCH", "OIH", "NCH"))
        return jax.nn.relu(out + b[None, :, None])

    h = conv(h, params["w1"], params["b1"])
    h = conv(h, params["w2"], params["b2"])
    h = conv(h, params["w3"], params["b3"])
    feat = h.reshape(h.shape[0], -1)
    mu = feat @ params["wf"].T + params["bf"][None, :]
    return jnp.squeeze(mu)


# ---------------------------------- Main ------------------------------------ #

if __name__ == "__main__":
    # Small shapes consistent with the module: L = featureDim + 12.
    L, BSIZE = 256, 8
    FEATURE_DIM = L - 12  # 244

    key = jax.random.PRNGKey(0)
    k_params, k_x1, k_x2 = jax.random.split(key, 3)
    params = init_params(k_params, img_channels=1,
                         feature_dim=FEATURE_DIM, bsize=BSIZE)

    # Case 1: tiny batch, single grid step (B=2).
    x1 = jax.random.normal(k_x1, (2, L), jnp.float32)
    out1 = jax.block_until_ready(vae_forward(x1, params))
    ref1 = jax.block_until_ready(vae_reference(x1, params))
    assert out1.shape == ref1.shape == (2, BSIZE), (out1.shape, ref1.shape)
    assert jnp.allclose(out1, ref1, rtol=1e-3, atol=1e-3), (
        float(jnp.max(jnp.abs(out1 - ref1))))

    # Case 2: multi-step grid (B=20 -> TB=16, grid=(2,), partial last block).
    x2 = jax.random.normal(k_x2, (20, L), jnp.float32)
    out2 = jax.block_until_ready(vae_forward(x2, params))
    ref2 = jax.block_until_ready(vae_reference(x2, params))
    assert out2.shape == ref2.shape == (20, BSIZE), (out2.shape, ref2.shape)
    assert jnp.allclose(out2, ref2, rtol=1e-3, atol=1e-3), (
        float(jnp.max(jnp.abs(out2 - ref2))))

    print("KERNEL_OK")
</pallas_src>

<mosaic_0001>
module attributes {stable_mosaic.version = 11 : i64} {
  func.func @vae_kernel(%arg0: i32, %arg1: memref<2x256xf32, #tpu.memory_space<vmem>>, %arg2: memref<40xf32, #tpu.memory_space<smem>>, %arg3: memref<8xf32, #tpu.memory_space<smem>>, %arg4: memref<200xf32, #tpu.memory_space<smem>>, %arg5: memref<5xf32, #tpu.memory_space<smem>>, %arg6: memref<25xf32, #tpu.memory_space<smem>>, %arg7: memref<1xf32, #tpu.memory_space<smem>>, %arg8: memref<8x244xf32, #tpu.memory_space<vmem>>, %arg9: memref<1x8xf32, #tpu.memory_space<vmem>>, %arg10: memref<2x8xf32, #tpu.memory_space<vmem>>) attributes {dimension_semantics = [#tpu.dimension_semantics<parallel>], iteration_bounds = array<i64: 1>, scalar_prefetch = 0 : i64, scratch_operands = 0 : i64, tpu.core_type = #tpu.core_type<tc>, window_params = [{transform_indices = @transform_0, window_bounds = array<i64: 2, 256>}, {transform_indices = @transform_1, window_bounds = array<i64: 40>}, {transform_indices = @transform_2, window_bounds = array<i64: 8>}, {transform_indices = @transform_3, window_bounds = array<i64: 200>}, {transform_indices = @transform_4, window_bounds = array<i64: 5>}, {transform_indices = @transform_5, window_bounds = array<i64: 25>}, {transform_indices = @transform_6, window_bounds = array<i64: 1>}, {pipeline_mode = #tpu.pipeline_mode<synchronous>, transform_indices = @transform_7, window_bounds = array<i64: 8, 244>}, {pipeline_mode = #tpu.pipeline_mode<synchronous>, transform_indices = @transform_8, window_bounds = array<i64: 1, 8>}, {transform_indices = @transform_9, window_bounds = array<i64: 2, 8>}]} {
    %c0 = arith.constant 0 : index
    %c0_0 = arith.constant 0 : index
    %0 = vector.load %arg1[%c0, %c0_0] : memref<2x256xf32, #tpu.memory_space<vmem>>, vector<2x256xf32>
    %1 = vector.extract_strided_slice %0 {offsets = [0, 0], sizes = [2, 252], strides = [1, 1]} : vector<2x256xf32> to vector<2x252xf32>
    %c0_1 = arith.constant 0 : index
    %2 = memref.load %arg2[%c0_1] : memref<40xf32, #tpu.memory_space<smem>>
    %3 = vector.broadcast %2 : f32 to vector<2x252xf32>
    %4 = arith.mulf %1, %3 : vector<2x252xf32>
    %c0_2 = arith.constant 0 : index
    %5 = memref.load %arg3[%c0_2] : memref<8xf32, #tpu.memory_space<smem>>
    %6 = vector.broadcast %5 : f32 to vector<2x252xf32>
    %7 = arith.addf %4, %6 : vector<2x252xf32>
    %c5 = arith.constant 5 : index
    %8 = memref.load %arg2[%c5] : memref<40xf32, #tpu.memory_space<smem>>
    %9 = vector.broadcast %8 : f32 to vector<2x252xf32>
    %10 = arith.mulf %1, %9 : vector<2x252xf32>
    %c1 = arith.constant 1 : index
    %11 = memref.load %arg3[%c1] : memref<8xf32, #tpu.memory_space<smem>>
    %12 = vector.broadcast %11 : f32 to vector<2x252xf32>
    %13 = arith.addf %10, %12 : vector<2x252xf32>
    %c10 = arith.constant 10 : index
    %14 = memref.load %arg2[%c10] : memref<40xf32, #tpu.memory_space<smem>>
    %15 = vector.broadcast %14 : f32 to vector<2x252xf32>
    %16 = arith.mulf %1, %15 : vector<2x252xf32>
    %c2 = arith.constant 2 : index
    %17 = memref.load %arg3[%c2] : memref<8xf32, #tpu.memory_space<smem>>
    %18 = vector.broadcast %17 : f32 to vector<2x252xf32>
    %19 = arith.addf %16, %18 : vector<2x252xf32>
    %c15 = arith.constant 15 : index
    %20 = memref.load %arg2[%c15] : memref<40xf32, #tpu.memory_space<smem>>
    %21 = vector.broadcast %20 : f32 to vector<2x252xf32>
    %22 = arith.mulf %1, %21 : vector<2x252xf32>
    %c3 = arith.constant 3 : index
    %23 = memref.load %arg3[%c3] : memref<8xf32, #tpu.memory_space<smem>>
    %24 = vector.broadcast %23 : f32 to vector<2x252xf32>
    %25 = arith.addf %22, %24 : vector<2x252xf32>
    %c20 = arith.constant 20 : index
    %26 = memref.load %arg2[%c20] : memref<40xf32, #tpu.memory_space<smem>>
    %27 = vector.broadcast %26 : f32 to vector<2x252xf32>
    %28 = arith.mulf %1, %27 : vector<2x252xf32>
    %c4 = arith.constant 4 : index
    %29 = memref.load %arg3[%c4] : memref<8xf32, #tpu.memory_space<smem>>
    %30 = vector.broadcast %29 : f32 to vector<2x252xf32>
    %31 = arith.addf %28, %30 : vector<2x252xf32>
    %c25 = arith.constant 25 : index
    %32 = memref.load %arg2[%c25] : memref<40xf32, #tpu.memory_space<smem>>
    %33 = vector.broadcast %32 : f32 to vector<2x252xf32>
    %34 = arith.mulf %1, %33 : vector<2x252xf32>
    %c5_3 = arith.constant 5 : index
    %35 = memref.load %arg3[%c5_3] : memref<8xf32, #tpu.memory_space<smem>>
    %36 = vector.broadcast %35 : f32 to vector<2x252xf32>
    %37 = arith.addf %34, %36 : vector<2x252xf32>
    %c30 = arith.constant 30 : index
    %38 = memref.load %arg2[%c30] : memref<40xf32, #tpu.memory_space<smem>>
    %39 = vector.broadcast %38 : f32 to vector<2x252xf32>
    %40 = arith.mulf %1, %39 : vector<2x252xf32>
    %c6 = arith.constant 6 : index
    %41 = memref.load %arg3[%c6] : memref<8xf32, #tpu.memory_space<smem>>
    %42 = vector.broadcast %41 : f32 to vector<2x252xf32>
    %43 = arith.addf %40, %42 : vector<2x252xf32>
    %c35 = arith.constant 35 : index
    %44 = memref.load %arg2[%c35] : memref<40xf32, #tpu.memory_space<smem>>
    %45 = vector.broadcast %44 : f32 to vector<2x252xf32>
    %46 = arith.mulf %1, %45 : vector<2x252xf32>
    %c7 = arith.constant 7 : index
    %47 = memref.load %arg3[%c7] : memref<8xf32, #tpu.memory_space<smem>>
    %48 = vector.broadcast %47 : f32 to vector<2x252xf32>
    %49 = arith.addf %46, %48 : vector<2x252xf32>
    %50 = vector.extract_strided_slice %0 {offsets = [0, 1], sizes = [2, 252], strides = [1, 1]} : vector<2x256xf32> to vector<2x252xf32>
    %c1_4 = arith.constant 1 : index
    %51 = memref.load %arg2[%c1_4] : memref<40xf32, #tpu.memory_space<smem>>
    %52 = vector.broadcast %51 : f32 to vector<2x252xf32>
    %53 = arith.mulf %50, %52 : vector<2x252xf32>
    %54 = arith.addf %7, %53 : vector<2x252xf32>
    %c6_5 = arith.constant 6 : index
    %55 = memref.load %arg2[%c6_5] : memref<40xf32, #tpu.memory_space<smem>>
    %56 = vector.broadcast %55 : f32 to vector<2x252xf32>
    %57 = arith.mulf %50, %56 : vector<2x252xf32>
    %58 = arith.addf %13, %57 : vector<2x252xf32>
    %c11 = arith.constant 11 : index
    %59 = memref.load %arg2[%c11] : memref<40xf32, #tpu.memory_space<smem>>
    %60 = vector.broadcast %59 : f32 to vector<2x252xf32>
    %61 = arith.mulf %50, %60 : vector<2x252xf32>
    %62 = arith.addf %19, %61 : vector<2x252xf32>
    %c16 = arith.constant 16 : index
    %63 = memref.load %arg2[%c16] : memref<40xf32, #tpu.memory_space<smem>>
    %64 = vector.broadcast %63 : f32 to vector<2x252xf32>
    %65 = arith.mulf %50, %64 : vector<2x252xf32>
    %66 = arith.addf %25, %65 : vector<2x252xf32>
    %c21 = arith.constant 21 : index
    %67 = memref.load %arg2[%c21] : memref<40xf32, #tpu.memory_space<smem>>
    %68 = vector.broadcast %67 : f32 to vector<2x252xf32>
    %69 = arith.mulf %50, %68 : vector<2x252xf32>
    %70 = arith.addf %31, %69 : vector<2x252xf32>
    %c26 = arith.constant 26 : index
    %71 = memref.load %arg2[%c26] : memref<40xf32, #tpu.memory_space<smem>>
    %72 = vector.broadcast %71 : f32 to vector<2x252xf32>
    %73 = arith.mulf %50, %72 : vector<2x252xf32>
    %74 = arith.addf %37, %73 : vector<2x252xf32>
    %c31 = arith.constant 31 : index
    %75 = memref.load %arg2[%c31] : memref<40xf32, #tpu.memory_space<smem>>
    %76 = vector.broadcast %75 : f32 to vector<2x252xf32>
    %77 = arith.mulf %50, %76 : vector<2x252xf32>
    %78 = arith.addf %43, %77 : vector<2x252xf32>
    %c36 = arith.constant 36 : index
    %79 = memref.load %arg2[%c36] : memref<40xf32, #tpu.memory_space<smem>>
    %80 = vector.broadcast %79 : f32 to vector<2x252xf32>
    %81 = arith.mulf %50, %80 : vector<2x252xf32>
    %82 = arith.addf %49, %81 : vector<2x252xf32>
    %83 = vector.extract_strided_slice %0 {offsets = [0, 2], sizes = [2, 252], strides = [1, 1]} : vector<2x256xf32> to vector<2x252xf32>
    %c2_6 = arith.constant 2 : index
    %84 = memref.load %arg2[%c2_6] : memref<40xf32, #tpu.memory_space<smem>>
    %85 = vector.broadcast %84 : f32 to vector<2x252xf32>
    %86 = arith.mulf %83, %85 : vector<2x252xf32>
    %87 = arith.addf %54, %86 : vector<2x252xf32>
    %c7_7 = arith.constant 7 : index
    %88 = memref.load %arg2[%c7_7] : memref<40xf32, #tpu.memory_space<smem>>
    %89 = vector.broadcast %88 : f32 to vector<2x252xf32>
    %90 = arith.mulf %83, %89 : vector<2x252xf32>
    %91 = arith.addf %58, %90 : vector<2x252xf32>
    %c12 = arith.constant 12 : index
    %92 = memref.load %arg2[%c12] : memref<40xf32, #tpu.memory_space<smem>>
    %93 = vector.broadcast %92 : f32 to vector<2x252xf32>
    %94 = arith.mulf %83, %93 : vector<2x252xf32>
    %95 = arith.addf %62, %94 : vector<2x252xf32>
    %c17 = arith.constant 17 : index
    %96 = memref.load %arg2[%c17] : memref<40xf32, #tpu.memory_space<smem>>
    %97 = vector.broadcast %96 : f32 to vector<2x252xf32>
    %98 = arith.mulf %83, %97 : vector<2x252xf32>
    %99 = arith.addf %66, %98 : vector<2x252xf32>
    %c22 = arith.constant 22 : index
    %100 = memref.load %arg2[%c22] : memref<40xf32, #tpu.memory_space<smem>>
    %101 = vector.broadcast %100 : f32 to vector<2x252xf32>
    %102 = arith.mulf %83, %101 : vector<2x252xf32>
    %103 = arith.addf %70, %102 : vector<2x252xf32>
    %c27 = arith.constant 27 : index
    %104 = memref.load %arg2[%c27] : memref<40xf32, #tpu.memory_space<smem>>
    %105 = vector.broadcast %104 : f32 to vector<2x252xf32>
    %106 = arith.mulf %83, %105 : vector<2x252xf32>
    %107 = arith.addf %74, %106 : vector<2x252xf32>
    %c32 = arith.constant 32 : index
    %108 = memref.load %arg2[%c32] : memref<40xf32, #tpu.memory_space<smem>>
    %109 = vector.broadcast %108 : f32 to vector<2x252xf32>
    %110 = arith.mulf %83, %109 : vector<2x252xf32>
    %111 = arith.addf %78, %110 : vector<2x252xf32>
    %c37 = arith.constant 37 : index
    %112 = memref.load %arg2[%c37] : memref<40xf32, #tpu.memory_space<smem>>
    %113 = vector.broadcast %112 : f32 to vector<2x252xf32>
    %114 = arith.mulf %83, %113 : vector<2x252xf32>
    %115 = arith.addf %82, %114 : vector<2x252xf32>
    %116 = vector.extract_strided_slice %0 {offsets = [0, 3], sizes = [2, 252], strides = [1, 1]} : vector<2x256xf32> to vector<2x252xf32>
    %c3_8 = arith.constant 3 : index
    %117 = memref.load %arg2[%c3_8] : memref<40xf32, #tpu.memory_space<smem>>
    %118 = vector.broadcast %117 : f32 to vector<2x252xf32>
    %119 = arith.mulf %116, %118 : vector<2x252xf32>
    %120 = arith.addf %87, %119 : vector<2x252xf32>
    %c8 = arith.constant 8 : index
    %121 = memref.load %arg2[%c8] : memref<40xf32, #tpu.memory_space<smem>>
    %122 = vector.broadcast %121 : f32 to vector<2x252xf32>
    %123 = arith.mulf %116, %122 : vector<2x252xf32>
    %124 = arith.addf %91, %123 : vector<2x252xf32>
    %c13 = arith.constant 13 : index
    %125 = memref.load %arg2[%c13] : memref<40xf32, #tpu.memory_space<smem>>
    %126 = vector.broadcast %125 : f32 to vector<2x252xf32>
    %127 = arith.mulf %116, %126 : vector<2x252xf32>
    %128 = arith.addf %95, %127 : vector<2x252xf32>
    %c18 = arith.constant 18 : index
    %129 = memref.load %arg2[%c18] : memref<40xf32, #tpu.memory_space<smem>>
    %130 = vector.broadcast %129 : f32 to vector<2x252xf32>
    %131 = arith.mulf %116, %130 : vector<2x252xf32>
    %132 = arith.addf %99, %131 : vector<2x252xf32>
    %c23 = arith.constant 23 : index
    %133 = memref.load %arg2[%c23] : memref<40xf32, #tpu.memory_space<smem>>
    %134 = vector.broadcast %133 : f32 to vector<2x252xf32>
    %135 = arith.mulf %116, %134 : vector<2x252xf32>
    %136 = arith.addf %103, %135 : vector<2x252xf32>
    %c28 = arith.constant 28 : index
    %137 = memref.load %arg2[%c28] : memref<40xf32, #tpu.memory_space<smem>>
    %138 = vector.broadcast %137 : f32 to vector<2x252xf32>
    %139 = arith.mulf %116, %138 : vector<2x252xf32>
    %140 = arith.addf %107, %139 : vector<2x252xf32>
    %c33 = arith.constant 33 : index
    %141 = memref.load %arg2[%c33] : memref<40xf32, #tpu.memory_space<smem>>
    %142 = vector.broadcast %141 : f32 to vector<2x252xf32>
    %143 = arith.mulf %116, %142 : vector<2x252xf32>
    %144 = arith.addf %111, %143 : vector<2x252xf32>
    %c38 = arith.constant 38 : index
    %145 = memref.load %arg2[%c38] : memref<40xf32, #tpu.memory_space<smem>>
    %146 = vector.broadcast %145 : f32 to vector<2x252xf32>
    %147 = arith.mulf %116, %146 : vector<2x252xf32>
    %148 = arith.addf %115, %147 : vector<2x252xf32>
    %149 = vector.extract_strided_slice %0 {offsets = [0, 4], sizes = [2, 252], strides = [1, 1]} : vector<2x256xf32> to vector<2x252xf32>
    %c4_9 = arith.constant 4 : index
    %150 = memref.load %arg2[%c4_9] : memref<40xf32, #tpu.memory_space<smem>>
    %151 = vector.broadcast %150 : f32 to vector<2x252xf32>
    %152 = arith.mulf %149, %151 : vector<2x252xf32>
    %153 = arith.addf %120, %152 : vector<2x252xf32>
    %c9 = arith.constant 9 : index
    %154 = memref.load %arg2[%c9] : memref<40xf32, #tpu.memory_space<smem>>
    %155 = vector.broadcast %154 : f32 to vector<2x252xf32>
    %156 = arith.mulf %149, %155 : vector<2x252xf32>
    %157 = arith.addf %124, %156 : vector<2x252xf32>
    %c14 = arith.constant 14 : index
    %158 = memref.load %arg2[%c14] : memref<40xf32, #tpu.memory_space<smem>>
    %159 = vector.broadcast %158 : f32 to vector<2x252xf32>
    %160 = arith.mulf %149, %159 : vector<2x252xf32>
    %161 = arith.addf %128, %160 : vector<2x252xf32>
    %c19 = arith.constant 19 : index
    %162 = memref.load %arg2[%c19] : memref<40xf32, #tpu.memory_space<smem>>
    %163 = vector.broadcast %162 : f32 to vector<2x252xf32>
    %164 = arith.mulf %149, %163 : vector<2x252xf32>
    %165 = arith.addf %132, %164 : vector<2x252xf32>
    %c24 = arith.constant 24 : index
    %166 = memref.load %arg2[%c24] : memref<40xf32, #tpu.memory_space<smem>>
    %167 = vector.broadcast %166 : f32 to vector<2x252xf32>
    %168 = arith.mulf %149, %167 : vector<2x252xf32>
    %169 = arith.addf %136, %168 : vector<2x252xf32>
    %c29 = arith.constant 29 : index
    %170 = memref.load %arg2[%c29] : memref<40xf32, #tpu.memory_space<smem>>
    %171 = vector.broadcast %170 : f32 to vector<2x252xf32>
    %172 = arith.mulf %149, %171 : vector<2x252xf32>
    %173 = arith.addf %140, %172 : vector<2x252xf32>
    %c34 = arith.constant 34 : index
    %174 = memref.load %arg2[%c34] : memref<40xf32, #tpu.memory_space<smem>>
    %175 = vector.broadcast %174 : f32 to vector<2x252xf32>
    %176 = arith.mulf %149, %175 : vector<2x252xf32>
    %177 = arith.addf %144, %176 : vector<2x252xf32>
    %c39 = arith.constant 39 : index
    %178 = memref.load %arg2[%c39] : memref<40xf32, #tpu.memory_space<smem>>
    %179 = vector.broadcast %178 : f32 to vector<2x252xf32>
    %180 = arith.mulf %149, %179 : vector<2x252xf32>
    %181 = arith.addf %148, %180 : vector<2x252xf32>
    %cst = arith.constant 0.000000e+00 : f32
    %182 = vector.broadcast %cst : f32 to vector<2x252xf32>
    %183 = arith.maximumf %153, %182 : vector<2x252xf32>
    %cst_10 = arith.constant 0.000000e+00 : f32
    %184 = vector.broadcast %cst_10 : f32 to vector<2x252xf32>
    %185 = arith.maximumf %157, %184 : vector<2x252xf32>
    %cst_11 = arith.constant 0.000000e+00 : f32
    %186 = vector.broadcast %cst_11 : f32 to vector<2x252xf32>
    %187 = arith.maximumf %161, %186 : vector<2x252xf32>
    %cst_12 = arith.constant 0.000000e+00 : f32
    %188 = vector.broadcast %cst_12 : f32 to vector<2x252xf32>
    %189 = arith.maximumf %165, %188 : vector<2x252xf32>
    %cst_13 = arith.constant 0.000000e+00 : f32
    %190 = vector.broadcast %cst_13 : f32 to vector<2x252xf32>
    %191 = arith.maximumf %169, %190 : vector<2x252xf32>
    %cst_14 = arith.constant 0.000000e+00 : f32
    %192 = vector.broadcast %cst_14 : f32 to vector<2x252xf32>
    %193 = arith.maximumf %173, %192 : vector<2x252xf32>
    %cst_15 = arith.constant 0.000000e+00 : f32
    %194 = vector.broadcast %cst_15 : f32 to vector<2x252xf32>
    %195 = arith.maximumf %177, %194 : vector<2x252xf32>
    %cst_16 = arith.constant 0.000000e+00 : f32
    %196 = vector.broadcast %cst_16 : f32 to vector<2x252xf32>
    %197 = arith.maximumf %181, %196 : vector<2x252xf32>
    %c0_17 = arith.constant 0 : index
    %198 = memref.load %arg4[%c0_17] : memref<200xf32, #tpu.memory_space<smem>>
    %199 = vector.broadcast %198 : f32 to vector<2x252xf32>
    %200 = arith.mulf %183, %199 : vector<2x252xf32>
    %c5_18 = arith.constant 5 : index
    %201 = memref.load %arg4[%c5_18] : memref<200xf32, #tpu.memory_space<smem>>
    %202 = vector.broadcast %201 : f32 to vector<2x252xf32>
    %203 = arith.mulf %185, %202 : vector<2x252xf32>
    %204 = arith.addf %200, %203 : vector<2x252xf32>
    %c10_19 = arith.constant 10 : index
    %205 = memref.load %arg4[%c10_19] : memref<200xf32, #tpu.memory_space<smem>>
    %206 = vector.broadcast %205 : f32 to vector<2x252xf32>
    %207 = arith.mulf %187, %206 : vector<2x252xf32>
    %208 = arith.addf %204, %207 : vector<2x252xf32>
    %c15_20 = arith.constant 15 : index
    %209 = memref.load %arg4[%c15_20] : memref<200xf32, #tpu.memory_space<smem>>
    %210 = vector.broadcast %209 : f32 to vector<2x252xf32>
    %211 = arith.mulf %189, %210 : vector<2x252xf32>
    %212 = arith.addf %208, %211 : vector<2x252xf32>
    %c20_21 = arith.constant 20 : index
    %213 = memref.load %arg4[%c20_21] : memref<200xf32, #tpu.memory_space<smem>>
    %214 = vector.broadcast %213 : f32 to vector<2x252xf32>
    %215 = arith.mulf %191, %214 : vector<2x252xf32>
    %216 = arith.addf %212, %215 : vector<2x252xf32>
    %c25_22 = arith.constant 25 : index
    %217 = memref.load %arg4[%c25_22] : memref<200xf32, #tpu.memory_space<smem>>
    %218 = vector.broadcast %217 : f32 to vector<2x252xf32>
    %219 = arith.mulf %193, %218 : vector<2x252xf32>
    %220 = arith.addf %216, %219 : vector<2x252xf32>
    %c30_23 = arith.constant 30 : index
    %221 = memref.load %arg4[%c30_23] : memref<200xf32, #tpu.memory_space<smem>>
    %222 = vector.broadcast %221 : f32 to vector<2x252xf32>
    %223 = arith.mulf %195, %222 : vector<2x252xf32>
    %224 = arith.addf %220, %223 : vector<2x252xf32>
    %c35_24 = arith.constant 35 : index
    %225 = memref.load %arg4[%c35_24] : memref<200xf32, #tpu.memory_space<smem>>
    %226 = vector.broadcast %225 : f32 to vector<2x252xf32>
    %227 = arith.mulf %197, %226 : vector<2x252xf32>
    %228 = arith.addf %224, %227 : vector<2x252xf32>
    %229 = vector.extract_strided_slice %228 {offsets = [0, 0], sizes = [2, 248], strides = [1, 1]} : vector<2x252xf32> to vector<2x248xf32>
    %c0_25 = arith.constant 0 : index
    %230 = memref.load %arg5[%c0_25] : memref<5xf32, #tpu.memory_space<smem>>
    %231 = vector.broadcast %230 : f32 to vector<2x248xf32>
    %232 = arith.addf %229, %231 : vector<2x248xf32>
    %c1_26 = arith.constant 1 : index
    %233 = memref.load %arg4[%c1_26] : memref<200xf32, #tpu.memory_space<smem>>
    %234 = vector.broadcast %233 : f32 to vector<2x252xf32>
    %235 = arith.mulf %183, %234 : vector<2x252xf32>
    %c6_27 = arith.constant 6 : index
    %236 = memref.load %arg4[%c6_27] : memref<200xf32, #tpu.memory_space<smem>>
    %237 = vector.broadcast %236 : f32 to vector<2x252xf32>
    %238 = arith.mulf %185, %237 : vector<2x252xf32>
    %239 = arith.addf %235, %238 : vector<2x252xf32>
    %c11_28 = arith.constant 11 : index
    %240 = memref.load %arg4[%c11_28] : memref<200xf32, #tpu.memory_space<smem>>
    %241 = vector.broadcast %240 : f32 to vector<2x252xf32>
    %242 = arith.mulf %187, %241 : vector<2x252xf32>
    %243 = arith.addf %239, %242 : vector<2x252xf32>
    %c16_29 = arith.constant 16 : index
    %244 = memref.load %arg4[%c16_29] : memref<200xf32, #tpu.memory_space<smem>>
    %245 = vector.broadcast %244 : f32 to vector<2x252xf32>
    %246 = arith.mulf %189, %245 : vector<2x252xf32>
    %247 = arith.addf %243, %246 : vector<2x252xf32>
    %c21_30 = arith.constant 21 : index
    %248 = memref.load %arg4[%c21_30] : memref<200xf32, #tpu.memory_space<smem>>
    %249 = vector.broadcast %248 : f32 to vector<2x252xf32>
    %250 = arith.mulf %191, %249 : vector<2x252xf32>
    %251 = arith.addf %247, %250 : vector<2x252xf32>
    %c26_31 = arith.constant 26 : index
    %252 = memref.load %arg4[%c26_31] : memref<200xf32, #tpu.memory_space<smem>>
    %253 = vector.broadcast %252 : f32 to vector<2x252xf32>
    %254 = arith.mulf %193, %253 : vector<2x252xf32>
    %255 = arith.addf %251, %254 : vector<2x252xf32>
    %c31_32 = arith.constant 31 : index
    %256 = memref.load %arg4[%c31_32] : memref<200xf32, #tpu.memory_space<smem>>
    %257 = vector.broadcast %256 : f32 to vector<2x252xf32>
    %258 = arith.mulf %195, %257 : vector<2x252xf32>
    %259 = arith.addf %255, %258 : vector<2x252xf32>
    %c36_33 = arith.constant 36 : index
    %260 = memref.load %arg4[%c36_33] : memref<200xf32, #tpu.memory_space<smem>>
    %261 = vector.broadcast %260 : f32 to vector<2x252xf32>
    %262 = arith.mulf %197, %261 : vector<2x252xf32>
    %263 = arith.addf %259, %262 : vector<2x252xf32>
    %264 = vector.extract_strided_slice %263 {offsets = [0, 1], sizes = [2, 248], strides = [1, 1]} : vector<2x252xf32> to vector<2x248xf32>
    %265 = arith.addf %232, %264 : vector<2x248xf32>
    %c2_34 = arith.constant 2 : index
    %266 = memref.load %arg4[%c2_34] : memref<200xf32, #tpu.memory_space<smem>>
    %267 = vector.broadcast %266 : f32 to vector<2x252xf32>
    %268 = arith.mulf %183, %267 : vector<2x252xf32>
    %c7_35 = arith.constant 7 : index
    %269 = memref.load %arg4[%c7_35] : memref<200xf32, #tpu.memory_space<smem>>
    %270 = vector.broadcast %269 : f32 to vector<2x252xf32>
    %271 = arith.mulf %185, %270 : vector<2x252xf32>
    %272 = arith.addf %268, %271 : vector<2x252xf32>
    %c12_36 = arith.constant 12 : index
    %273 = memref.load %arg4[%c12_36] : memref<200xf32, #tpu.memory_space<smem>>
    %274 = vector.broadcast %273 : f32 to vector<2x252xf32>
    %275 = arith.mulf %187, %274 : vector<2x252xf32>
    %276 = arith.addf %272, %275 : vector<2x252xf32>
    %c17_37 = arith.constant 17 : index
    %277 = memref.load %arg4[%c17_37] : memref<200xf32, #tpu.memory_space<smem>>
    %278 = vector.broadcast %277 : f32 to vector<2x252xf32>
    %279 = arith.mulf %189, %278 : vector<2x252xf32>
    %280 = arith.addf %276, %279 : vector<2x252xf32>
    %c22_38 = arith.constant 22 : index
    %281 = memref.load %arg4[%c22_38] : memref<200xf32, #tpu.memory_space<smem>>
    %282 = vector.broadcast %281 : f32 to vector<2x252xf32>
    %283 = arith.mulf %191, %282 : vector<2x252xf32>
    %284 = arith.addf %280, %283 : vector<2x252xf32>
    %c27_39 = arith.constant 27 : index
    %285 = memref.load %arg4[%c27_39] : memref<200xf32, #tpu.memory_space<smem>>
    %286 = vector.broadcast %285 : f32 to vector<2x252xf32>
    %287 = arith.mulf %193, %286 : vector<2x252xf32>
    %288 = arith.addf %284, %287 : vector<2x252xf32>
    %c32_40 = arith.constant 32 : index
    %289 = memref.load %arg4[%c32_40] : memref<200xf32, #tpu.memory_space<smem>>
    %290 = vector.broadcast %289 : f32 to vector<2x252xf32>
    %291 = arith.mulf %195, %290 : vector<2x252xf32>
    %292 = arith.addf %288, %291 : vector<2x252xf32>
    %c37_41 = arith.constant 37 : index
    %293 = memref.load %arg4[%c37_41] : memref<200xf32, #tpu.memory_space<smem>>
    %294 = vector.broadcast %293 : f32 to vector<2x252xf32>
    %295 = arith.mulf %197, %294 : vector<2x252xf32>
    %296 = arith.addf %292, %295 : vector<2x252xf32>
    %297 = vector.extract_strided_slice %296 {offsets = [0, 2], sizes = [2, 248], strides = [1, 1]} : vector<2x252xf32> to vector<2x248xf32>
    %298 = arith.addf %265, %297 : vector<2x248xf32>
    %c3_42 = arith.constant 3 : index
    %299 = memref.load %arg4[%c3_42] : memref<200xf32, #tpu.memory_space<smem>>
    %300 = vector.broadcast %299 : f32 to vector<2x252xf32>
    %301 = arith.mulf %183, %300 : vector<2x252xf32>
    %c8_43 = arith.constant 8 : index
    %302 = memref.load %arg4[%c8_43] : memref<200xf32, #tpu.memory_space<smem>>
    %303 = vector.broadcast %302 : f32 to vector<2x252xf32>
    %304 = arith.mulf %185, %303 : vector<2x252xf32>
    %305 = arith.addf %301, %304 : vector<2x252xf32>
    %c13_44 = arith.constant 13 : index
    %306 = memref.load %arg4[%c13_44] : memref<200xf32, #tpu.memory_space<smem>>
    %307 = vector.broadcast %306 : f32 to vector<2x252xf32>
    %308 = arith.mulf %187, %307 : vector<2x252xf32>
    %309 = arith.addf %305, %308 : vector<2x252xf32>
    %c18_45 = arith.constant 18 : index
    %310 = memref.load %arg4[%c18_45] : memref<200xf32, #tpu.memory_space<smem>>
    %311 = vector.broadcast %310 : f32 to vector<2x252xf32>
    %312 = arith.mulf %189, %311 : vector<2x252xf32>
    %313 = arith.addf %309, %312 : vector<2x252xf32>
    %c23_46 = arith.constant 23 : index
    %314 = memref.load %arg4[%c23_46] : memref<200xf32, #tpu.memory_space<smem>>
    %315 = vector.broadcast %314 : f32 to vector<2x252xf32>
    %316 = arith.mulf %191, %315 : vector<2x252xf32>
    %317 = arith.addf %313, %316 : vector<2x252xf32>
    %c28_47 = arith.constant 28 : index
    %318 = memref.load %arg4[%c28_47] : memref<200xf32, #tpu.memory_space<smem>>
    %319 = vector.broadcast %318 : f32 to vector<2x252xf32>
    %320 = arith.mulf %193, %319 : vector<2x252xf32>
    %321 = arith.addf %317, %320 : vector<2x252xf32>
    %c33_48 = arith.constant 33 : index
    %322 = memref.load %arg4[%c33_48] : memref<200xf32, #tpu.memory_space<smem>>
    %323 = vector.broadcast %322 : f32 to vector<2x252xf32>
    %324 = arith.mulf %195, %323 : vector<2x252xf32>
    %325 = arith.addf %321, %324 : vector<2x252xf32>
    %c38_49 = arith.constant 38 : index
    %326 = memref.load %arg4[%c38_49] : memref<200xf32, #tpu.memory_space<smem>>
    %327 = vector.broadcast %326 : f32 to vector<2x252xf32>
    %328 = arith.mulf %197, %327 : vector<2x252xf32>
    %329 = arith.addf %325, %328 : vector<2x252xf32>
    %330 = vector.extract_strided_slice %329 {offsets = [0, 3], sizes = [2, 248], strides = [1, 1]} : vector<2x252xf32> to vector<2x248xf32>
    %331 = arith.addf %298, %330 : vector<2x248xf32>
    %c4_50 = arith.constant 4 : index
    %332 = memref.load %arg4[%c4_50] : memref<200xf32, #tpu.memory_space<smem>>
    %333 = vector.broadcast %332 : f32 to vector<2x252xf32>
    %334 = arith.mulf %183, %333 : vector<2x252xf32>
    %c9_51 = arith.constant 9 : index
    %335 = memref.load %arg4[%c9_51] : memref<200xf32, #tpu.memory_space<smem>>
    %336 = vector.broadcast %335 : f32 to vector<2x252xf32>
    %337 = arith.mulf %185, %336 : vector<2x252xf32>
    %338 = arith.addf %334, %337 : vector<2x252xf32>
    %c14_52 = arith.constant 14 : index
    %339 = memref.load %arg4[%c14_52] : memref<200xf32, #tpu.memory_space<smem>>
    %340 = vector.broadcast %339 : f32 to vector<2x252xf32>
    %341 = arith.mulf %187, %340 : vector<2x252xf32>
    %342 = arith.addf %338, %341 : vector<2x252xf32>
    %c19_53 = arith.constant 19 : index
    %343 = memref.load %arg4[%c19_53] : memref<200xf32, #tpu.memory_space<smem>>
    %344 = vector.broadcast %343 : f32 to vector<2x252xf32>
    %345 = arith.mulf %189, %344 : vector<2x252xf32>
    %346 = arith.addf %342, %345 : vector<2x252xf32>
    %c24_54 = arith.constant 24 : index
    %347 = memref.load %arg4[%c24_54] : memref<200xf32, #tpu.memory_space<smem>>
    %348 = vector.broadcast %347 : f32 to vector<2x252xf32>
    %349 = arith.mulf %191, %348 : vector<2x252xf32>
    %350 = arith.addf %346, %349 : vector<2x252xf32>
    %c29_55 = arith.constant 29 : index
    %351 = memref.load %arg4[%c29_55] : memref<200xf32, #tpu.memory_space<smem>>
    %352 = vector.broadcast %351 : f32 to vector<2x252xf32>
    %353 = arith.mulf %193, %352 : vector<2x252xf32>
    %354 = arith.addf %350, %353 : vector<2x252xf32>
    %c34_56 = arith.constant 34 : index
    %355 = memref.load %arg4[%c34_56] : memref<200xf32, #tpu.memory_space<smem>>
    %356 = vector.broadcast %355 : f32 to vector<2x252xf32>
    %357 = arith.mulf %195, %356 : vector<2x252xf32>
    %358 = arith.addf %354, %357 : vector<2x252xf32>
    %c39_57 = arith.constant 39 : index
    %359 = memref.load %arg4[%c39_57] : memref<200xf32, #tpu.memory_space<smem>>
    %360 = vector.broadcast %359 : f32 to vector<2x252xf32>
    %361 = arith.mulf %197, %360 : vector<2x252xf32>
    %362 = arith.addf %358, %361 : vector<2x252xf32>
    %363 = vector.extract_strided_slice %362 {offsets = [0, 4], sizes = [2, 248], strides = [1, 1]} : vector<2x252xf32> to vector<2x248xf32>
    %364 = arith.addf %331, %363 : vector<2x248xf32>
    %c40 = arith.constant 40 : index
    %365 = memref.load %arg4[%c40] : memref<200xf32, #tpu.memory_space<smem>>
    %366 = vector.broadcast %365 : f32 to vector<2x252xf32>
    %367 = arith.mulf %183, %366 : vector<2x252xf32>
    %c45 = arith.constant 45 : index
    %368 = memref.load %arg4[%c45] : memref<200xf32, #tpu.memory_space<smem>>
    %369 = vector.broadcast %368 : f32 to vector<2x252xf32>
    %370 = arith.mulf %185, %369 : vector<2x252xf32>
    %371 = arith.addf %367, %370 : vector<2x252xf32>
    %c50 = arith.constant 50 : index
    %372 = memref.load %arg4[%c50] : memref<200xf32, #tpu.memory_space<smem>>
    %373 = vector.broadcast %372 : f32 to vector<2x252xf32>
    %374 = arith.mulf %187, %373 : vector<2x252xf32>
    %375 = arith.addf %371, %374 : vector<2x252xf32>
    %c55 = arith.constant 55 : index
    %376 = memref.load %arg4[%c55] : memref<200xf32, #tpu.memory_space<smem>>
    %377 = vector.broadcast %376 : f32 to vector<2x252xf32>
    %378 = arith.mulf %189, %377 : vector<2x252xf32>
    %379 = arith.addf %375, %378 : vector<2x252xf32>
    %c60 = arith.constant 60 : index
    %380 = memref.load %arg4[%c60] : memref<200xf32, #tpu.memory_space<smem>>
    %381 = vector.broadcast %380 : f32 to vector<2x252xf32>
    %382 = arith.mulf %191, %381 : vector<2x252xf32>
    %383 = arith.addf %379, %382 : vector<2x252xf32>
    %c65 = arith.constant 65 : index
    %384 = memref.load %arg4[%c65] : memref<200xf32, #tpu.memory_space<smem>>
    %385 = vector.broadcast %384 : f32 to vector<2x252xf32>
    %386 = arith.mulf %193, %385 : vector<2x252xf32>
    %387 = arith.addf %383, %386 : vector<2x252xf32>
    %c70 = arith.constant 70 : index
    %388 = memref.load %arg4[%c70] : memref<200xf32, #tpu.memory_space<smem>>
    %389 = vector.broadcast %388 : f32 to vector<2x252xf32>
    %390 = arith.mulf %195, %389 : vector<2x252xf32>
    %391 = arith.addf %387, %390 : vector<2x252xf32>
    %c75 = arith.constant 75 : index
    %392 = memref.load %arg4[%c75] : memref<200xf32, #tpu.memory_space<smem>>
    %393 = vector.broadcast %392 : f32 to vector<2x252xf32>
    %394 = arith.mulf %197, %393 : vector<2x252xf32>
    %395 = arith.addf %391, %394 : vector<2x252xf32>
    %396 = vector.extract_strided_slice %395 {offsets = [0, 0], sizes = [2, 248], strides = [1, 1]} : vector<2x252xf32> to vector<2x248xf32>
    %c1_58 = arith.constant 1 : index
    %397 = memref.load %arg5[%c1_58] : memref<5xf32, #tpu.memory_space<smem>>
    %398 = vector.broadcast %397 : f32 to vector<2x248xf32>
    %399 = arith.addf %396, %398 : vector<2x248xf32>
    %c41 = arith.constant 41 : index
    %400 = memref.load %arg4[%c41] : memref<200xf32, #tpu.memory_space<smem>>
    %401 = vector.broadcast %400 : f32 to vector<2x252xf32>
    %402 = arith.mulf %183, %401 : vector<2x252xf32>
    %c46 = arith.constant 46 : index
    %403 = memref.load %arg4[%c46] : memref<200xf32, #tpu.memory_space<smem>>
    %404 = vector.broadcast %403 : f32 to vector<2x252xf32>
    %405 = arith.mulf %185, %404 : vector<2x252xf32>
    %406 = arith.addf %402, %405 : vector<2x252xf32>
    %c51 = arith.constant 51 : index
    %407 = memref.load %arg4[%c51] : memref<200xf32, #tpu.memory_space<smem>>
    %408 = vector.broadcast %407 : f32 to vector<2x252xf32>
    %409 = arith.mulf %187, %408 : vector<2x252xf32>
    %410 = arith.addf %406, %409 : vector<2x252xf32>
    %c56 = arith.constant 56 : index
    %411 = memref.load %arg4[%c56] : memref<200xf32, #tpu.memory_space<smem>>
    %412 = vector.broadcast %411 : f32 to vector<2x252xf32>
    %413 = arith.mulf %189, %412 : vector<2x252xf32>
    %414 = arith.addf %410, %413 : vector<2x252xf32>
    %c61 = arith.constant 61 : index
    %415 = memref.load %arg4[%c61] : memref<200xf32, #tpu.memory_space<smem>>
    %416 = vector.broadcast %415 : f32 to vector<2x252xf32>
    %417 = arith.mulf %191, %416 : vector<2x252xf32>
    %418 = arith.addf %414, %417 : vector<2x252xf32>
    %c66 = arith.constant 66 : index
    %419 = memref.load %arg4[%c66] : memref<200xf32, #tpu.memory_space<smem>>
    %420 = vector.broadcast %419 : f32 to vector<2x252xf32>
    %421 = arith.mulf %193, %420 : vector<2x252xf32>
    %422 = arith.addf %418, %421 : vector<2x252xf32>
    %c71 = arith.constant 71 : index
    %423 = memref.load %arg4[%c71] : memref<200xf32, #tpu.memory_space<smem>>
    %424 = vector.broadcast %423 : f32 to vector<2x252xf32>
    %425 = arith.mulf %195, %424 : vector<2x252xf32>
    %426 = arith.addf %422, %425 : vector<2x252xf32>
    %c76 = arith.constant 76 : index
    %427 = memref.load %arg4[%c76] : memref<200xf32, #tpu.memory_space<smem>>
    %428 = vector.broadcast %427 : f32 to vector<2x252xf32>
    %429 = arith.mulf %197, %428 : vector<2x252xf32>
    %430 = arith.addf %426, %429 : vector<2x252xf32>
    %431 = vector.extract_strided_slice %430 {offsets = [0, 1], sizes = [2, 248], strides = [1, 1]} : vector<2x252xf32> to vector<2x248xf32>
    %432 = arith.addf %399, %431 : vector<2x248xf32>
    %c42 = arith.constant 42 : index
    %433 = memref.load %arg4[%c42] : memref<200xf32, #tpu.memory_space<smem>>
    %434 = vector.broadcast %433 : f32 to vector<2x252xf32>
    %435 = arith.mulf %183, %434 : vector<2x252xf32>
    %c47 = arith.constant 47 : index
    %436 = memref.load %arg4[%c47] : memref<200xf32, #tpu.memory_space<smem>>
    %437 = vector.broadcast %436 : f32 to vector<2x252xf32>
    %438 = arith.mulf %185, %437 : vector<2x252xf32>
    %439 = arith.addf %435, %438 : vector<2x252xf32>
    %c52 = arith.constant 52 : index
    %440 = memref.load %arg4[%c52] : memref<200xf32, #tpu.memory_space<smem>>
    %441 = vector.broadcast %440 : f32 to vector<2x252xf32>
    %442 = arith.mulf %187, %441 : vector<2x252xf32>
    %443 = arith.addf %439, %442 : vector<2x252xf32>
    %c57 = arith.constant 57 : index
    %444 = memref.load %arg4[%c57] : memref<200xf32, #tpu.memory_space<smem>>
    %445 = vector.broadcast %444 : f32 to vector<2x252xf32>
    %446 = arith.mulf %189, %445 : vector<2x252xf32>
    %447 = arith.addf %443, %446 : vector<2x252xf32>
    %c62 = arith.constant 62 : index
    %448 = memref.load %arg4[%c62] : memref<200xf32, #tpu.memory_space<smem>>
    %449 = vector.broadcast %448 : f32 to vector<2x252xf32>
    %450 = arith.mulf %191, %449 : vector<2x252xf32>
    %451 = arith.addf %447, %450 : vector<2x252xf32>
    %c67 = arith.constant 67 : index
    %452 = memref.load %arg4[%c67] : memref<200xf32, #tpu.memory_space<smem>>
    %453 = vector.broadcast %452 : f32 to vector<2x252xf32>
    %454 = arith.mulf %193, %453 : vector<2x252xf32>
    %455 = arith.addf %451, %454 : vector<2x252xf32>
    %c72 = arith.constant 72 : index
    %456 = memref.load %arg4[%c72] : memref<200xf32, #tpu.memory_space<smem>>
    %457 = vector.broadcast %456 : f32 to vector<2x252xf32>
    %458 = arith.mulf %195, %457 : vector<2x252xf32>
    %459 = arith.addf %455, %458 : vector<2x252xf32>
    %c77 = arith.constant 77 : index
    %460 = memref.load %arg4[%c77] : memref<200xf32, #tpu.memory_space<smem>>
    %461 = vector.broadcast %460 : f32 to vector<2x252xf32>
    %462 = arith.mulf %197, %461 : vector<2x252xf32>
    %463 = arith.addf %459, %462 : vector<2x252xf32>
    %464 = vector.extract_strided_slice %463 {offsets = [0, 2], sizes = [2, 248], strides = [1, 1]} : vector<2x252xf32> to vector<2x248xf32>
    %465 = arith.addf %432, %464 : vector<2x248xf32>
    %c43 = arith.constant 43 : index
    %466 = memref.load %arg4[%c43] : memref<200xf32, #tpu.memory_space<smem>>
    %467 = vector.broadcast %466 : f32 to vector<2x252xf32>
    %468 = arith.mulf %183, %467 : vector<2x252xf32>
    %c48 = arith.constant 48 : index
    %469 = memref.load %arg4[%c48] : memref<200xf32, #tpu.memory_space<smem>>
    %470 = vector.broadcast %469 : f32 to vector<2x252xf32>
    %471 = arith.mulf %185, %470 : vector<2x252xf32>
    %472 = arith.addf %468, %471 : vector<2x252xf32>
    %c53 = arith.constant 53 : index
    %473 = memref.load %arg4[%c53] : memref<200xf32, #tpu.memory_space<smem>>
    %474 = vector.broadcast %473 : f32 to vector<2x252xf32>
    %475 = arith.mulf %187, %474 : vector<2x252xf32>
    %476 = arith.addf %472, %475 : vector<2x252xf32>
    %c58 = arith.constant 58 : index
    %477 = memref.load %arg4[%c58] : memref<200xf32, #tpu.memory_space<smem>>
    %478 = vector.broadcast %477 : f32 to vector<2x252xf32>
    %479 = arith.mulf %189, %478 : vector<2x252xf32>
    %480 = arith.addf %476, %479 : vector<2x252xf32>
    %c63 = arith.constant 63 : index
    %481 = memref.load %arg4[%c63] : memref<200xf32, #tpu.memory_space<smem>>
    %482 = vector.broadcast %481 : f32 to vector<2x252xf32>
    %483 = arith.mulf %191, %482 : vector<2x252xf32>
    %484 = arith.addf %480, %483 : vector<2x252xf32>
    %c68 = arith.constant 68 : index
    %485 = memref.load %arg4[%c68] : memref<200xf32, #tpu.memory_space<smem>>
    %486 = vector.broadcast %485 : f32 to vector<2x252xf32>
    %487 = arith.mulf %193, %486 : vector<2x252xf32>
    %488 = arith.addf %484, %487 : vector<2x252xf32>
    %c73 = arith.constant 73 : index
    %489 = memref.load %arg4[%c73] : memref<200xf32, #tpu.memory_space<smem>>
    %490 = vector.broadcast %489 : f32 to vector<2x252xf32>
    %491 = arith.mulf %195, %490 : vector<2x252xf32>
    %492 = arith.addf %488, %491 : vector<2x252xf32>
    %c78 = arith.constant 78 : index
    %493 = memref.load %arg4[%c78] : memref<200xf32, #tpu.memory_space<smem>>
    %494 = vector.broadcast %493 : f32 to vector<2x252xf32>
    %495 = arith.mulf %197, %494 : vector<2x252xf32>
    %496 = arith.addf %492, %495 : vector<2x252xf32>
    %497 = vector.extract_strided_slice %496 {offsets = [0, 3], sizes = [2, 248], strides = [1, 1]} : vector<2x252xf32> to vector<2x248xf32>
    %498 = arith.addf %465, %497 : vector<2x248xf32>
    %c44 = arith.constant 44 : index
    %499 = memref.load %arg4[%c44] : memref<200xf32, #tpu.memory_space<smem>>
    %500 = vector.broadcast %499 : f32 to vector<2x252xf32>
    %501 = arith.mulf %183, %500 : vector<2x252xf32>
    %c49 = arith.constant 49 : index
    %502 = memref.load %arg4[%c49] : memref<200xf32, #tpu.memory_space<smem>>
    %503 = vector.broadcast %502 : f32 to vector<2x252xf32>
    %504 = arith.mulf %185, %503 : vector<2x252xf32>
    %505 = arith.addf %501, %504 : vector<2x252xf32>
    %c54 = arith.constant 54 : index
    %506 = memref.load %arg4[%c54] : memref<200xf32, #tpu.memory_space<smem>>
    %507 = vector.broadcast %506 : f32 to vector<2x252xf32>
    %508 = arith.mulf %187, %507 : vector<2x252xf32>
    %509 = arith.addf %505, %508 : vector<2x252xf32>
    %c59 = arith.constant 59 : index
    %510 = memref.load %arg4[%c59] : memref<200xf32, #tpu.memory_space<smem>>
    %511 = vector.broadcast %510 : f32 to vector<2x252xf32>
    %512 = arith.mulf %189, %511 : vector<2x252xf32>
    %513 = arith.addf %509, %512 : vector<2x252xf32>
    %c64 = arith.constant 64 : index
    %514 = memref.load %arg4[%c64] : memref<200xf32, #tpu.memory_space<smem>>
    %515 = vector.broadcast %514 : f32 to vector<2x252xf32>
    %516 = arith.mulf %191, %515 : vector<2x252xf32>
    %517 = arith.addf %513, %516 : vector<2x252xf32>
    %c69 = arith.constant 69 : index
    %518 = memref.load %arg4[%c69] : memref<200xf32, #tpu.memory_space<smem>>
    %519 = vector.broadcast %518 : f32 to vector<2x252xf32>
    %520 = arith.mulf %193, %519 : vector<2x252xf32>
    %521 = arith.addf %517, %520 : vector<2x252xf32>
    %c74 = arith.constant 74 : index
    %522 = memref.load %arg4[%c74] : memref<200xf32, #tpu.memory_space<smem>>
    %523 = vector.broadcast %522 : f32 to vector<2x252xf32>
    %524 = arith.mulf %195, %523 : vector<2x252xf32>
    %525 = arith.addf %521, %524 : vector<2x252xf32>
    %c79 = arith.constant 79 : index
    %526 = memref.load %arg4[%c79] : memref<200xf32, #tpu.memory_space<smem>>
    %527 = vector.broadcast %526 : f32 to vector<2x252xf32>
    %528 = arith.mulf %197, %527 : vector<2x252xf32>
    %529 = arith.addf %525, %528 : vector<2x252xf32>
    %530 = vector.extract_strided_slice %529 {offsets = [0, 4], sizes = [2, 248], strides = [1, 1]} : vector<2x252xf32> to vector<2x248xf32>
    %531 = arith.addf %498, %530 : vector<2x248xf32>
    %c80 = arith.constant 80 : index
    %532 = memref.load %arg4[%c80] : memref<200xf32, #tpu.memory_space<smem>>
    %533 = vector.broadcast %532 : f32 to vector<2x252xf32>
    %534 = arith.mulf %183, %533 : vector<2x252xf32>
    %c85 = arith.constant 85 : index
    %535 = memref.load %arg4[%c85] : memref<200xf32, #tpu.memory_space<smem>>
    %536 = vector.broadcast %535 : f32 to vector<2x252xf32>
    %537 = arith.mulf %185, %536 : vector<2x252xf32>
    %538 = arith.addf %534, %537 : vector<2x252xf32>
    %c90 = arith.constant 90 : index
    %539 = memref.load %arg4[%c90] : memref<200xf32, #tpu.memory_space<smem>>
    %540 = vector.broadcast %539 : f32 to vector<2x252xf32>
    %541 = arith.mulf %187, %540 : vector<2x252xf32>
    %542 = arith.addf %538, %541 : vector<2x252xf32>
    %c95 = arith.constant 95 : index
    %543 = memref.load %arg4[%c95] : memref<200xf32, #tpu.memory_space<smem>>
    %544 = vector.broadcast %543 : f32 to vector<2x252xf32>
    %545 = arith.mulf %189, %544 : vector<2x252xf32>
    %546 = arith.addf %542, %545 : vector<2x252xf32>
    %c100 = arith.constant 100 : index
    %547 = memref.load %arg4[%c100] : memref<200xf32, #tpu.memory_space<smem>>
    %548 = vector.broadcast %547 : f32 to vector<2x252xf32>
    %549 = arith.mulf %191, %548 : vector<2x252xf32>
    %550 = arith.addf %546, %549 : vector<2x252xf32>
    %c105 = arith.constant 105 : index
    %551 = memref.load %arg4[%c105] : memref<200xf32, #tpu.memory_space<smem>>
    %552 = vector.broadcast %551 : f32 to vector<2x252xf32>
    %553 = arith.mulf %193, %552 : vector<2x252xf32>
    %554 = arith.addf %550, %553 : vector<2x252xf32>
    %c110 = arith.constant 110 : index
    %555 = memref.load %arg4[%c110] : memref<200xf32, #tpu.memory_space<smem>>
    %556 = vector.broadcast %555 : f32 to vector<2x252xf32>
    %557 = arith.mulf %195, %556 : vector<2x252xf32>
    %558 = arith.addf %554, %557 : vector<2x252xf32>
    %c115 = arith.constant 115 : index
    %559 = memref.load %arg4[%c115] : memref<200xf32, #tpu.memory_space<smem>>
    %560 = vector.broadcast %559 : f32 to vector<2x252xf32>
    %561 = arith.mulf %197, %560 : vector<2x252xf32>
    %562 = arith.addf %558, %561 : vector<2x252xf32>
    %563 = vector.extract_strided_slice %562 {offsets = [0, 0], sizes = [2, 248], strides = [1, 1]} : vector<2x252xf32> to vector<2x248xf32>
    %c2_59 = arith.constant 2 : index
    %564 = memref.load %arg5[%c2_59] : memref<5xf32, #tpu.memory_space<smem>>
    %565 = vector.broadcast %564 : f32 to vector<2x248xf32>
    %566 = arith.addf %563, %565 : vector<2x248xf32>
    %c81 = arith.constant 81 : index
    %567 = memref.load %arg4[%c81] : memref<200xf32, #tpu.memory_space<smem>>
    %568 = vector.broadcast %567 : f32 to vector<2x252xf32>
    %569 = arith.mulf %183, %568 : vector<2x252xf32>
    %c86 = arith.constant 86 : index
    %570 = memref.load %arg4[%c86] : memref<200xf32, #tpu.memory_space<smem>>
    %571 = vector.broadcast %570 : f32 to vector<2x252xf32>
    %572 = arith.mulf %185, %571 : vector<2x252xf32>
    %573 = arith.addf %569, %572 : vector<2x252xf32>
    %c91 = arith.constant 91 : index
    %574 = memref.load %arg4[%c91] : memref<200xf32, #tpu.memory_space<smem>>
    %575 = vector.broadcast %574 : f32 to vector<2x252xf32>
    %576 = arith.mulf %187, %575 : vector<2x252xf32>
    %577 = arith.addf %573, %576 : vector<2x252xf32>
    %c96 = arith.constant 96 : index
    %578 = memref.load %arg4[%c96] : memref<200xf32, #tpu.memory_space<smem>>
    %579 = vector.broadcast %578 : f32 to vector<2x252xf32>
    %580 = arith.mulf %189, %579 : vector<2x252xf32>
    %581 = arith.addf %577, %580 : vector<2x252xf32>
    %c101 = arith.constant 101 : index
    %582 = memref.load %arg4[%c101] : memref<200xf32, #tpu.memory_space<smem>>
    %583 = vector.broadcast %582 : f32 to vector<2x252xf32>
    %584 = arith.mulf %191, %583 : vector<2x252xf32>
    %585 = arith.addf %581, %584 : vector<2x252xf32>
    %c106 = arith.constant 106 : index
    %586 = memref.load %arg4[%c106] : memref<200xf32, #tpu.memory_space<smem>>
    %587 = vector.broadcast %586 : f32 to vector<2x252xf32>
    %588 = arith.mulf %193, %587 : vector<2x252xf32>
    %589 = arith.addf %585, %588 : vector<2x252xf32>
    %c111 = arith.constant 111 : index
    %590 = memref.load %arg4[%c111] : memref<200xf32, #tpu.memory_space<smem>>
    %591 = vector.broadcast %590 : f32 to vector<2x252xf32>
    %592 = arith.mulf %195, %591 : vector<2x252xf32>
    %593 = arith.addf %589, %592 : vector<2x252xf32>
    %c116 = arith.constant 116 : index
    %594 = memref.load %arg4[%c116] : memref<200xf32, #tpu.memory_space<smem>>
    %595 = vector.broadcast %594 : f32 to vector<2x252xf32>
    %596 = arith.mulf %197, %595 : vector<2x252xf32>
    %597 = arith.addf %593, %596 : vector<2x252xf32>
    %598 = vector.extract_strided_slice %597 {offsets = [0, 1], sizes = [2, 248], strides = [1, 1]} : vector<2x252xf32> to vector<2x248xf32>
    %599 = arith.addf %566, %598 : vector<2x248xf32>
    %c82 = arith.constant 82 : index
    %600 = memref.load %arg4[%c82] : memref<200xf32, #tpu.memory_space<smem>>
    %601 = vector.broadcast %600 : f32 to vector<2x252xf32>
    %602 = arith.mulf %183, %601 : vector<2x252xf32>
    %c87 = arith.constant 87 : index
    %603 = memref.load %arg4[%c87] : memref<200xf32, #tpu.memory_space<smem>>
    %604 = vector.broadcast %603 : f32 to vector<2x252xf32>
    %605 = arith.mulf %185, %604 : vector<2x252xf32>
    %606 = arith.addf %602, %605 : vector<2x252xf32>
    %c92 = arith.constant 92 : index
    %607 = memref.load %arg4[%c92] : memref<200xf32, #tpu.memory_space<smem>>
    %608 = vector.broadcast %607 : f32 to vector<2x252xf32>
    %609 = arith.mulf %187, %608 : vector<2x252xf32>
    %610 = arith.addf %606, %609 : vector<2x252xf32>
    %c97 = arith.constant 97 : index
    %611 = memref.load %arg4[%c97] : memref<200xf32, #tpu.memory_space<smem>>
    %612 = vector.broadcast %611 : f32 to vector<2x252xf32>
    %613 = arith.mulf %189, %612 : vector<2x252xf32>
    %614 = arith.addf %610, %613 : vector<2x252xf32>
    %c102 = arith.constant 102 : index
    %615 = memref.load %arg4[%c102] : memref<200xf32, #tpu.memory_space<smem>>
    %616 = vector.broadcast %615 : f32 to vector<2x252xf32>
    %617 = arith.mulf %191, %616 : vector<2x252xf32>
    %618 = arith.addf %614, %617 : vector<2x252xf32>
    %c107 = arith.constant 107 : index
    %619 = memref.load %arg4[%c107] : memref<200xf32, #tpu.memory_space<smem>>
    %620 = vector.broadcast %619 : f32 to vector<2x252xf32>
    %621 = arith.mulf %193, %620 : vector<2x252xf32>
    %622 = arith.addf %618, %621 : vector<2x252xf32>
    %c112 = arith.constant 112 : index
    %623 = memref.load %arg4[%c112] : memref<200xf32, #tpu.memory_space<smem>>
    %624 = vector.broadcast %623 : f32 to vector<2x252xf32>
    %625 = arith.mulf %195, %624 : vector<2x252xf32>
    %626 = arith.addf %622, %625 : vector<2x252xf32>
    %c117 = arith.constant 117 : index
    %627 = memref.load %arg4[%c117] : memref<200xf32, #tpu.memory_space<smem>>
    %628 = vector.broadcast %627 : f32 to vector<2x252xf32>
    %629 = arith.mulf %197, %628 : vector<2x252xf32>
    %630 = arith.addf %626, %629 : vector<2x252xf32>
    %631 = vector.extract_strided_slice %630 {offsets = [0, 2], sizes = [2, 248], strides = [1, 1]} : vector<2x252xf32> to vector<2x248xf32>
    %632 = arith.addf %599, %631 : vector<2x248xf32>
    %c83 = arith.constant 83 : index
    %633 = memref.load %arg4[%c83] : memref<200xf32, #tpu.memory_space<smem>>
    %634 = vector.broadcast %633 : f32 to vector<2x252xf32>
    %635 = arith.mulf %183, %634 : vector<2x252xf32>
    %c88 = arith.constant 88 : index
    %636 = memref.load %arg4[%c88] : memref<200xf32, #tpu.memory_space<smem>>
    %637 = vector.broadcast %636 : f32 to vector<2x252xf32>
    %638 = arith.mulf %185, %637 : vector<2x252xf32>
    %639 = arith.addf %635, %638 : vector<2x252xf32>
    %c93 = arith.constant 93 : index
    %640 = memref.load %arg4[%c93] : memref<200xf32, #tpu.memory_space<smem>>
    %641 = vector.broadcast %640 : f32 to vector<2x252xf32>
    %642 = arith.mulf %187, %641 : vector<2x252xf32>
    %643 = arith.addf %639, %642 : vector<2x252xf32>
    %c98 = arith.constant 98 : index
    %644 = memref.load %arg4[%c98] : memref<200xf32, #tpu.memory_space<smem>>
    %645 = vector.broadcast %644 : f32 to vector<2x252xf32>
    %646 = arith.mulf %189, %645 : vector<2x252xf32>
    %647 = arith.addf %643, %646 : vector<2x252xf32>
    %c103 = arith.constant 103 : index
    %648 = memref.load %arg4[%c103] : memref<200xf32, #tpu.memory_space<smem>>
    %649 = vector.broadcast %648 : f32 to vector<2x252xf32>
    %650 = arith.mulf %191, %649 : vector<2x252xf32>
    %651 = arith.addf %647, %650 : vector<2x252xf32>
    %c108 = arith.constant 108 : index
    %652 = memref.load %arg4[%c108] : memref<200xf32, #tpu.memory_space<smem>>
    %653 = vector.broadcast %652 : f32 to vector<2x252xf32>
    %654 = arith.mulf %193, %653 : vector<2x252xf32>
    %655 = arith.addf %651, %654 : vector<2x252xf32>
    %c113 = arith.constant 113 : index
    %656 = memref.load %arg4[%c113] : memref<200xf32, #tpu.memory_space<smem>>
    %657 = vector.broadcast %656 : f32 to vector<2x252xf32>
    %658 = arith.mulf %195, %657 : vector<2x252xf32>
    %659 = arith.addf %655, %658 : vector<2x252xf32>
    %c118 = arith.constant 118 : index
    %660 = memref.load %arg4[%c118] : memref<200xf32, #tpu.memory_space<smem>>
    %661 = vector.broadcast %660 : f32 to vector<2x252xf32>
    %662 = arith.mulf %197, %661 : vector<2x252xf32>
    %663 = arith.addf %659, %662 : vector<2x252xf32>
    %664 = vector.extract_strided_slice %663 {offsets = [0, 3], sizes = [2, 248], strides = [1, 1]} : vector<2x252xf32> to vector<2x248xf32>
    %665 = arith.addf %632, %664 : vector<2x248xf32>
    %c84 = arith.constant 84 : index
    %666 = memref.load %arg4[%c84] : memref<200xf32, #tpu.memory_space<smem>>
    %667 = vector.broadcast %666 : f32 to vector<2x252xf32>
    %668 = arith.mulf %183, %667 : vector<2x252xf32>
    %c89 = arith.constant 89 : index
    %669 = memref.load %arg4[%c89] : memref<200xf32, #tpu.memory_space<smem>>
    %670 = vector.broadcast %669 : f32 to vector<2x252xf32>
    %671 = arith.mulf %185, %670 : vector<2x252xf32>
    %672 = arith.addf %668, %671 : vector<2x252xf32>
    %c94 = arith.constant 94 : index
    %673 = memref.load %arg4[%c94] : memref<200xf32, #tpu.memory_space<smem>>
    %674 = vector.broadcast %673 : f32 to vector<2x252xf32>
    %675 = arith.mulf %187, %674 : vector<2x252xf32>
    %676 = arith.addf %672, %675 : vector<2x252xf32>
    %c99 = arith.constant 99 : index
    %677 = memref.load %arg4[%c99] : memref<200xf32, #tpu.memory_space<smem>>
    %678 = vector.broadcast %677 : f32 to vector<2x252xf32>
    %679 = arith.mulf %189, %678 : vector<2x252xf32>
    %680 = arith.addf %676, %679 : vector<2x252xf32>
    %c104 = arith.constant 104 : index
    %681 = memref.load %arg4[%c104] : memref<200xf32, #tpu.memory_space<smem>>
    %682 = vector.broadcast %681 : f32 to vector<2x252xf32>
    %683 = arith.mulf %191, %682 : vector<2x252xf32>
    %684 = arith.addf %680, %683 : vector<2x252xf32>
    %c109 = arith.constant 109 : index
    %685 = memref.load %arg4[%c109] : memref<200xf32, #tpu.memory_space<smem>>
    %686 = vector.broadcast %685 : f32 to vector<2x252xf32>
    %687 = arith.mulf %193, %686 : vector<2x252xf32>
    %688 = arith.addf %684, %687 : vector<2x252xf32>
    %c114 = arith.constant 114 : index
    %689 = memref.load %arg4[%c114] : memref<200xf32, #tpu.memory_space<smem>>
    %690 = vector.broadcast %689 : f32 to vector<2x252xf32>
    %691 = arith.mulf %195, %690 : vector<2x252xf32>
    %692 = arith.addf %688, %691 : vector<2x252xf32>
    %c119 = arith.constant 119 : index
    %693 = memref.load %arg4[%c119] : memref<200xf32, #tpu.memory_space<smem>>
    %694 = vector.broadcast %693 : f32 to vector<2x252xf32>
    %695 = arith.mulf %197, %694 : vector<2x252xf32>
    %696 = arith.addf %692, %695 : vector<2x252xf32>
    %697 = vector.extract_strided_slice %696 {offsets = [0, 4], sizes = [2, 248], strides = [1, 1]} : vector<2x252xf32> to vector<2x248xf32>
    %698 = arith.addf %665, %697 : vector<2x248xf32>
    %c120 = arith.constant 120 : index
    %699 = memref.load %arg4[%c120] : memref<200xf32, #tpu.memory_space<smem>>
    %700 = vector.broadcast %699 : f32 to vector<2x252xf32>
    %701 = arith.mulf %183, %700 : vector<2x252xf32>
    %c125 = arith.constant 125 : index
    %702 = memref.load %arg4[%c125] : memref<200xf32, #tpu.memory_space<smem>>
    %703 = vector.broadcast %702 : f32 to vector<2x252xf32>
    %704 = arith.mulf %185, %703 : vector<2x252xf32>
    %705 = arith.addf %701, %704 : vector<2x252xf32>
    %c130 = arith.constant 130 : index
    %706 = memref.load %arg4[%c130] : memref<200xf32, #tpu.memory_space<smem>>
    %707 = vector.broadcast %706 : f32 to vector<2x252xf32>
    %708 = arith.mulf %187, %707 : vector<2x252xf32>
    %709 = arith.addf %705, %708 : vector<2x252xf32>
    %c135 = arith.constant 135 : index
    %710 = memref.load %arg4[%c135] : memref<200xf32, #tpu.memory_space<smem>>
    %711 = vector.broadcast %710 : f32 to vector<2x252xf32>
    %712 = arith.mulf %189, %711 : vector<2x252xf32>
    %713 = arith.addf %709, %712 : vector<2x252xf32>
    %c140 = arith.constant 140 : index
    %714 = memref.load %arg4[%c140] : memref<200xf32, #tpu.memory_space<smem>>
    %715 = vector.broadcast %714 : f32 to vector<2x252xf32>
    %716 = arith.mulf %191, %715 : vector<2x252xf32>
    %717 = arith.addf %713, %716 : vector<2x252xf32>
    %c145 = arith.constant 145 : index
    %718 = memref.load %arg4[%c145] : memref<200xf32, #tpu.memory_space<smem>>
    %719 = vector.broadcast %718 : f32 to vector<2x252xf32>
    %720 = arith.mulf %193, %719 : vector<2x252xf32>
    %721 = arith.addf %717, %720 : vector<2x252xf32>
    %c150 = arith.constant 150 : index
    %722 = memref.load %arg4[%c150] : memref<200xf32, #tpu.memory_space<smem>>
    %723 = vector.broadcast %722 : f32 to vector<2x252xf32>
    %724 = arith.mulf %195, %723 : vector<2x252xf32>
    %725 = arith.addf %721, %724 : vector<2x252xf32>
    %c155 = arith.constant 155 : index
    %726 = memref.load %arg4[%c155] : memref<200xf32, #tpu.memory_space<smem>>
    %727 = vector.broadcast %726 : f32 to vector<2x252xf32>
    %728 = arith.mulf %197, %727 : vector<2x252xf32>
    %729 = arith.addf %725, %728 : vector<2x252xf32>
    %730 = vector.extract_strided_slice %729 {offsets = [0, 0], sizes = [2, 248], strides = [1, 1]} : vector<2x252xf32> to vector<2x248xf32>
    %c3_60 = arith.constant 3 : index
    %731 = memref.load %arg5[%c3_60] : memref<5xf32, #tpu.memory_space<smem>>
    %732 = vector.broadcast %731 : f32 to vector<2x248xf32>
    %733 = arith.addf %730, %732 : vector<2x248xf32>
    %c121 = arith.constant 121 : index
    %734 = memref.load %arg4[%c121] : memref<200xf32, #tpu.memory_space<smem>>
    %735 = vector.broadcast %734 : f32 to vector<2x252xf32>
    %736 = arith.mulf %183, %735 : vector<2x252xf32>
    %c126 = arith.constant 126 : index
    %737 = memref.load %arg4[%c126] : memref<200xf32, #tpu.memory_space<smem>>
    %738 = vector.broadcast %737 : f32 to vector<2x252xf32>
    %739 = arith.mulf %185, %738 : vector<2x252xf32>
    %740 = arith.addf %736, %739 : vector<2x252xf32>
    %c131 = arith.constant 131 : index
    %741 = memref.load %arg4[%c131] : memref<200xf32, #tpu.memory_space<smem>>
    %742 = vector.broadcast %741 : f32 to vector<2x252xf32>
    %743 = arith.mulf %187, %742 : vector<2x252xf32>
    %744 = arith.addf %740, %743 : vector<2x252xf32>
    %c136 = arith.constant 136 : index
    %745 = memref.load %arg4[%c136] : memref<200xf32, #tpu.memory_space<smem>>
    %746 = vector.broadcast %745 : f32 to vector<2x252xf32>
    %747 = arith.mulf %189, %746 : vector<2x252xf32>
    %748 = arith.addf %744, %747 : vector<2x252xf32>
    %c141 = arith.constant 141 : index
    %749 = memref.load %arg4[%c141] : memref<200xf32, #tpu.memory_space<smem>>
    %750 = vector.broadcast %749 : f32 to vector<2x252xf32>
    %751 = arith.mulf %191, %750 : vector<2x252xf32>
    %752 = arith.addf %748, %751 : vector<2x252xf32>
    %c146 = arith.constant 146 : index
    %753 = memref.load %arg4[%c146] : memref<200xf32, #tpu.memory_space<smem>>
    %754 = vector.broadcast %753 : f32 to vector<2x252xf32>
    %755 = arith.mulf %193, %754 : vector<2x252xf32>
    %756 = arith.addf %752, %755 : vector<2x252xf32>
    %c151 = arith.constant 151 : index
    %757 = memref.load %arg4[%c151] : memref<200xf32, #tpu.memory_space<smem>>
    %758 = vector.broadcast %757 : f32 to vector<2x252xf32>
    %759 = arith.mulf %195, %758 : vector<2x252xf32>
    %760 = arith.addf %756, %759 : vector<2x252xf32>
    %c156 = arith.constant 156 : index
    %761 = memref.load %arg4[%c156] : memref<200xf32, #tpu.memory_space<smem>>
    %762 = vector.broadcast %761 : f32 to vector<2x252xf32>
    %763 = arith.mulf %197, %762 : vector<2x252xf32>
    %764 = arith.addf %760, %763 : vector<2x252xf32>
    %765 = vector.extract_strided_slice %764 {offsets = [0, 1], sizes = [2, 248], strides = [1, 1]} : vector<2x252xf32> to vector<2x248xf32>
    %766 = arith.addf %733, %765 : vector<2x248xf32>
    %c122 = arith.constant 122 : index
    %767 = memref.load %arg4[%c122] : memref<200xf32, #tpu.memory_space<smem>>
    %768 = vector.broadcast %767 : f32 to vector<2x252xf32>
    %769 = arith.mulf %183, %768 : vector<2x252xf32>
    %c127 = arith.constant 127 : index
    %770 = memref.load %arg4[%c127] : memref<200xf32, #tpu.memory_space<smem>>
    %771 = vector.broadcast %770 : f32 to vector<2x252xf32>
    %772 = arith.mulf %185, %771 : vector<2x252xf32>
    %773 = arith.addf %769, %772 : vector<2x252xf32>
    %c132 = arith.constant 132 : index
    %774 = memref.load %arg4[%c132] : memref<200xf32, #tpu.memory_space<smem>>
    %775 = vector.broadcast %774 : f32 to vector<2x252xf32>
    %776 = arith.mulf %187, %775 : vector<2x252xf32>
    %777 = arith.addf %773, %776 : vector<2x252xf32>
    %c137 = arith.constant 137 : index
    %778 = memref.load %arg4[%c137] : memref<200xf32, #tpu.memory_space<smem>>
    %779 = vector.broadcast %778 : f32 to vector<2x252xf32>
    %780 = arith.mulf %189, %779 : vector<2x252xf32>
    %781 = arith.addf %777, %780 : vector<2x252xf32>
    %c142 = arith.constant 142 : index
    %782 = memref.load %arg4[%c142] : memref<200xf32, #tpu.memory_space<smem>>
    %783 = vector.broadcast %782 : f32 to vector<2x252xf32>
    %784 = arith.mulf %191, %783 : vector<2x252xf32>
    %785 = arith.addf %781, %784 : vector<2x252xf32>
    %c147 = arith.constant 147 : index
    %786 = memref.load %arg4[%c147] : memref<200xf32, #tpu.memory_space<smem>>
    %787 = vector.broadcast %786 : f32 to vector<2x252xf32>
    %788 = arith.mulf %193, %787 : vector<2x252xf32>
    %789 = arith.addf %785, %788 : vector<2x252xf32>
    %c152 = arith.constant 152 : index
    %790 = memref.load %arg4[%c152] : memref<200xf32, #tpu.memory_space<smem>>
    %791 = vector.broadcast %790 : f32 to vector<2x252xf32>
    %792 = arith.mulf %195, %791 : vector<2x252xf32>
    %793 = arith.addf %789, %792 : vector<2x252xf32>
    %c157 = arith.constant 157 : index
    %794 = memref.load %arg4[%c157] : memref<200xf32, #tpu.memory_space<smem>>
    %795 = vector.broadcast %794 : f32 to vector<2x252xf32>
    %796 = arith.mulf %197, %795 : vector<2x252xf32>
    %797 = arith.addf %793, %796 : vector<2x252xf32>
    %798 = vector.extract_strided_slice %797 {offsets = [0, 2], sizes = [2, 248], strides = [1, 1]} : vector<2x252xf32> to vector<2x248xf32>
    %799 = arith.addf %766, %798 : vector<2x248xf32>
    %c123 = arith.constant 123 : index
    %800 = memref.load %arg4[%c123] : memref<200xf32, #tpu.memory_space<smem>>
    %801 = vector.broadcast %800 : f32 to vector<2x252xf32>
    %802 = arith.mulf %183, %801 : vector<2x252xf32>
    %c128 = arith.constant 128 : index
    %803 = memref.load %arg4[%c128] : memref<200xf32, #tpu.memory_space<smem>>
    %804 = vector.broadcast %803 : f32 to vector<2x252xf32>
    %805 = arith.mulf %185, %804 : vector<2x252xf32>
    %806 = arith.addf %802, %805 : vector<2x252xf32>
    %c133 = arith.constant 133 : index
    %807 = memref.load %arg4[%c133] : memref<200xf32, #tpu.memory_space<smem>>
    %808 = vector.broadcast %807 : f32 to vector<2x252xf32>
    %809 = arith.mulf %187, %808 : vector<2x252xf32>
    %810 = arith.addf %806, %809 : vector<2x252xf32>
    %c138 = arith.constant 138 : index
    %811 = memref.load %arg4[%c138] : memref<200xf32, #tpu.memory_space<smem>>
    %812 = vector.broadcast %811 : f32 to vector<2x252xf32>
    %813 = arith.mulf %189, %812 : vector<2x252xf32>
    %814 = arith.addf %810, %813 : vector<2x252xf32>
    %c143 = arith.constant 143 : index
    %815 = memref.load %arg4[%c143] : memref<200xf32, #tpu.memory_space<smem>>
    %816 = vector.broadcast %815 : f32 to vector<2x252xf32>
    %817 = arith.mulf %191, %816 : vector<2x252xf32>
    %818 = arith.addf %814, %817 : vector<2x252xf32>
    %c148 = arith.constant 148 : index
    %819 = memref.load %arg4[%c148] : memref<200xf32, #tpu.memory_space<smem>>
    %820 = vector.broadcast %819 : f32 to vector<2x252xf32>
    %821 = arith.mulf %193, %820 : vector<2x252xf32>
    %822 = arith.addf %818, %821 : vector<2x252xf32>
    %c153 = arith.constant 153 : index
    %823 = memref.load %arg4[%c153] : memref<200xf32, #tpu.memory_space<smem>>
    %824 = vector.broadcast %823 : f32 to vector<2x252xf32>
    %825 = arith.mulf %195, %824 : vector<2x252xf32>
    %826 = arith.addf %822, %825 : vector<2x252xf32>
    %c158 = arith.constant 158 : index
    %827 = memref.load %arg4[%c158] : memref<200xf32, #tpu.memory_space<smem>>
    %828 = vector.broadcast %827 : f32 to vector<2x252xf32>
    %829 = arith.mulf %197, %828 : vector<2x252xf32>
    %830 = arith.addf %826, %829 : vector<2x252xf32>
    %831 = vector.extract_strided_slice %830 {offsets = [0, 3], sizes = [2, 248], strides = [1, 1]} : vector<2x252xf32> to vector<2x248xf32>
    %832 = arith.addf %799, %831 : vector<2x248xf32>
    %c124 = arith.constant 124 : index
    %833 = memref.load %arg4[%c124] : memref<200xf32, #tpu.memory_space<smem>>
    %834 = vector.broadcast %833 : f32 to vector<2x252xf32>
    %835 = arith.mulf %183, %834 : vector<2x252xf32>
    %c129 = arith.constant 129 : index
    %836 = memref.load %arg4[%c129] : memref<200xf32, #tpu.memory_space<smem>>
    %837 = vector.broadcast %836 : f32 to vector<2x252xf32>
    %838 = arith.mulf %185, %837 : vector<2x252xf32>
    %839 = arith.addf %835, %838 : vector<2x252xf32>
    %c134 = arith.constant 134 : index
    %840 = memref.load %arg4[%c134] : memref<200xf32, #tpu.memory_space<smem>>
    %841 = vector.broadcast %840 : f32 to vector<2x252xf32>
    %842 = arith.mulf %187, %841 : vector<2x252xf32>
    %843 = arith.addf %839, %842 : vector<2x252xf32>
    %c139 = arith.constant 139 : index
    %844 = memref.load %arg4[%c139] : memref<200xf32, #tpu.memory_space<smem>>
    %845 = vector.broadcast %844 : f32 to vector<2x252xf32>
    %846 = arith.mulf %189, %845 : vector<2x252xf32>
    %847 = arith.addf %843, %846 : vector<2x252xf32>
    %c144 = arith.constant 144 : index
    %848 = memref.load %arg4[%c144] : memref<200xf32, #tpu.memory_space<smem>>
    %849 = vector.broadcast %848 : f32 to vector<2x252xf32>
    %850 = arith.mulf %191, %849 : vector<2x252xf32>
    %851 = arith.addf %847, %850 : vector<2x252xf32>
    %c149 = arith.constant 149 : index
    %852 = memref.load %arg4[%c149] : memref<200xf32, #tpu.memory_space<smem>>
    %853 = vector.broadcast %852 : f32 to vector<2x252xf32>
    %854 = arith.mulf %193, %853 : vector<2x252xf32>
    %855 = arith.addf %851, %854 : vector<2x252xf32>
    %c154 = arith.constant 154 : index
    %856 = memref.load %arg4[%c154] : memref<200xf32, #tpu.memory_space<smem>>
    %857 = vector.broadcast %856 : f32 to vector<2x252xf32>
    %858 = arith.mulf %195, %857 : vector<2x252xf32>
    %859 = arith.addf %855, %858 : vector<2x252xf32>
    %c159 = arith.constant 159 : index
    %860 = memref.load %arg4[%c159] : memref<200xf32, #tpu.memory_space<smem>>
    %861 = vector.broadcast %860 : f32 to vector<2x252xf32>
    %862 = arith.mulf %197, %861 : vector<2x252xf32>
    %863 = arith.addf %859, %862 : vector<2x252xf32>
    %864 = vector.extract_strided_slice %863 {offsets = [0, 4], sizes = [2, 248], strides = [1, 1]} : vector<2x252xf32> to vector<2x248xf32>
    %865 = arith.addf %832, %864 : vector<2x248xf32>
    %c160 = arith.constant 160 : index
    %866 = memref.load %arg4[%c160] : memref<200xf32, #tpu.memory_space<smem>>
    %867 = vector.broadcast %866 : f32 to vector<2x252xf32>
    %868 = arith.mulf %183, %867 : vector<2x252xf32>
    %c165 = arith.constant 165 : index
    %869 = memref.load %arg4[%c165] : memref<200xf32, #tpu.memory_space<smem>>
    %870 = vector.broadcast %869 : f32 to vector<2x252xf32>
    %871 = arith.mulf %185, %870 : vector<2x252xf32>
    %872 = arith.addf %868, %871 : vector<2x252xf32>
    %c170 = arith.constant 170 : index
    %873 = memref.load %arg4[%c170] : memref<200xf32, #tpu.memory_space<smem>>
    %874 = vector.broadcast %873 : f32 to vector<2x252xf32>
    %875 = arith.mulf %187, %874 : vector<2x252xf32>
    %876 = arith.addf %872, %875 : vector<2x252xf32>
    %c175 = arith.constant 175 : index
    %877 = memref.load %arg4[%c175] : memref<200xf32, #tpu.memory_space<smem>>
    %878 = vector.broadcast %877 : f32 to vector<2x252xf32>
    %879 = arith.mulf %189, %878 : vector<2x252xf32>
    %880 = arith.addf %876, %879 : vector<2x252xf32>
    %c180 = arith.constant 180 : index
    %881 = memref.load %arg4[%c180] : memref<200xf32, #tpu.memory_space<smem>>
    %882 = vector.broadcast %881 : f32 to vector<2x252xf32>
    %883 = arith.mulf %191, %882 : vector<2x252xf32>
    %884 = arith.addf %880, %883 : vector<2x252xf32>
    %c185 = arith.constant 185 : index
    %885 = memref.load %arg4[%c185] : memref<200xf32, #tpu.memory_space<smem>>
    %886 = vector.broadcast %885 : f32 to vector<2x252xf32>
    %887 = arith.mulf %193, %886 : vector<2x252xf32>
    %888 = arith.addf %884, %887 : vector<2x252xf32>
    %c190 = arith.constant 190 : index
    %889 = memref.load %arg4[%c190] : memref<200xf32, #tpu.memory_space<smem>>
    %890 = vector.broadcast %889 : f32 to vector<2x252xf32>
    %891 = arith.mulf %195, %890 : vector<2x252xf32>
    %892 = arith.addf %888, %891 : vector<2x252xf32>
    %c195 = arith.constant 195 : index
    %893 = memref.load %arg4[%c195] : memref<200xf32, #tpu.memory_space<smem>>
    %894 = vector.broadcast %893 : f32 to vector<2x252xf32>
    %895 = arith.mulf %197, %894 : vector<2x252xf32>
    %896 = arith.addf %892, %895 : vector<2x252xf32>
    %897 = vector.extract_strided_slice %896 {offsets = [0, 0], sizes = [2, 248], strides = [1, 1]} : vector<2x252xf32> to vector<2x248xf32>
    %c4_61 = arith.constant 4 : index
    %898 = memref.load %arg5[%c4_61] : memref<5xf32, #tpu.memory_space<smem>>
    %899 = vector.broadcast %898 : f32 to vector<2x248xf32>
    %900 = arith.addf %897, %899 : vector<2x248xf32>
    %c161 = arith.constant 161 : index
    %901 = memref.load %arg4[%c161] : memref<200xf32, #tpu.memory_space<smem>>
    %902 = vector.broadcast %901 : f32 to vector<2x252xf32>
    %903 = arith.mulf %183, %902 : vector<2x252xf32>
    %c166 = arith.constant 166 : index
    %904 = memref.load %arg4[%c166] : memref<200xf32, #tpu.memory_space<smem>>
    %905 = vector.broadcast %904 : f32 to vector<2x252xf32>
    %906 = arith.mulf %185, %905 : vector<2x252xf32>
    %907 = arith.addf %903, %906 : vector<2x252xf32>
    %c171 = arith.constant 171 : index
    %908 = memref.load %arg4[%c171] : memref<200xf32, #tpu.memory_space<smem>>
    %909 = vector.broadcast %908 : f32 to vector<2x252xf32>
    %910 = arith.mulf %187, %909 : vector<2x252xf32>
    %911 = arith.addf %907, %910 : vector<2x252xf32>
    %c176 = arith.constant 176 : index
    %912 = memref.load %arg4[%c176] : memref<200xf32, #tpu.memory_space<smem>>
    %913 = vector.broadcast %912 : f32 to vector<2x252xf32>
    %914 = arith.mulf %189, %913 : vector<2x252xf32>
    %915 = arith.addf %911, %914 : vector<2x252xf32>
    %c181 = arith.constant 181 : index
    %916 = memref.load %arg4[%c181] : memref<200xf32, #tpu.memory_space<smem>>
    %917 = vector.broadcast %916 : f32 to vector<2x252xf32>
    %918 = arith.mulf %191, %917 : vector<2x252xf32>
    %919 = arith.addf %915, %918 : vector<2x252xf32>
    %c186 = arith.constant 186 : index
    %920 = memref.load %arg4[%c186] : memref<200xf32, #tpu.memory_space<smem>>
    %921 = vector.broadcast %920 : f32 to vector<2x252xf32>
    %922 = arith.mulf %193, %921 : vector<2x252xf32>
    %923 = arith.addf %919, %922 : vector<2x252xf32>
    %c191 = arith.constant 191 : index
    %924 = memref.load %arg4[%c191] : memref<200xf32, #tpu.memory_space<smem>>
    %925 = vector.broadcast %924 : f32 to vector<2x252xf32>
    %926 = arith.mulf %195, %925 : vector<2x252xf32>
    %927 = arith.addf %923, %926 : vector<2x252xf32>
    %c196 = arith.constant 196 : index
    %928 = memref.load %arg4[%c196] : memref<200xf32, #tpu.memory_space<smem>>
    %929 = vector.broadcast %928 : f32 to vector<2x252xf32>
    %930 = arith.mulf %197, %929 : vector<2x252xf32>
    %931 = arith.addf %927, %930 : vector<2x252xf32>
    %932 = vector.extract_strided_slice %931 {offsets = [0, 1], sizes = [2, 248], strides = [1, 1]} : vector<2x252xf32> to vector<2x248xf32>
    %933 = arith.addf %900, %932 : vector<2x248xf32>
    %c162 = arith.constant 162 : index
    %934 = memref.load %arg4[%c162] : memref<200xf32, #tpu.memory_space<smem>>
    %935 = vector.broadcast %934 : f32 to vector<2x252xf32>
    %936 = arith.mulf %183, %935 : vector<2x252xf32>
    %c167 = arith.constant 167 : index
    %937 = memref.load %arg4[%c167] : memref<200xf32, #tpu.memory_space<smem>>
    %938 = vector.broadcast %937 : f32 to vector<2x252xf32>
    %939 = arith.mulf %185, %938 : vector<2x252xf32>
    %940 = arith.addf %936, %939 : vector<2x252xf32>
    %c172 = arith.constant 172 : index
    %941 = memref.load %arg4[%c172] : memref<200xf32, #tpu.memory_space<smem>>
    %942 = vector.broadcast %941 : f32 to vector<2x252xf32>
    %943 = arith.mulf %187, %942 : vector<2x252xf32>
    %944 = arith.addf %940, %943 : vector<2x252xf32>
    %c177 = arith.constant 177 : index
    %945 = memref.load %arg4[%c177] : memref<200xf32, #tpu.memory_space<smem>>
    %946 = vector.broadcast %945 : f32 to vector<2x252xf32>
    %947 = arith.mulf %189, %946 : vector<2x252xf32>
    %948 = arith.addf %944, %947 : vector<2x252xf32>
    %c182 = arith.constant 182 : index
    %949 = memref.load %arg4[%c182] : memref<200xf32, #tpu.memory_space<smem>>
    %950 = vector.broadcast %949 : f32 to vector<2x252xf32>
    %951 = arith.mulf %191, %950 : vector<2x252xf32>
    %952 = arith.addf %948, %951 : vector<2x252xf32>
    %c187 = arith.constant 187 : index
    %953 = memref.load %arg4[%c187] : memref<200xf32, #tpu.memory_space<smem>>
    %954 = vector.broadcast %953 : f32 to vector<2x252xf32>
    %955 = arith.mulf %193, %954 : vector<2x252xf32>
    %956 = arith.addf %952, %955 : vector<2x252xf32>
    %c192 = arith.constant 192 : index
    %957 = memref.load %arg4[%c192] : memref<200xf32, #tpu.memory_space<smem>>
    %958 = vector.broadcast %957 : f32 to vector<2x252xf32>
    %959 = arith.mulf %195, %958 : vector<2x252xf32>
    %960 = arith.addf %956, %959 : vector<2x252xf32>
    %c197 = arith.constant 197 : index
    %961 = memref.load %arg4[%c197] : memref<200xf32, #tpu.memory_space<smem>>
    %962 = vector.broadcast %961 : f32 to vector<2x252xf32>
    %963 = arith.mulf %197, %962 : vector<2x252xf32>
    %964 = arith.addf %960, %963 : vector<2x252xf32>
    %965 = vector.extract_strided_slice %964 {offsets = [0, 2], sizes = [2, 248], strides = [1, 1]} : vector<2x252xf32> to vector<2x248xf32>
    %966 = arith.addf %933, %965 : vector<2x248xf32>
    %c163 = arith.constant 163 : index
    %967 = memref.load %arg4[%c163] : memref<200xf32, #tpu.memory_space<smem>>
    %968 = vector.broadcast %967 : f32 to vector<2x252xf32>
    %969 = arith.mulf %183, %968 : vector<2x252xf32>
    %c168 = arith.constant 168 : index
    %970 = memref.load %arg4[%c168] : memref<200xf32, #tpu.memory_space<smem>>
    %971 = vector.broadcast %970 : f32 to vector<2x252xf32>
    %972 = arith.mulf %185, %971 : vector<2x252xf32>
    %973 = arith.addf %969, %972 : vector<2x252xf32>
    %c173 = arith.constant 173 : index
    %974 = memref.load %arg4[%c173] : memref<200xf32, #tpu.memory_space<smem>>
    %975 = vector.broadcast %974 : f32 to vector<2x252xf32>
    %976 = arith.mulf %187, %975 : vector<2x252xf32>
    %977 = arith.addf %973, %976 : vector<2x252xf32>
    %c178 = arith.constant 178 : index
    %978 = memref.load %arg4[%c178] : memref<200xf32, #tpu.memory_space<smem>>
    %979 = vector.broadcast %978 : f32 to vector<2x252xf32>
    %980 = arith.mulf %189, %979 : vector<2x252xf32>
    %981 = arith.addf %977, %980 : vector<2x252xf32>
    %c183 = arith.constant 183 : index
    %982 = memref.load %arg4[%c183] : memref<200xf32, #tpu.memory_space<smem>>
    %983 = vector.broadcast %982 : f32 to vector<2x252xf32>
    %984 = arith.mulf %191, %983 : vector<2x252xf32>
    %985 = arith.addf %981, %984 : vector<2x252xf32>
    %c188 = arith.constant 188 : index
    %986 = memref.load %arg4[%c188] : memref<200xf32, #tpu.memory_space<smem>>
    %987 = vector.broadcast %986 : f32 to vector<2x252xf32>
    %988 = arith.mulf %193, %987 : vector<2x252xf32>
    %989 = arith.addf %985, %988 : vector<2x252xf32>
    %c193 = arith.constant 193 : index
    %990 = memref.load %arg4[%c193] : memref<200xf32, #tpu.memory_space<smem>>
    %991 = vector.broadcast %990 : f32 to vector<2x252xf32>
    %992 = arith.mulf %195, %991 : vector<2x252xf32>
    %993 = arith.addf %989, %992 : vector<2x252xf32>
    %c198 = arith.constant 198 : index
    %994 = memref.load %arg4[%c198] : memref<200xf32, #tpu.memory_space<smem>>
    %995 = vector.broadcast %994 : f32 to vector<2x252xf32>
    %996 = arith.mulf %197, %995 : vector<2x252xf32>
    %997 = arith.addf %993, %996 : vector<2x252xf32>
    %998 = vector.extract_strided_slice %997 {offsets = [0, 3], sizes = [2, 248], strides = [1, 1]} : vector<2x252xf32> to vector<2x248xf32>
    %999 = arith.addf %966, %998 : vector<2x248xf32>
    %c164 = arith.constant 164 : index
    %1000 = memref.load %arg4[%c164] : memref<200xf32, #tpu.memory_space<smem>>
    %1001 = vector.broadcast %1000 : f32 to vector<2x252xf32>
    %1002 = arith.mulf %183, %1001 : vector<2x252xf32>
    %c169 = arith.constant 169 : index
    %1003 = memref.load %arg4[%c169] : memref<200xf32, #tpu.memory_space<smem>>
    %1004 = vector.broadcast %1003 : f32 to vector<2x252xf32>
    %1005 = arith.mulf %185, %1004 : vector<2x252xf32>
    %1006 = arith.addf %1002, %1005 : vector<2x252xf32>
    %c174 = arith.constant 174 : index
    %1007 = memref.load %arg4[%c174] : memref<200xf32, #tpu.memory_space<smem>>
    %1008 = vector.broadcast %1007 : f32 to vector<2x252xf32>
    %1009 = arith.mulf %187, %1008 : vector<2x252xf32>
    %1010 = arith.addf %1006, %1009 : vector<2x252xf32>
    %c179 = arith.constant 179 : index
    %1011 = memref.load %arg4[%c179] : memref<200xf32, #tpu.memory_space<smem>>
    %1012 = vector.broadcast %1011 : f32 to vector<2x252xf32>
    %1013 = arith.mulf %189, %1012 : vector<2x252xf32>
    %1014 = arith.addf %1010, %1013 : vector<2x252xf32>
    %c184 = arith.constant 184 : index
    %1015 = memref.load %arg4[%c184] : memref<200xf32, #tpu.memory_space<smem>>
    %1016 = vector.broadcast %1015 : f32 to vector<2x252xf32>
    %1017 = arith.mulf %191, %1016 : vector<2x252xf32>
    %1018 = arith.addf %1014, %1017 : vector<2x252xf32>
    %c189 = arith.constant 189 : index
    %1019 = memref.load %arg4[%c189] : memref<200xf32, #tpu.memory_space<smem>>
    %1020 = vector.broadcast %1019 : f32 to vector<2x252xf32>
    %1021 = arith.mulf %193, %1020 : vector<2x252xf32>
    %1022 = arith.addf %1018, %1021 : vector<2x252xf32>
    %c194 = arith.constant 194 : index
    %1023 = memref.load %arg4[%c194] : memref<200xf32, #tpu.memory_space<smem>>
    %1024 = vector.broadcast %1023 : f32 to vector<2x252xf32>
    %1025 = arith.mulf %195, %1024 : vector<2x252xf32>
    %1026 = arith.addf %1022, %1025 : vector<2x252xf32>
    %c199 = arith.constant 199 : index
    %1027 = memref.load %arg4[%c199] : memref<200xf32, #tpu.memory_space<smem>>
    %1028 = vector.broadcast %1027 : f32 to vector<2x252xf32>
    %1029 = arith.mulf %197, %1028 : vector<2x252xf32>
    %1030 = arith.addf %1026, %1029 : vector<2x252xf32>
    %1031 = vector.extract_strided_slice %1030 {offsets = [0, 4], sizes = [2, 248], strides = [1, 1]} : vector<2x252xf32> to vector<2x248xf32>
    %1032 = arith.addf %999, %1031 : vector<2x248xf32>
    %cst_62 = arith.constant 0.000000e+00 : f32
    %1033 = vector.broadcast %cst_62 : f32 to vector<2x248xf32>
    %1034 = arith.maximumf %364, %1033 : vector<2x248xf32>
    %cst_63 = arith.constant 0.000000e+00 : f32
    %1035 = vector.broadcast %cst_63 : f32 to vector<2x248xf32>
    %1036 = arith.maximumf %531, %1035 : vector<2x248xf32>
    %cst_64 = arith.constant 0.000000e+00 : f32
    %1037 = vector.broadcast %cst_64 : f32 to vector<2x248xf32>
    %1038 = arith.maximumf %698, %1037 : vector<2x248xf32>
    %cst_65 = arith.constant 0.000000e+00 : f32
    %1039 = vector.broadcast %cst_65 : f32 to vector<2x248xf32>
    %1040 = arith.maximumf %865, %1039 : vector<2x248xf32>
    %cst_66 = arith.constant 0.000000e+00 : f32
    %1041 = vector.broadcast %cst_66 : f32 to vector<2x248xf32>
    %1042 = arith.maximumf %1032, %1041 : vector<2x248xf32>
    %c0_67 = arith.constant 0 : index
    %1043 = memref.load %arg6[%c0_67] : memref<25xf32, #tpu.memory_space<smem>>
    %1044 = vector.broadcast %1043 : f32 to vector<2x248xf32>
    %1045 = arith.mulf %1034, %1044 : vector<2x248xf32>
    %c5_68 = arith.constant 5 : index
    %1046 = memref.load %arg6[%c5_68] : memref<25xf32, #tpu.memory_space<smem>>
    %1047 = vector.broadcast %1046 : f32 to vector<2x248xf32>
    %1048 = arith.mulf %1036, %1047 : vector<2x248xf32>
    %1049 = arith.addf %1045, %1048 : vector<2x248xf32>
    %c10_69 = arith.constant 10 : index
    %1050 = memref.load %arg6[%c10_69] : memref<25xf32, #tpu.memory_space<smem>>
    %1051 = vector.broadcast %1050 : f32 to vector<2x248xf32>
    %1052 = arith.mulf %1038, %1051 : vector<2x248xf32>
    %1053 = arith.addf %1049, %1052 : vector<2x248xf32>
    %c15_70 = arith.constant 15 : index
    %1054 = memref.load %arg6[%c15_70] : memref<25xf32, #tpu.memory_space<smem>>
    %1055 = vector.broadcast %1054 : f32 to vector<2x248xf32>
    %1056 = arith.mulf %1040, %1055 : vector<2x248xf32>
    %1057 = arith.addf %1053, %1056 : vector<2x248xf32>
    %c20_71 = arith.constant 20 : index
    %1058 = memref.load %arg6[%c20_71] : memref<25xf32, #tpu.memory_space<smem>>
    %1059 = vector.broadcast %1058 : f32 to vector<2x248xf32>
    %1060 = arith.mulf %1042, %1059 : vector<2x248xf32>
    %1061 = arith.addf %1057, %1060 : vector<2x248xf32>
    %1062 = vector.extract_strided_slice %1061 {offsets = [0, 0], sizes = [2, 244], strides = [1, 1]} : vector<2x248xf32> to vector<2x244xf32>
    %c0_72 = arith.constant 0 : index
    %1063 = memref.load %arg7[%c0_72] : memref<1xf32, #tpu.memory_space<smem>>
    %1064 = vector.broadcast %1063 : f32 to vector<2x244xf32>
    %1065 = arith.addf %1062, %1064 : vector<2x244xf32>
    %c1_73 = arith.constant 1 : index
    %1066 = memref.load %arg6[%c1_73] : memref<25xf32, #tpu.memory_space<smem>>
    %1067 = vector.broadcast %1066 : f32 to vector<2x248xf32>
    %1068 = arith.mulf %1034, %1067 : vector<2x248xf32>
    %c6_74 = arith.constant 6 : index
    %1069 = memref.load %arg6[%c6_74] : memref<25xf32, #tpu.memory_space<smem>>
    %1070 = vector.broadcast %1069 : f32 to vector<2x248xf32>
    %1071 = arith.mulf %1036, %1070 : vector<2x248xf32>
    %1072 = arith.addf %1068, %1071 : vector<2x248xf32>
    %c11_75 = arith.constant 11 : index
    %1073 = memref.load %arg6[%c11_75] : memref<25xf32, #tpu.memory_space<smem>>
    %1074 = vector.broadcast %1073 : f32 to vector<2x248xf32>
    %1075 = arith.mulf %1038, %1074 : vector<2x248xf32>
    %1076 = arith.addf %1072, %1075 : vector<2x248xf32>
    %c16_76 = arith.constant 16 : index
    %1077 = memref.load %arg6[%c16_76] : memref<25xf32, #tpu.memory_space<smem>>
    %1078 = vector.broadcast %1077 : f32 to vector<2x248xf32>
    %1079 = arith.mulf %1040, %1078 : vector<2x248xf32>
    %1080 = arith.addf %1076, %1079 : vector<2x248xf32>
    %c21_77 = arith.constant 21 : index
    %1081 = memref.load %arg6[%c21_77] : memref<25xf32, #tpu.memory_space<smem>>
    %1082 = vector.broadcast %1081 : f32 to vector<2x248xf32>
    %1083 = arith.mulf %1042, %1082 : vector<2x248xf32>
    %1084 = arith.addf %1080, %1083 : vector<2x248xf32>
    %1085 = vector.extract_strided_slice %1084 {offsets = [0, 1], sizes = [2, 244], strides = [1, 1]} : vector<2x248xf32> to vector<2x244xf32>
    %1086 = arith.addf %1065, %1085 : vector<2x244xf32>
    %c2_78 = arith.constant 2 : index
    %1087 = memref.load %arg6[%c2_78] : memref<25xf32, #tpu.memory_space<smem>>
    %1088 = vector.broadcast %1087 : f32 to vector<2x248xf32>
    %1089 = arith.mulf %1034, %1088 : vector<2x248xf32>
    %c7_79 = arith.constant 7 : index
    %1090 = memref.load %arg6[%c7_79] : memref<25xf32, #tpu.memory_space<smem>>
    %1091 = vector.broadcast %1090 : f32 to vector<2x248xf32>
    %1092 = arith.mulf %1036, %1091 : vector<2x248xf32>
    %1093 = arith.addf %1089, %1092 : vector<2x248xf32>
    %c12_80 = arith.constant 12 : index
    %1094 = memref.load %arg6[%c12_80] : memref<25xf32, #tpu.memory_space<smem>>
    %1095 = vector.broadcast %1094 : f32 to vector<2x248xf32>
    %1096 = arith.mulf %1038, %1095 : vector<2x248xf32>
    %1097 = arith.addf %1093, %1096 : vector<2x248xf32>
    %c17_81 = arith.constant 17 : index
    %1098 = memref.load %arg6[%c17_81] : memref<25xf32, #tpu.memory_space<smem>>
    %1099 = vector.broadcast %1098 : f32 to vector<2x248xf32>
    %1100 = arith.mulf %1040, %1099 : vector<2x248xf32>
    %1101 = arith.addf %1097, %1100 : vector<2x248xf32>
    %c22_82 = arith.constant 22 : index
    %1102 = memref.load %arg6[%c22_82] : memref<25xf32, #tpu.memory_space<smem>>
    %1103 = vector.broadcast %1102 : f32 to vector<2x248xf32>
    %1104 = arith.mulf %1042, %1103 : vector<2x248xf32>
    %1105 = arith.addf %1101, %1104 : vector<2x248xf32>
    %1106 = vector.extract_strided_slice %1105 {offsets = [0, 2], sizes = [2, 244], strides = [1, 1]} : vector<2x248xf32> to vector<2x244xf32>
    %1107 = arith.addf %1086, %1106 : vector<2x244xf32>
    %c3_83 = arith.constant 3 : index
    %1108 = memref.load %arg6[%c3_83] : memref<25xf32, #tpu.memory_space<smem>>
    %1109 = vector.broadcast %1108 : f32 to vector<2x248xf32>
    %1110 = arith.mulf %1034, %1109 : vector<2x248xf32>
    %c8_84 = arith.constant 8 : index
    %1111 = memref.load %arg6[%c8_84] : memref<25xf32, #tpu.memory_space<smem>>
    %1112 = vector.broadcast %1111 : f32 to vector<2x248xf32>
    %1113 = arith.mulf %1036, %1112 : vector<2x248xf32>
    %1114 = arith.addf %1110, %1113 : vector<2x248xf32>
    %c13_85 = arith.constant 13 : index
    %1115 = memref.load %arg6[%c13_85] : memref<25xf32, #tpu.memory_space<smem>>
    %1116 = vector.broadcast %1115 : f32 to vector<2x248xf32>
    %1117 = arith.mulf %1038, %1116 : vector<2x248xf32>
    %1118 = arith.addf %1114, %1117 : vector<2x248xf32>
    %c18_86 = arith.constant 18 : index
    %1119 = memref.load %arg6[%c18_86] : memref<25xf32, #tpu.memory_space<smem>>
    %1120 = vector.broadcast %1119 : f32 to vector<2x248xf32>
    %1121 = arith.mulf %1040, %1120 : vector<2x248xf32>
    %1122 = arith.addf %1118, %1121 : vector<2x248xf32>
    %c23_87 = arith.constant 23 : index
    %1123 = memref.load %arg6[%c23_87] : memref<25xf32, #tpu.memory_space<smem>>
    %1124 = vector.broadcast %1123 : f32 to vector<2x248xf32>
    %1125 = arith.mulf %1042, %1124 : vector<2x248xf32>
    %1126 = arith.addf %1122, %1125 : vector<2x248xf32>
    %1127 = vector.extract_strided_slice %1126 {offsets = [0, 3], sizes = [2, 244], strides = [1, 1]} : vector<2x248xf32> to vector<2x244xf32>
    %1128 = arith.addf %1107, %1127 : vector<2x244xf32>
    %c4_88 = arith.constant 4 : index
    %1129 = memref.load %arg6[%c4_88] : memref<25xf32, #tpu.memory_space<smem>>
    %1130 = vector.broadcast %1129 : f32 to vector<2x248xf32>
    %1131 = arith.mulf %1034, %1130 : vector<2x248xf32>
    %c9_89 = arith.constant 9 : index
    %1132 = memref.load %arg6[%c9_89] : memref<25xf32, #tpu.memory_space<smem>>
    %1133 = vector.broadcast %1132 : f32 to vector<2x248xf32>
    %1134 = arith.mulf %1036, %1133 : vector<2x248xf32>
    %1135 = arith.addf %1131, %1134 : vector<2x248xf32>
    %c14_90 = arith.constant 14 : index
    %1136 = memref.load %arg6[%c14_90] : memref<25xf32, #tpu.memory_space<smem>>
    %1137 = vector.broadcast %1136 : f32 to vector<2x248xf32>
    %1138 = arith.mulf %1038, %1137 : vector<2x248xf32>
    %1139 = arith.addf %1135, %1138 : vector<2x248xf32>
    %c19_91 = arith.constant 19 : index
    %1140 = memref.load %arg6[%c19_91] : memref<25xf32, #tpu.memory_space<smem>>
    %1141 = vector.broadcast %1140 : f32 to vector<2x248xf32>
    %1142 = arith.mulf %1040, %1141 : vector<2x248xf32>
    %1143 = arith.addf %1139, %1142 : vector<2x248xf32>
    %c24_92 = arith.constant 24 : index
    %1144 = memref.load %arg6[%c24_92] : memref<25xf32, #tpu.memory_space<smem>>
    %1145 = vector.broadcast %1144 : f32 to vector<2x248xf32>
    %1146 = arith.mulf %1042, %1145 : vector<2x248xf32>
    %1147 = arith.addf %1143, %1146 : vector<2x248xf32>
    %1148 = vector.extract_strided_slice %1147 {offsets = [0, 4], sizes = [2, 244], strides = [1, 1]} : vector<2x248xf32> to vector<2x244xf32>
    %1149 = arith.addf %1128, %1148 : vector<2x244xf32>
    %cst_93 = arith.constant 0.000000e+00 : f32
    %1150 = vector.broadcast %cst_93 : f32 to vector<2x244xf32>
    %1151 = arith.maximumf %1149, %1150 : vector<2x244xf32>
    %c0_94 = arith.constant 0 : index
    %c0_95 = arith.constant 0 : index
    %1152 = vector.load %arg8[%c0_94, %c0_95] : memref<8x244xf32, #tpu.memory_space<vmem>>, vector<8x244xf32>
    %cst_96 = arith.constant dense<0.000000e+00> : vector<2x8xf32>
    %1153 = tpu.matmul %1151, %1152, %cst_96 {dimension_numbers = #tpu.dot_dimension_numbers<[1], [1], [0], [0], [0, 0, 1, 0], [], []>} : vector<2x244xf32>, vector<8x244xf32>, vector<2x8xf32> -> vector<2x8xf32>
    %c0_97 = arith.constant 0 : index
    %c0_98 = arith.constant 0 : index
    %1154 = vector.load %arg9[%c0_97, %c0_98] : memref<1x8xf32, #tpu.memory_space<vmem>>, vector<1x8xf32>
    %1155 = vector.broadcast %1154 : vector<1x8xf32> to vector<2x8xf32>
    %1156 = arith.addf %1153, %1155 : vector<2x8xf32>
    %c0_99 = arith.constant 0 : index
    %c0_100 = arith.constant 0 : index
    %1157 = vector.load %arg10[%c0_99, %c0_100] : memref<2x8xf32, #tpu.memory_space<vmem>>, vector<2x8xf32>
    tpu.vector_store %arg10[%c0_99, %c0_100], %1156 {strides = array<i32>} : memref<2x8xf32, #tpu.memory_space<vmem>>, vector<2x8xf32>,
    return
  }
  func.func @transform_0(%arg0: i32) -> (i32, i32) {
    %c0_i32 = arith.constant 0 : i32
    %c0_i32_0 = arith.constant 0 : i32
    return %arg0, %c0_i32 : i32, i32
  }
  func.func @transform_1(%arg0: i32) -> i32 {
    %c0_i32 = arith.constant 0 : i32
    %c0_i32_0 = arith.constant 0 : i32
    return %c0_i32 : i32
  }
  func.func @transform_2(%arg0: i32) -> i32 {
    %c0_i32 = arith.constant 0 : i32
    %c0_i32_0 = arith.constant 0 : i32
    return %c0_i32 : i32
  }
  func.func @transform_3(%arg0: i32) -> i32 {
    %c0_i32 = arith.constant 0 : i32
    %c0_i32_0 = arith.constant 0 : i32
    return %c0_i32 : i32
  }
  func.func @transform_4(%arg0: i32) -> i32 {
    %c0_i32 = arith.constant 0 : i32
    %c0_i32_0 = arith.constant 0 : i32
    return %c0_i32 : i32
  }
  func.func @transform_5(%arg0: i32) -> i32 {
    %c0_i32 = arith.constant 0 : i32
    %c0_i32_0 = arith.constant 0 : i32
    return %c0_i32 : i32
  }
  func.func @transform_6(%arg0: i32) -> i32 {
    %c0_i32 = arith.constant 0 : i32
    %c0_i32_0 = arith.constant 0 : i32
    return %c0_i32 : i32
  }
  func.func @transform_7(%arg0: i32) -> (i32, i32) {
    %c0_i32 = arith.constant 0 : i32
    %c0_i32_0 = arith.constant 0 : i32
    %c0_i32_1 = arith.constant 0 : i32
    return %c0_i32, %c0_i32_0 : i32, i32
  }
  func.func @transform_8(%arg0: i32) -> (i32, i32) {
    %c0_i32 = arith.constant 0 : i32
    %c0_i32_0 = arith.constant 0 : i32
    %c0_i32_1 = arith.constant 0 : i32
    return %c0_i32, %c0_i32_0 : i32, i32
  }
  func.func @transform_9(%arg0: i32) -> (i32, i32) {
    %c0_i32 = arith.constant 0 : i32
    %c0_i32_0 = arith.constant 0 : i32
    return %arg0, %c0_i32 : i32, i32
  }
}

</mosaic_0001>

<bundles_post_ra>
// kernel: tpu_custom_call.1
= control target key start
LH: loop header
LB: loop body
LE: loop exit
PB: predicated region body
PF: predicated region fallthrough
CT: control target
= control target key end

     0   :  { %s3706_s0 = inlined_call_operand.hbm [shape: f32[2,256], index: 0, kind: input, shape index: {}]   ;;  %s3707_s1 = inlined_call_operand.vmem [shape: f32[40], index: 1, kind: input, shape index: {}]   ;;  %s3708_s2 = inlined_call_operand.vmem [shape: f32[8], index: 2, kind: input, shape index: {}]   ;;  %s3709_s3 = inlined_call_operand.vmem [shape: f32[200], index: 3, kind: input, shape index: {}]   ;;  %s3710_s4 = inlined_call_operand.vmem [shape: f32[5], index: 4, kind: input, shape index: {}]   ;;  %s3711_s5 = inlined_call_operand.vmem [shape: f32[25], index: 5, kind: input, shape index: {}]   ;;  %s3712_s6 = inlined_call_operand.<no memory space> [shape: f32[1], index: 6, kind: input, shape index: {}]   ;;  %s3713_s7 = inlined_call_operand.vmem [shape: f32[8,244], index: 7, kind: input, shape index: {}]   ;;  %s3714_s8 = inlined_call_operand.vmem [shape: f32[1,8], index: 8, kind: input, shape index: {}]   ;;  %s3715_s9 = inlined_call_operand.hbm [shape: f32[2,8], index: 9, kind: output, shape index: {}]  }
   0x1   :  { %3871 = sst [smem:[#allocation157_spill]] %s3712_s6 }
   0x2   :  { %3872 = sst [smem:[#allocation158_spill]] %s3713_s7 }
   0x3   :  { %3873 = sst [smem:[#allocation159_spill]] %s3714_s8 }
   0x4   :  { %3874 = sst [smem:[#allocation160_spill]] %s3715_s9 }
   0x5   :  { %15 = vsyncpa [#allocation4], 0 }
   0x6   :  { %16 = vsyncpa [#allocation6], 0 }
   0x7   :  { %17 = vsyncpa [#allocation9], 0 }
   0x8   :  { %18 = vsyncpa [#allocation12], 0  ;;  %s46_s11 = sshll.u32 %s3708_s2, 4  ;;  %s47_s11 = int_to_ptr.vmem [resolvable:$true] %s46_s11 }
   0x9   :  { %19 = vsyncpa [#allocation5], 0  ;;  %s66_s14 = sshll.u32 %s3710_s4, 4  ;;  %s1951_s15 = scalar_lea.vmem %s47_s11, 16  ;;  %s67_s14 = int_to_ptr.vmem [resolvable:$true] %s66_s14 }
   0xa   :  { %p1952_p0 = scmp.ne.s32.totalorder %s47_s11, %s1951_s15  ;;  %p1956_p1 = scmp.lt.s32.totalorder %s47_s11, %s47_s11 }
   0xb   :  { %p1957_p2 = scmp.lt.s32.totalorder %s1951_s15, %s1951_s15 }
   0xd   :  { %p1958_p3 = por %p1957_p2, %p1956_p1 }
   0xf   :  { %p1959_p4 = pnand %p1958_p3, %p1952_p0 }
  0x11   :  { %1962 = shalt.err (!%p1959_p4)
}
  0x12   :  { %s2065_s16 = smov [#allocation8]   ;;  %s1963_s17 = scalar_lea.vmem %s67_s14, 16 }
  0x13   :  { %49 = dma.vmem_to_smem %s47_s11, 16, %s2065_s16, [#allocation9]  }
  0x14   :  { %p1964_p5 = scmp.ne.s32.totalorder %s67_s14, %s1963_s17  ;;  %p1968_p6 = scmp.lt.s32.totalorder %s67_s14, %s67_s14 }
  0x15   :  { %p1969_p7 = scmp.lt.s32.totalorder %s1963_s17, %s1963_s17 }
  0x17   :  { %p1970_p8 = por %p1969_p7, %p1968_p6 }
  0x19   :  { %p1971_p9 = pnand %p1970_p8, %p1964_p5 }
  0x1b   :  { %1974 = shalt.err (!%p1971_p9)
}
  0x1c   :  { %s2066_s2 = smov [#allocation11]   ;;  %s36_s19 = sshll.u32 %s3707_s1, 4  ;;  %s37_s19 = int_to_ptr.vmem [resolvable:$true] %s36_s19 }
  0x1d   :  { %69 = dma.vmem_to_smem %s67_s14, 16, %s2066_s2, [#allocation12]  }
  0x1e   :  { %s2067_s20 = smov [#allocation3]   ;;  %s1975_s24 = scalar_lea.hbm %s3706_s0, 64 }
  0x1f   :  { %s26_s21 = sshll.u32 %s2067_s20, 4  ;;  %p1976_p10 = scmp.ne.s32.totalorder %s3706_s0, %s1975_s24  ;;  %s27_s21 = int_to_ptr.vmem [resolvable:$true] %s26_s21 }
  0x20   :  { %p1979_p11 = scmp.lt.u32.totalorder %s1975_s24, %s3706_s0 }
  0x22   :  { %p1981_p12 = pnand %p1979_p11, %p1976_p10 }
  0x24   :  { %1984 = shalt.err (!%p1981_p12)
}
  0x25   :  { %s1985_s29 = scalar_lea.vmem %s27_s21, 64  ;;  %p1990_p0 = scmp.lt.s32.totalorder %s27_s21, %s27_s21 }
  0x26   :  { %p1986_p13 = scmp.ne.s32.totalorder %s27_s21, %s1985_s29  ;;  %p1991_p1 = scmp.lt.s32.totalorder %s1985_s29, %s1985_s29 }
  0x28   :  { %p1992_p2 = por %p1991_p1, %p1990_p0 }
  0x2a   :  { %p1993_p3 = pnand %p1992_p2, %p1986_p13 }
  0x2c   :  { %1996 = shalt.err (!%p1993_p3)
}
  0x2d   :  { %29 = dma.hbm_to_vmem [thread:$0]  %s3706_s0, 64, %s27_s21, [#allocation4]  }
  0x2e   :  { %s1997_s10 = scalar_lea.vmem %s37_s19, 16  ;;  %p2002_p5 = scmp.lt.s32.totalorder %s37_s19, %s37_s19 }
  0x2f   :  { %p1998_p4 = scmp.ne.s32.totalorder %s37_s19, %s1997_s10  ;;  %p2003_p6 = scmp.lt.s32.totalorder %s1997_s10, %s1997_s10 }
  0x31   :  { %p2004_p7 = por %p2003_p6, %p2002_p5 }
  0x33   :  { %p2005_p8 = pnand %p2004_p7, %p1998_p4 }
  0x35   :  { %2008 = shalt.err (!%p2005_p8)
}
  0x36   :  { %s2068_s11 = smov [#allocation7]   ;;  %s56_s14 = sshll.u32 %s3709_s3, 4  ;;  %s57_s14 = int_to_ptr.vmem [resolvable:$true] %s56_s14 }
  0x37   :  { %39 = dma.vmem_to_smem %s37_s19, 16, %s2068_s11, [#allocation6]  }
  0x38   :  { %s76_s17 = sshll.u32 %s3711_s5, 4  ;;  %s2009_s2 = scalar_lea.vmem %s57_s14, 32  ;;  %s77_s17 = int_to_ptr.vmem [resolvable:$true] %s76_s17 }
  0x39   :  { %p2010_p9 = scmp.ne.s32.totalorder %s57_s14, %s2009_s2  ;;  %p2014_p10 = scmp.lt.s32.totalorder %s57_s14, %s57_s14 }
  0x3a   :  { %p2015_p11 = scmp.lt.s32.totalorder %s2009_s2, %s2009_s2 }
  0x3c   :  { %p2016_p12 = por %p2015_p11, %p2014_p10 }
  0x3e   :  { %p2017_p13 = pnand %p2016_p12, %p2010_p9 }
  0x40   :  { %2020 = shalt.err (!%p2017_p13)
}
  0x41   :  { %s2069_s0 = smov [#allocation10]   ;;  %s2021_s4 = scalar_lea.vmem %s77_s17, 16 }
  0x42   :  { %59 = dma.vmem_to_smem %s57_s14, 32, %s2069_s0, [#allocation9]  }
  0x43   :  { %p2022_p0 = scmp.ne.s32.totalorder %s77_s17, %s2021_s4  ;;  %p2026_p1 = scmp.lt.s32.totalorder %s77_s17, %s77_s17 }
  0x44   :  { %p2027_p2 = scmp.lt.s32.totalorder %s2021_s4, %s2021_s4 }
  0x46   :  { %p2028_p3 = por %p2027_p2, %p2026_p1 }
  0x48   :  { %p2029_p4 = pnand %p2028_p3, %p2022_p0 }
  0x4a   :  { %2032 = shalt.err (!%p2029_p4)
}
  0x4b   :  { %s2070_s3 = smov [#allocation13]  }
  0x4c   :  { %79 = dma.vmem_to_smem %s77_s17, 16, %s2070_s3, [#allocation12]  }
  0x4d   :  { %2055 = dma.done.wait [#allocation4], 64  }
  0x4e   :  { %2056 = vsyncadd [#allocation4], 4294967232 }
  0x4f   :  { %2057 = dma.done.wait [#allocation6], 16  }
  0x50   :  { %2058 = vsyncadd [#allocation6], 4294967280 }
  0x51   :  { %2059 = dma.done.wait [#allocation9], 48  }
  0x52   :  { %2060 = vsyncadd [#allocation9], 4294967248 }
  0x53   :  { %2061 = dma.done.wait [#allocation12], 32  }
  0x54   :  { %2062 = vsyncadd [#allocation12], 4294967264 }
  0x55   :  { %104 = sfence }
  0x56   :  { %s1679_s5 = sld [smem:[#allocation7 + $0xb]]  ;;  %s1677_s18 = sld [smem:[#allocation7 + $0x1]]  ;;  %v2154_v0 = vld [vmem:[#allocation3] sm:$0xf]  ;;  %vm161_vm0 = vcmask 1039360   ;;  %vm242_vm1 = vcmask 1031168  }
  0x57   :  { %s1685_s19 = sld [smem:[#allocation7 + $0x2]]  ;;  %s1678_s20 = sld [smem:[#allocation7 + $0x6]]  ;;  %vm323_vm2 = vcmask 1022976   ;;  %vm404_vm3 = vcmask 1014784   ;;  %vm1567_vm4 = vcmask 949248   ;;  %vm1643_vm5 = vcmask 58368  }
  0x58   :  { %s1680_s21 = sld [smem:[#allocation7 + $0x10]]  ;;  %s1686_s22 = sld [smem:[#allocation7 + $0x7]] }
  0x59   :  { %s1693_s23 = sld [smem:[#allocation7 + $0x3]]  ;;  %s1687_s24 = sld [smem:[#allocation7 + $0xc]] }
  0x5a   :  { %s3720_s25 = smov 127   ;;  %s1681_s26 = sld [smem:[#allocation7 + $0x15]] }
  0x5b   :  { %s1694_s27 = sld [smem:[#allocation7 + $0x8]]  ;;  %s3718_s28 = smov 126  }
  0x5c   :  { %v176_v1 = vstv %s1679_s5  ;;  %v155_v3 = vstv %s1677_s18  ;;  %s1695_s29 = sld [smem:[#allocation7 + $0xd]]  ;;  %s1688_s1 = sld [smem:[#allocation7 + $0x11]] }
  0x5d   :  { %v177_v2 = vmul.f32 %v176_v1, %v2154_v0  ;;  %v236_v4 = vstv %s1685_s19  ;;  %v156_v5 = vmul.f32 %v155_v3, %v2154_v0  ;;  %v166_v6 = vstv %s1678_s20  ;;  %s1702_s30 = sld [smem:[#allocation7 + $0x9]]  ;;  %s1701_s10 = sld [smem:[#allocation7 + $0x4]] }
  0x5e   :  { %v237_v7 = vmul.f32 %v236_v4, %v2154_v0  ;;  %v167_v8 = vmul.f32 %v166_v6, %v2154_v0  ;;  %v186_v9 = vstv %s1680_s21  ;;  %v247_v10 = vstv %s1686_s22  ;;  %s3716_s11 = smov 125   ;;  %s1689_s12 = sld [smem:[#allocation7 + $0x16]] }
  0x5f   :  { %179 = vrot.lane.b32.xlu1 %v177_v2, %s3720_s25  ;;  %158 = vrot.lane.b32.xlu0 %v156_v5, %s3720_s25  ;;  %v187_v11 = vmul.f32 %v186_v9, %v2154_v0  ;;  %v248_v12 = vmul.f32 %v247_v10, %v2154_v0  ;;  %v317_v13 = vstv %s1693_s23  ;;  %v257_v14 = vstv %s1687_s24  ;;  %s1682_s13 = sld [smem:[#allocation7 + $0x1a]]  ;;  %s1703_s14 = sld [smem:[#allocation7 + $0xe]] }
  0x60   :  { %v318_v15 = vmul.f32 %v317_v13, %v2154_v0  ;;  %v258_v16 = vmul.f32 %v257_v14, %v2154_v0  ;;  %v196_v17 = vstv %s1681_s26  ;;  %s1696_s15 = sld [smem:[#allocation7 + $0x12]]  ;;  %s1690_s16 = sld [smem:[#allocation7 + $0x1b]] }
  0x61   :  { %v328_v18 = vstv %s1694_s27  ;;  %v197_v19 = vmul.f32 %v196_v17, %v2154_v0  ;;  %s1683_s17 = sld [smem:[#allocation7 + $0x1f]]  ;;  %s3730_s2 = smov 124  }
  0x62   :  { %v329_v20 = vmul.f32 %v328_v18, %v2154_v0  ;;  %v338_v21 = vstv %s1695_s29  ;;  %v267_v22 = vstv %s1688_s1  ;;  %s1704_s0 = sld [smem:[#allocation7 + $0x13]]  ;;  %s1697_s4 = sld [smem:[#allocation7 + $0x17]] }
  0x63   :  { %239 = vrot.lane.b32.xlu1 %v237_v7, %s3718_s28  ;;  %169 = vrot.lane.b32.xlu0 %v167_v8, %s3720_s25  ;;  %v339_v23 = vmul.f32 %v338_v21, %v2154_v0  ;;  %v268_v24 = vmul.f32 %v267_v22, %v2154_v0  ;;  %v409_v25 = vstv %s1702_s30  ;;  %v398_v26 = vstv %s1701_s10  ;;  %s1691_s3 = sld [smem:[#allocation7 + $0x20]]  ;;  %s1684_s5 = sld [smem:[#allocation7 + $0x24]] }
  0x64   :  { %v410_v27 = vmul.f32 %v409_v25, %v2154_v0  ;;  %v399_v28 = vmul.f32 %v398_v26, %v2154_v0  ;;  %v277_v29 = vstv %s1689_s12  ;;  %s1705_s18 = sld [smem:[#allocation7 + $0x18]]  ;;  %s1698_s19 = sld [smem:[#allocation7 + $0x1c]] }
  0x65   :  { %v206_v30 = vstv %s1682_s13  ;;  %v278_v31 = vmul.f32 %v277_v29, %v2154_v0  ;;  %v419_v33 = vstv %s1703_s14  ;;  %s1699_s20 = sld [smem:[#allocation7 + $0x21]]  ;;  %s1692_s21 = sld [smem:[#allocation7 + $0x25]] }
  0x66   :  { %v207_v32 = vmul.f32 %v206_v30, %v2154_v0  ;;  %v348_v34 = vstv %s1696_s15  ;;  %v420_v35 = vmul.f32 %v419_v33, %v2154_v0  ;;  %v287_v37 = vstv %s1690_s16  ;;  %s1700_s22 = sld [smem:[#allocation7 + $0x26]]  ;;  %s1706_s23 = sld [smem:[#allocation7 + $0x1d]] }
  0x67   :  { %189 = vrot.lane.b32.xlu1 %v187_v11, %s3720_s25  ;;  %250 = vrot.lane.b32.xlu0 %v248_v12, %s3718_s28  ;;  %v349_v36 = vmul.f32 %v348_v34, %v2154_v0  ;;  %v216_v38 = vstv %s1683_s17  ;;  %v288_v39 = vmul.f32 %v287_v37, %v2154_v0  ;;  %s2206_s24 = sld [smem:[#allocation7 + $0x27]]  ;;  %s2208_s26 = sld [smem:[#allocation7 + $0x22]] }
  0x68   :  { %v217_v40 = vmul.f32 %v216_v38, %v2154_v0  ;;  %v429_v41 = vstv %s1704_s0  ;;  %v358_v42 = vstv %s1697_s4  ;;  %s2212_s27 = sld [smem:[#allocation7 + $0xa]]  ;;  %s2218_s1 = sld [smem:[#allocation7]] }
  0x69   :  { %v430_v43 = vmul.f32 %v429_v41, %v2154_v0  ;;  %v359_v44 = vmul.f32 %v358_v42, %v2154_v0  ;;  %v297_v45 = vstv %s1691_s3  ;;  %v226_v46 = vstv %s1684_s5  ;;  %s2214_s29 = sld [smem:[#allocation8 + $0x2]]  ;;  %s2220_s30 = sld [smem:[#allocation8]] }
  0x6a   :  { %v298_v47 = vmul.f32 %v297_v45, %v2154_v0  ;;  %v227_v48 = vmul.f32 %v226_v46, %v2154_v0  ;;  %v439_v49 = vstv %s1705_s18  ;;  %v368_v50 = vstv %s1698_s19  ;;  %s2222_s10 = sld [smem:[#allocation7 + $0x5]]  ;;  %s2224_s12 = sld [smem:[#allocation8 + $0x1]] }
  0x6b   :  { %320 = vrot.lane.b32.xlu1 %v318_v15, %s3716_s11  ;;  %260 = vrot.lane.b32.xlu0 %v258_v16, %s3718_s28  ;;  %v440_v51 = vmul.f32 %v439_v49, %v2154_v0  ;;  %v369_v52 = vmul.f32 %v368_v50, %v2154_v0  ;;  %v378_v53 = vstv %s1699_s20  ;;  %v307_v54 = vstv %s1692_s21  ;;  %s2226_s13 = sld [smem:[#allocation7 + $0xf]]  ;;  %s2228_s14 = sld [smem:[#allocation8 + $0x3]] }
  0x6c   :  { %v379_v55 = vmul.f32 %v378_v53, %v2154_v0  ;;  %v308_v56 = vmul.f32 %v307_v54, %v2154_v0  ;;  %v388_v57 = vstv %s1700_s22  ;;  %v449_v58 = vstv %s1706_s23  ;;  %s2232_s15 = sld [smem:[#allocation7 + $0x14]]  ;;  %s2239_s17 = sld [smem:[#allocation7 + $0x19]] }
  0x6d   :  { %v389_v59 = vmul.f32 %v388_v57, %v2154_v0  ;;  %s2234_s16 = sld [smem:[#allocation8 + $0x4]]  ;;  %v450_v60 = vmul.f32 %v449_v58, %v2154_v0  ;;  %v469_v61 = vstv %s2206_s24  ;;  %s2241_s0 = sld [smem:[#allocation8 + $0x5]]  ;;  %v459_v62 = vstv %s2208_s26 }
  0x6e   :  { %s2244_s4 = sld [smem:[#allocation10 + $0x29]]  ;;  %s2246_s3 = sld [smem:[#allocation10 + $0x2e]]  ;;  %v470_v63 = vmul.f32 %v469_v61, %v2154_v0  ;;  %v460_v1 = vmul.f32 %v459_v62, %v2154_v0  ;;  %v119_v2 = vstv %s2212_s27  ;;  %v107_v3 = vstv %s2218_s1 }
  0x6f   :  { %199 = vrot.lane.b32.xlu1 %v197_v19, %s3720_s25  ;;  %331 = vrot.lane.b32.xlu0 %v329_v20, %s3716_s11  ;;  %s2248_s5 = sld [smem:[#allocation7 + $0x1e]]  ;;  %s2250_s18 = sld [smem:[#allocation10 + $0x1]]  ;;  %v122_v7 = vstv %s2214_s29  ;;  %v120_v8 = vmul.f32 %v119_v2, %v2154_v0  ;;  %v108_v9 = vmul.f32 %v107_v3, %v2154_v0  ;;  %v110_v11 = vstv %s2220_s30 }
  0x70   :  { %s2254_s19 = sld [smem:[#allocation10 + $0x6]]  ;;  %s2256_s20 = sld [smem:[#allocation10 + $0x2a]]  ;;  %v113_v4 = vstv %s2222_s10  ;;  %v116_v15 = vstv %s2224_s12 }
  0x71   :  { %s2260_s21 = sld [smem:[#allocation8 + $0x6]]  ;;  %s2262_s22 = sld [smem:[#allocation10 + $0x2f]]  ;;  %v125_v5 = vstv %s2226_s13  ;;  %v114_v12 = vmul.f32 %v113_v4, %v2154_v0  ;;  %v128_v16 = vstv %s2228_s14  ;;  %v2428_v20 = vadd.f32 %v122_v7, %v120_v8 }
  0x72   :  { %s2264_s23 = sld [smem:[#allocation10 + $0x2]]  ;;  %s2266_s24 = sld [smem:[#allocation10 + $0x7]]  ;;  %v131_v6 = vstv %s2232_s15  ;;  %v137_v10 = vstv %s2239_s17  ;;  %v126_v13 = vmul.f32 %v125_v5, %v2154_v0  ;;  %v2430_v21 = vadd.f32 %v110_v11, %v108_v9 }
  0x73   :  { %341 = vrot.lane.b32.xlu1 %v339_v23, %s3716_s11  ;;  %270 = vrot.lane.b32.xlu0 %v268_v24, %s3718_s28  ;;  %s2268_s26 = sld [smem:[#allocation10 + $0x33]]  ;;  %s2278_s9 = sld [smem:[#allocation10 + $0xc]]  ;;  %v132_v17 = vmul.f32 %v131_v6, %v2154_v0  ;;  %v134_v18 = vstv %s2234_s16  ;;  %v138_v19 = vmul.f32 %v137_v10, %v2154_v0  ;;  %v140_v22 = vstv %s2241_s0 }
  0x74   :  { %3875 = sst [smem:[#allocation20_spill]] %s2244_s4  ;;  %s2282_s6 = sld [smem:[#allocation10 + $0x51]]  ;;  %v2438_v24 = vadd.f32 %v116_v15, %v114_v12  ;;  %v2440_v25 = vadd.f32 %v128_v16, %v126_v13  ;;  %v707_v29 = vstv %s2244_s4  ;;  %v710_v30 = vstv %s2246_s3 }
  0x75   :  { %3876 = sst [smem:[#allocation21_spill]] %s2246_s3  ;;  %s2280_s8 = sld [smem:[#allocation10 + $0x8]]  ;;  %v143_v14 = vstv %s2248_s5 }
  0x76   :  { %3877 = sst [smem:[#allocation22_spill]] %s2250_s18  ;;  %s2284_s7 = sld [smem:[#allocation10 + $0x56]]  ;;  %v144_v23 = vmul.f32 %v143_v14, %v2154_v0  ;;  %v524_v33 = vstv %s2254_s19  ;;  %v745_v34 = vstv %s2256_s20 }
  0x77   :  { %412 = vrot.lane.b32.xlu1 %v410_v27, %s3730_s2  ;;  %401 = vrot.lane.b32.xlu0 %v399_v28, %s3730_s2  ;;  %3878 = sst [smem:[#allocation23_spill]] %s2254_s19  ;;  %s2403_s27 = sld [smem:[#allocation10 + $0x44]]  ;;  %v146_v26 = vstv %s2260_s21  ;;  %v2448_v28 = vadd.f32 %v134_v18, %v132_v17 }
  0x78   :  { %3879 = sst [smem:[#allocation24_spill]] %s2256_s20  ;;  %s2405_s1 = sld [smem:[#allocation10 + $0x58]] }
  0x79   :  { %3880 = sst [smem:[#allocation25_spill]] %s2262_s22  ;;  %s2308_s22 = sld [smem:[#allocation10 + $0x5b]] }
  0x7a   :  { %3881 = sst [smem:[#allocation26_spill]] %s2264_s23  ;;  %s2292_s23 = sld [smem:[#allocation10 + $0x57]] }
  0x7b   :  { %280 = vrot.lane.b32.xlu1 %v278_v31, %s3718_s28  ;;  %209 = vrot.lane.b32.xlu0 %v207_v32, %s3720_s25  ;;  %3882 = sst [smem:[#allocation27_spill]] %s2266_s24  ;;  %s2286_s24 = sld [smem:[#allocation7 + $0x23]]  ;;  %v521_v31 = vstv %s2250_s18  ;;  %v2457_v32 = vadd.f32 %v140_v22, %v138_v19 }
  0x7c   :  { %3883 = sst [smem:[#allocation28_spill]] %s2268_s26  ;;  %s2288_s26 = sld [smem:[#allocation10 + $0xd]] }
  0x7d   :  { %3887 = sst [smem:[#allocation32_spill]] %s2278_s9  ;;  %s2300_s9 = sld [smem:[#allocation10 + $0x30]] }
  0x7e   :  { %3888 = sst [smem:[#allocation33_spill]] %s2280_s8  ;;  %s2302_s8 = sld [smem:[#allocation10 + $0x10]] }
  0x7f   :  { %422 = vrot.lane.b32.xlu1 %v420_v35, %s3730_s2  ;;  %351 = vrot.lane.b32.xlu0 %v349_v36, %s3716_s11  ;;  %3889 = sst [smem:[#allocation34_spill]] %s2282_s6  ;;  %s2304_s6 = sld [smem:[#allocation10 + $0x39]]  ;;  %v2466_v36 = vadd.f32 %v146_v26, %v144_v23 }
  0x80   :  { %3890 = sst [smem:[#allocation35_spill]] %s2284_s7  ;;  %s2306_s7 = sld [smem:[#allocation10 + $0x11]] }
  0x81   :  { %3893 = sst [smem:[#allocation38_spill]] %s2292_s23  ;;  %s2411_s10 = sld [smem:[#allocation10 + $0x2c]]  ;;  %v149_v27 = vstv %s2286_s24 }
  0x82   :  { %3891 = sst [smem:[#allocation36_spill]] %s2288_s26  ;;  %s2310_s26 = sld [smem:[#allocation10 + $0x5c]]  ;;  %v150_v37 = vmul.f32 %v149_v27, %v2154_v0 }
  0x83   :  { %290 = vrot.lane.b32.xlu1 %v288_v39, %s3718_s28  ;;  %219 = vrot.lane.b32.xlu0 %v217_v40, %s3720_s25  ;;  %3897 = sst [smem:[#allocation42_spill]] %s2300_s9  ;;  %s2314_s23 = sld [smem:[#allocation10 + $0x12]] }
  0x84   :  { %3898 = sst [smem:[#allocation43_spill]] %s2302_s8  ;;  %s2322_s9 = sld [smem:[#allocation10 + $0x3e]] }
  0x85   :  { %3899 = sst [smem:[#allocation44_spill]] %s2304_s6  ;;  %s2326_s6 = sld [smem:[#allocation10 + $0x16]] }
  0x86   :  { %3900 = sst [smem:[#allocation45_spill]] %s2306_s7  ;;  %s2324_s8 = sld [smem:[#allocation10 + $0x60]] }
  0x87   :  { %432 = vrot.lane.b32.xlu1 %v430_v43, %s3730_s2  ;;  %361 = vrot.lane.b32.xlu0 %v359_v44, %s3716_s11  ;;  %3901 = sst [smem:[#allocation46_spill]] %s2308_s22  ;;  %s2328_s7 = sld [smem:[#allocation10 + $0x61]] }
  0x88   :  { %3902 = sst [smem:[#allocation47_spill]] %s2310_s26  ;;  %s2330_s22 = sld [smem:[#allocation10 + $0x17]] }
  0x89   :  { %3904 = sst [smem:[#allocation49_spill]] %s2314_s23  ;;  %s2336_s23 = sld [smem:[#allocation10 + $0x1a]] }
  0x8a   :  { %3908 = sst [smem:[#allocation53_spill]] %s2322_s9  ;;  %s2332_s26 = sld [smem:[#allocation10 + $0x35]] }
  0x8b   :  { %300 = vrot.lane.b32.xlu1 %v298_v47, %s3718_s28  ;;  %229 = vrot.lane.b32.xlu0 %v227_v48, %s3720_s25  ;;  %s2275_s25 = sld [smem:[#allocation10 + $0x3]]  ;;  %s2344_s9 = sld [smem:[#allocation10 + $0x66]] }
  0x8c   :  { %3909 = sst [smem:[#allocation54_spill]] %s2324_s8  ;;  %s2413_s29 = sld [smem:[#allocation10 + $0x31]] }
  0x8d   :  { %3910 = sst [smem:[#allocation55_spill]] %s2326_s6  ;;  %s2346_s8 = sld [smem:[#allocation10 + $0x3a]] }
  0x8e   :  { %3911 = sst [smem:[#allocation56_spill]] %s2328_s7  ;;  %s2348_s6 = sld [smem:[#allocation10 + $0xe]] }
  0x8f   :  { %442 = vrot.lane.b32.xlu1 %v440_v51, %s3730_s2  ;;  %371 = vrot.lane.b32.xlu0 %v369_v52, %s3716_s11  ;;  %3912 = sst [smem:[#allocation57_spill]] %s2330_s22  ;;  %s2350_s7 = sld [smem:[#allocation10 + $0x47]] }
  0x90   :  { %3913 = sst [smem:[#allocation58_spill]] %s2332_s26  ;;  %s2352_s26 = sld [smem:[#allocation10 + $0x4c]] }
  0x91   :  { %3886 = sst [smem:[#allocation31_spill]] %s2275_s25  ;;  %s2420_s15 = sld [smem:[#allocation10 + $0xa1]] }
  0x92   :  { %s2296_s25 = sld [smem:[#allocation10 + $0x2b]]  ;;  %3915 = sst [smem:[#allocation60_spill]] %s2336_s23 }
  0x93   :  { %381 = vrot.lane.b32.xlu1 %v379_v55, %s3716_s11  ;;  %310 = vrot.lane.b32.xlu0 %v308_v56, %s3718_s28  ;;  %s2273_s28 = sld [smem:[#allocation10 + $0x34]]  ;;  %3920 = sst [smem:[#allocation65_spill]] %s2346_s8 }
  0x94   :  { %3919 = sst [smem:[#allocation64_spill]] %s2344_s9  ;;  %s2362_s9 = sld [smem:[#allocation10 + $0x20]] }
  0x95   :  { %3921 = sst [smem:[#allocation66_spill]] %s2348_s6  ;;  %s2356_s23 = sld [smem:[#allocation10 + $0x24]] }
  0x96   :  { %3922 = sst [smem:[#allocation67_spill]] %s2350_s7  ;;  %s2364_s8 = sld [smem:[#allocation10 + $0x25]] }
  0x97   :  { %391 = vrot.lane.b32.xlu1 %v389_v59, %s3716_s11  ;;  %452 = vrot.lane.b32.xlu0 %v450_v60, %s3730_s2  ;;  %s2270_s11 = sld [smem:[#allocation10 + $0xb]]  ;;  %3923 = sst [smem:[#allocation68_spill]] %s2352_s26 }
  0x98   :  { %3895 = sst [smem:[#allocation40_spill]] %s2296_s25  ;;  %s2318_s25 = sld [smem:[#allocation10 + $0x3d]] }
  0x99   :  { %3885 = sst [smem:[#allocation30_spill]] %s2273_s28  ;;  %s2294_s28 = sld [smem:[#allocation8 + $0x7]] }
  0x9a   :  { %3928 = sst [smem:[#allocation73_spill]] %s2362_s9  ;;  %s2366_s6 = sld [smem:[#allocation10 + $0x1c]] }
  0x9b   :  { %472 = vrot.lane.b32.xlu1 %v470_v63, %s3730_s2  ;;  %462 = vrot.lane.b32.xlu0 %v460_v1, %s3730_s2  ;;  %s2298_s2 = sld [smem:[#allocation10 + $0x38]]  ;;  %3925 = sst [smem:[#allocation70_spill]] %s2356_s23 }
  0x9c   :  { %3929 = sst [smem:[#allocation74_spill]] %s2364_s8  ;;  %s2368_s7 = sld [smem:[#allocation10 + $0x21]] }
  0x9d   :  { %3884 = sst [smem:[#allocation29_spill]] %s2270_s11  ;;  %s2290_s11 = sld [smem:[#allocation10 + $0x52]] }
  0x9e   :  { %3906 = sst [smem:[#allocation51_spill]] %s2318_s25  ;;  %s2340_s25 = sld [smem:[#allocation10 + $0x65]] }
  0x9f   :  { %3894 = sst [smem:[#allocation39_spill]] %s2294_s28  ;;  %s2316_s28 = sld [smem:[#allocation10 + $0x9]] }
  0xa0   :  { %3930 = sst [smem:[#allocation75_spill]] %s2366_s6  ;;  %s2370_s26 = sld [smem:[#allocation10 + $0x26]] }
  0xa1   :  { %3896 = sst [smem:[#allocation41_spill]] %s2298_s2  ;;  %s2374_s23 = sld [smem:[#allocation10 + $0x6b]] }
  0xa2   :  { %s2320_s2 = sld [smem:[#allocation10 + $0x15]]  ;;  %3931 = sst [smem:[#allocation76_spill]] %s2368_s7 }
  0xa3   :  { %3892 = sst [smem:[#allocation37_spill]] %s2290_s11  ;;  %s2312_s11 = sld [smem:[#allocation10 + $0x4]] }
  0xa4   :  { %3917 = sst [smem:[#allocation62_spill]] %s2340_s25  ;;  %s2380_s9 = sld [smem:[#allocation10 + $0x79]] }
  0xa5   :  { %3905 = sst [smem:[#allocation50_spill]] %s2316_s28  ;;  %s2338_s28 = sld [smem:[#allocation10 + $0x43]] }
  0xa6   :  { %3932 = sst [smem:[#allocation77_spill]] %s2370_s26  ;;  %s2384_s6 = sld [smem:[#allocation10 + $0x74]] }
  0xa7   :  { %3934 = sst [smem:[#allocation79_spill]] %s2374_s23  ;;  %s2386_s7 = sld [smem:[#allocation10 + $0x7e]] }
  0xa8   :  { %3907 = sst [smem:[#allocation52_spill]] %s2320_s2  ;;  %s2342_s2 = sld [smem:[#allocation10 + $0x1b]] }
  0xa9   :  { %3903 = sst [smem:[#allocation48_spill]] %s2312_s11  ;;  %s2334_s11 = sld [smem:[#allocation10 + $0x42]] }
  0xaa   :  { %3937 = sst [smem:[#allocation82_spill]] %s2380_s9  ;;  %s2392_s23 = sld [smem:[#allocation10 + $0x53]] }
  0xab   :  { %3916 = sst [smem:[#allocation61_spill]] %s2338_s28  ;;  %s2358_s28 = sld [smem:[#allocation10 + $0x48]] }
  0xac   :  { %3938 = sst [smem:[#allocation83_spill]] %s2384_s6  ;;  %s2397_s9 = sld [smem:[#allocation10 + $0x13]] }
  0xad   :  { %3939 = sst [smem:[#allocation84_spill]] %s2386_s7  ;;  %s2418_s13 = sld [smem:[#allocation10 + $0x83]] }
  0xae   :  { %3918 = sst [smem:[#allocation63_spill]] %s2342_s2  ;;  %s2360_s2 = sld [smem:[#allocation10 + $0x4d]] }
  0xaf   :  { %3914 = sst [smem:[#allocation59_spill]] %s2334_s11  ;;  %s2424_s30 = sld [smem:[#allocation10 + $0x49]] }
  0xb0   :  { %s2354_s11 = sld [smem:[#allocation10 + $0x1f]]  ;;  %3941 = sst [smem:[#allocation86_spill]] %s2392_s23 }
  0xb1   :  { %3926 = sst [smem:[#allocation71_spill]] %s2358_s28  ;;  %s2376_s28 = sld [smem:[#allocation10 + $0x3f]] }
  0xb2   :  { %3943 = sst [smem:[#allocation88_spill]] %s2397_s9  ;;  %s2426_s17 = sld [smem:[#allocation10 + $0x4e]] }
  0xb3   :  { %3944 = sst [smem:[#allocation89_spill]] %s2403_s27  ;;  %s2434_s12 = sld [smem:[#allocation10 + $0xa6]] }
  0xb4   :  { %3927 = sst [smem:[#allocation72_spill]] %s2360_s2  ;;  %s2378_s2 = sld [smem:[#allocation10 + $0x6f]] }
  0xb5   :  { %3945 = sst [smem:[#allocation90_spill]] %s2405_s1  ;;  %s2436_s14 = sld [smem:[#allocation10 + $0x7a]] }
  0xb6   :  { %3924 = sst [smem:[#allocation69_spill]] %s2354_s11  ;;  %s2372_s11 = sld [smem:[#allocation10 + $0x6a]] }
  0xb7   :  { %3935 = sst [smem:[#allocation80_spill]] %s2376_s28  ;;  %s2395_s28 = sld [smem:[#allocation10 + $0x75]] }
  0xb8   :  { %3946 = sst [smem:[#allocation91_spill]] %s2411_s10  ;;  %s3954_s16 = sld [smem:[#allocation25_spill]] }
  0xb9   :  { %3947 = sst [smem:[#allocation92_spill]] %s2413_s29  ;;  %s3958_s0 = sld [smem:[#allocation27_spill]] }
  0xba   :  { %3936 = sst [smem:[#allocation81_spill]] %s2378_s2  ;;  %s2444_s5 = sld [smem:[#allocation10 + $0x18]] }
  0xbb   :  { %3948 = sst [smem:[#allocation93_spill]] %s2418_s13  ;;  %s2455_s10 = sld [smem:[#allocation10 + $0x7f]] }
  0xbc   :  { %3933 = sst [smem:[#allocation78_spill]] %s2372_s11  ;;  %s2390_s11 = sld [smem:[#allocation10 + $0x70]] }
  0xbd   :  { %3942 = sst [smem:[#allocation87_spill]] %s2395_s28  ;;  %s3962_s29 = sld [smem:[#allocation29_spill]] }
  0xbe   :  { %3949 = sst [smem:[#allocation94_spill]] %s2420_s15  ;;  %s2453_s15 = sld [smem:[#allocation10 + $0x36]]  ;;  %v748_v35 = vstv %s3954_s16 }
  0xbf   :  { %3950 = sst [smem:[#allocation95_spill]] %s2424_s30  ;;  %s2446_s30 = sld [smem:[#allocation10 + $0x5d]]  ;;  %v562_v39 = vstv %s3958_s0 }
  0xc0   :  { %3951 = sst [smem:[#allocation96_spill]] %s2426_s17  ;;  %s3956_s17 = sld [smem:[#allocation26_spill]] }
  0xc1   :  { %3952 = sst [smem:[#allocation97_spill]] %s2434_s12  ;;  %s3959_s12 = sld [smem:[#allocation39_spill]] }
  0xc2   :  { %3940 = sst [smem:[#allocation85_spill]] %s2390_s11  ;;  %s3964_s21 = sld [smem:[#allocation30_spill]] }
  0xc3   :  { %3953 = sst [smem:[#allocation98_spill]] %s2436_s14  ;;  %s3960_s14 = sld [smem:[#allocation28_spill]]  ;;  %v528_v42 = vstv %s3962_s29 }
  0xc4   :  { %3955 = sst [smem:[#allocation99_spill]] %s2444_s5  ;;  %s3965_s24 = sld [smem:[#allocation32_spill]] }
  0xc5   :  { %3957 = sst [smem:[#allocation100_spill]] %s2446_s30  ;;  %s3966_s30 = sld [smem:[#allocation31_spill]] }
  0xc6   :  { %3961 = sst [smem:[#allocation39_spill]] %s2453_s15  ;;  %s2462_s5 = sld [smem:[#allocation10 + $0x1d]]  ;;  %v559_v38 = vstv %s3956_s17 }
  0xc7   :  { %3963 = sst [smem:[#allocation101_spill]] %s2455_s10  ;;  %s3968_s4 = sld [smem:[#allocation33_spill]]  ;;  %v152_v40 = vstv %s3959_s12 }
  0xc8   :  { %s2464_s3 = sld [smem:[#allocation10 + $0x22]]  ;;  %s3970_s18 = sld [smem:[#allocation34_spill]]  ;;  %v752_v43 = vstv %s3964_s21  ;;  %v2499_v51 = vadd.f32 %v152_v40, %v150_v37 }
  0xc9   :  { %s3971_s10 = sld [smem:[#allocation36_spill]]  ;;  %s3972_s15 = sld [smem:[#allocation35_spill]]  ;;  %v714_v41 = vstv %s3960_s14 }
  0xca   :  { %s2471_s13 = sld [smem:[#allocation10 + $0x27]]  ;;  %s3974_s20 = sld [smem:[#allocation37_spill]]  ;;  %v566_v0 = vstv %s3965_s24 }
  0xcb   :  { %s2473_s19 = sld [smem:[#allocation10 + $0x88]]  ;;  %s3976_s16 = sld [smem:[#allocation38_spill]]  ;;  %v597_v44 = vstv %s3966_s30 }
  0xcc   :  { %3967 = sst [smem:[#allocation102_spill]] %s2462_s5  ;;  %s2479_s5 = sld [smem:[#allocation10 + $0x7b]] }
  0xcd   :  { %s3979_s1 = sld [smem:[#allocation40_spill]]  ;;  %s2481_s9 = sld [smem:[#allocation10 + $0x80]]  ;;  %v600_v45 = vstv %s3968_s4 }
  0xce   :  { %3969 = sst [smem:[#allocation103_spill]] %s2464_s3  ;;  %s3977_s3 = sld [smem:[#allocation41_spill]]  ;;  %v893_v46 = vstv %s3970_s18 }
  0xcf   :  { %s3982_s0 = sld [smem:[#allocation43_spill]]  ;;  %s2487_s27 = sld [smem:[#allocation10 + $0xab]]  ;;  %v604_v47 = vstv %s3971_s10  ;;  %v896_v48 = vstv %s3972_s15 }
  0xd0   :  { %3973 = sst [smem:[#allocation104_spill]] %s2471_s13  ;;  %s3983_s13 = sld [smem:[#allocation44_spill]]  ;;  %v931_v49 = vstv %s3974_s20 }
  0xd1   :  { %3975 = sst [smem:[#allocation105_spill]] %s2473_s19  ;;  %s3985_s19 = sld [smem:[#allocation45_spill]]  ;;  %v934_v50 = vstv %s3976_s16  ;;  %v2596_v27 = vpop.permute.xlu1 %179  ;;  %v2606_v16 = vpop.permute.xlu0 %158 }
  0xd2   :  { %3978 = sst [smem:[#allocation106_spill]] %s2479_s5  ;;  %s2489_s12 = sld [smem:[#allocation10 + $0x54]]  ;;  %v160_v11 = vrot.slane %v2606_v16, 2  ;;  %v181_v26 = vrot.slane %v2596_v27, 2 }
  0xd3   :  { %3980 = sst [smem:[#allocation107_spill]] %s2481_s9  ;;  %s3987_s29 = sld [smem:[#allocation46_spill]]  ;;  %v783_v53 = vstv %s3979_s1 }
  0xd4   :  { %s3988_s21 = sld [smem:[#allocation49_spill]]  ;;  %s3989_s14 = sld [smem:[#allocation47_spill]]  ;;  %v718_v52 = vstv %s3977_s3  ;;  %v162_v12 = vsel %vm161_vm0, %v2606_v16, %v160_v11 }
  0xd5   :  { %3984 = sst [smem:[#allocation108_spill]] %s2487_s27  ;;  %s2495_s9 = sld [smem:[#allocation10 + $0x8d]]  ;;  %v532_v55 = vstv %s3982_s0  ;;  %v2632_v23 = vpop.permute.xlu1 %239  ;;  %v2642_v18 = vpop.permute.xlu0 %169 }
  0xd6   :  { %s2497_s30 = sld [smem:[#allocation10 + $0x92]]  ;;  %s2504_s5 = sld [smem:[#allocation10 + $0x97]]  ;;  %v756_v56 = vstv %s3983_s13  ;;  %v171_v19 = vrot.slane %v2642_v18, 2  ;;  %v241_v10 = vrot.slane %v2632_v23, 2 }
  0xd7   :  { %s2506_s20 = sld [smem:[#allocation10 + $0x9c]]  ;;  %v570_v57 = vstv %s3985_s19  ;;  %s2514_s3 = sld [smem:[#allocation10 + $0x59]] }
  0xd8   :  { %3986 = sst [smem:[#allocation109_spill]] %s2489_s12  ;;  %s2522_s13 = sld [smem:[#allocation10 + $0x6c]]  ;;  %v172_v5 = vsel %vm161_vm0, %v2642_v18, %v171_v19  ;;  %v182_v18 = vsel %vm161_vm0, %v2596_v27, %v181_v26  ;;  %v243_v11 = vsel %vm242_vm1, %v2632_v23, %v241_v10 }
  0xd9   :  { %v900_v58 = vstv %s3987_s29  ;;  %s2538_s12 = sld [smem:[#allocation10 + $0x84]]  ;;  %s2546_s22 = sld [smem:[#allocation10 + $0x81]]  ;;  %v2668_v37 = vpop.permute.xlu1 %189  ;;  %v2678_v9 = vpop.permute.xlu0 %250  ;;  %v174_v16 = vadd.f32 %v172_v5, %v2438_v24  ;;  %v184_v3 = vadd.f32 %v182_v18, %v2428_v20 }
  0xda   :  { %v608_v59 = vstv %s3988_s21  ;;  %v938_v60 = vstv %s3989_s14  ;;  %s2530_s14 = sld [smem:[#allocation10 + $0x76]]  ;;  %s2560_s25 = sld [smem:[#allocation10 + $0x4a]]  ;;  %v252_v13 = vrot.slane %v2678_v9, 2 }
  0xdb   :  { %3990 = sst [smem:[#allocation110_spill]] %s2495_s9  ;;  %s2562_s29 = sld [smem:[#allocation10 + $0x4f]] }
  0xdc   :  { %3992 = sst [smem:[#allocation111_spill]] %s2497_s30  ;;  %s2512_s30 = sld [smem:[#allocation10 + $0x62]]  ;;  %v253_v40 = vsel %vm242_vm1, %v2678_v9, %v252_v13  ;;  %v164_v9 = vadd.f32 %v162_v12, %v2430_v21  ;;  %v191_v13 = vrot.slane %v2668_v37, 2 }
  0xdd   :  { %3996 = sst [smem:[#allocation112_spill]] %s2504_s5  ;;  %s2554_s5 = sld [smem:[#allocation10 + $0x45]]  ;;  %v2704_v8 = vpop.permute.xlu1 %320  ;;  %v2714_v15 = vpop.permute.xlu0 %260  ;;  %v255_v26 = vadd.f32 %v253_v40, %v174_v16 }
  0xde   :  { %3998 = sst [smem:[#allocation113_spill]] %s2506_s20  ;;  %s2520_s20 = sld [smem:[#allocation10 + $0x67]]  ;;  %v322_v22 = vrot.slane %v2704_v8, 2  ;;  %v262_v6 = vrot.slane %v2714_v15, 2  ;;  %v245_v27 = vadd.f32 %v243_v11, %v164_v9 }
  0xdf   :  { %4003 = sst [smem:[#allocation115_spill]] %s2514_s3  ;;  %s2528_s3 = sld [smem:[#allocation10 + $0x71]] }
  0xe0   :  { %4009 = sst [smem:[#allocation117_spill]] %s2522_s13  ;;  %s2536_s13 = sld [smem:[#allocation10 + $0x3b]]  ;;  %v324_v10 = vsel %vm323_vm2, %v2704_v8, %v322_v22  ;;  %v263_v8 = vsel %vm242_vm1, %v2714_v15, %v262_v6 }
  0xe1   :  { %4014 = sst [smem:[#allocation119_spill]] %s2530_s14  ;;  %s2544_s14 = sld [smem:[#allocation10 + $0x7c]]  ;;  %v200_v62 = vpop.permute.xlu1 %199  ;;  %v332_v17 = vpop.permute.xlu0 %331  ;;  %v326_v40 = vadd.f32 %v324_v10, %v245_v27  ;;  %v265_v10 = vadd.f32 %v263_v8, %v184_v3 }
  0xe2   :  { %4001 = sst [smem:[#allocation114_spill]] %s2512_s30  ;;  %s2568_s24 = sld [smem:[#allocation10 + $0xb0]]  ;;  %v333_v4 = vrot.slane %v332_v17, 2  ;;  %v201_v24 = vrot.slane %v200_v62, 2 }
  0xe3   :  { %4020 = sst [smem:[#allocation121_spill]] %s2538_s12  ;;  %s2552_s12 = sld [smem:[#allocation10 + $0x40]] }
  0xe4   :  { %4007 = sst [smem:[#allocation116_spill]] %s2520_s20  ;;  %s2570_s20 = sld [smem:[#allocation10 + $0x85]]  ;;  %v334_v54 = vsel %vm323_vm2, %v332_v17, %v333_v4  ;;  %v192_v17 = vsel %vm161_vm0, %v2668_v37, %v191_v13  ;;  %v202_v11 = vsel %vm161_vm0, %v200_v62, %v201_v24 }
  0xe5   :  { %4012 = sst [smem:[#allocation118_spill]] %s2528_s3  ;;  %s2576_s10 = sld [smem:[#allocation10 + $0xb5]]  ;;  %v342_v63 = vpop.permute.xlu1 %341  ;;  %v271_v61 = vpop.permute.xlu0 %270  ;;  %v336_v2 = vadd.f32 %v334_v54, %v255_v26 }
  0xe6   :  { %4018 = sst [smem:[#allocation120_spill]] %s2536_s13  ;;  %s2578_s16 = sld [smem:[#allocation10 + $0xba]]  ;;  %v343_v7 = vrot.slane %v342_v63, 2  ;;  %v272_v16 = vrot.slane %v271_v61, 2 }
  0xe7   :  { %4024 = sst [smem:[#allocation122_spill]] %s2544_s14  ;;  %s2584_s15 = sld [smem:[#allocation10 + $0xbf]] }
  0xe8   :  { %4026 = sst [smem:[#allocation123_spill]] %s2546_s22  ;;  %s2592_s9 = sld [smem:[#allocation10 + $0x89]]  ;;  %v344_v18 = vsel %vm323_vm2, %v342_v63, %v343_v7  ;;  %v273_v3 = vsel %vm242_vm1, %v271_v61, %v272_v16 }
  0xe9   :  { %4029 = sst [smem:[#allocation124_spill]] %s2552_s12  ;;  %s2594_s2 = sld [smem:[#allocation10 + $0x5e]]  ;;  %v413_v5 = vpop.permute.xlu1 %412  ;;  %v402_v21 = vpop.permute.xlu0 %401 }
  0xea   :  { %4030 = sst [smem:[#allocation125_spill]] %s2554_s5  ;;  %s2604_s7 = sld [smem:[#allocation10 + $0xa7]]  ;;  %v414_v19 = vrot.slane %v413_v5, 2  ;;  %v403_v14 = vrot.slane %v402_v21, 2 }
  0xeb   :  { %4033 = sst [smem:[#allocation126_spill]] %s2560_s25  ;;  %s2612_s28 = sld [smem:[#allocation10 + $0x8e]] }
  0xec   :  { %4035 = sst [smem:[#allocation127_spill]] %s2562_s29  ;;  %s2628_s4 = sld [smem:[#allocation10 + $0x8a]]  ;;  %v415_v22 = vsel %vm404_vm3, %v413_v5, %v414_v19  ;;  %v405_v20 = vsel %vm404_vm3, %v402_v21, %v403_v14  ;;  %v204_v14 = vadd.f32 %v202_v11, %v2448_v28  ;;  %v346_v19 = vadd.f32 %v344_v18, %v265_v10 }
  0xed   :  { %4037 = sst [smem:[#allocation128_spill]] %s2568_s24  ;;  %s2614_s3 = sld [smem:[#allocation10 + $0x93]]  ;;  %v417_v9 = vadd.f32 %v415_v22, %v336_v2  ;;  %v281_v54 = vpop.permute.xlu1 %280  ;;  %v407_v26 = vadd.f32 %v405_v20, %v326_v40  ;;  %v210_v37 = vpop.permute.xlu0 %209  ;;  %v194_v2 = vadd.f32 %v192_v17, %v2440_v25 }
  0xee   :  { %4038 = sst [smem:[#allocation129_spill]] %s2570_s20  ;;  %s2586_s20 = sld [smem:[#allocation10 + $0xc4]]  ;;  %v282_v23 = vrot.slane %v281_v54, 2  ;;  %v211_v15 = vrot.slane %v210_v37, 2 }
  0xef   :  { %4039 = sst [smem:[#allocation130_spill]] %s2576_s10  ;;  %s2638_s6 = sld [smem:[#allocation10 + $0xa4]]  ;;  %v2797_v6 = vmax.f32 %v417_v9, 0.0  ;;  %v2802_v63 = vmax.f32 %v407_v26, 0.0  ;;  %v275_v11 = vadd.f32 %v273_v3, %v194_v2 }
  0xf0   :  { %4041 = sst [smem:[#allocation131_spill]] %s2578_s16  ;;  %s2630_s16 = sld [smem:[#allocation10 + $0x86]]  ;;  %v283_v24 = vsel %vm242_vm1, %v281_v54, %v282_v23  ;;  %v212_v5 = vsel %vm161_vm0, %v210_v37, %v211_v15 }
  0xf1   :  { %4044 = sst [smem:[#allocation132_spill]] %s2584_s15  ;;  %s2622_s15 = sld [smem:[#allocation10 + $0x9d]]  ;;  %v423_v27 = vpop.permute.xlu1 %422  ;;  %v352_v40 = vpop.permute.xlu0 %351  ;;  %v708_v25 = vmul.f32 %v707_v29, %v2802_v63  ;;  %v711_v28 = vmul.f32 %v710_v30, %v2797_v6  ;;  %v525_v17 = vmul.f32 %v524_v33, %v2797_v6  ;;  %v522_v61 = vmul.f32 %v521_v31, %v2802_v63 }
  0xf2   :  { %4050 = sst [smem:[#allocation134_spill]] %s2592_s9  ;;  %s2640_s9 = sld [smem:[#allocation10 + $0xa9]]  ;;  %v424_v21 = vrot.slane %v423_v27, 2  ;;  %v353_v8 = vrot.slane %v352_v40, 2  ;;  %v746_v23 = vmul.f32 %v745_v34, %v2802_v63  ;;  %v749_v22 = vmul.f32 %v748_v35, %v2797_v6 }
  0xf3   :  { %4052 = sst [smem:[#allocation135_spill]] %s2594_s2  ;;  %s2656_s18 = sld [smem:[#allocation10 + $0x99]]  ;;  %v560_v30 = vmul.f32 %v559_v38, %v2802_v63  ;;  %v563_v33 = vmul.f32 %v562_v39, %v2797_v6  ;;  %v285_v16 = vadd.f32 %v283_v24, %v204_v14  ;;  %v214_v9 = vadd.f32 %v212_v5, %v2457_v32 }
  0xf4   :  { %4046 = sst [smem:[#allocation133_spill]] %s2586_s20  ;;  %s2602_s20 = sld [smem:[#allocation10 + $0xa2]]  ;;  %v425_v29 = vsel %vm404_vm3, %v423_v27, %v424_v21  ;;  %v354_v20 = vsel %vm323_vm2, %v352_v40, %v353_v8  ;;  %v712_v18 = vadd.f32 %v711_v28, %v708_v25  ;;  %v598_v38 = vmul.f32 %v597_v44, %v2802_v63 }
  0xf5   :  { %4059 = sst [smem:[#allocation137_spill]] %s2604_s7  ;;  %s2620_s7 = sld [smem:[#allocation10 + $0x98]]  ;;  %v427_v31 = vadd.f32 %v425_v29, %v346_v19  ;;  %v291_v34 = vpop.permute.xlu1 %290  ;;  %v220_v35 = vpop.permute.xlu0 %219  ;;  %v601_v39 = vmul.f32 %v600_v45, %v2797_v6  ;;  %v526_v37 = vadd.f32 %v525_v17, %v522_v61  ;;  %v750_v10 = vadd.f32 %v749_v22, %v746_v23 }
  0xf6   :  { %4064 = sst [smem:[#allocation138_spill]] %s2614_s3  ;;  %s2664_s0 = sld [smem:[#allocation10 + $0x63]]  ;;  %v292_v54 = vrot.slane %v291_v34, 2  ;;  %v221_v32 = vrot.slane %v220_v35, 2  ;;  %v356_v15 = vadd.f32 %v354_v20, %v275_v11  ;;  %v564_v14 = vadd.f32 %v563_v33, %v560_v30 }
  0xf7   :  { %4067 = sst [smem:[#allocation139_spill]] %s2622_s15  ;;  %s2649_s15 = sld [smem:[#allocation10 + $0x94]]  ;;  %v2841_v26 = vmax.f32 %v427_v31, 0.0  ;;  %v894_v19 = vmul.f32 %v893_v46, %v2802_v63  ;;  %v897_v5 = vmul.f32 %v896_v48, %v2797_v6  ;;  %v602_v46 = vadd.f32 %v601_v39, %v598_v38 }
  0xf8   :  { %4071 = sst [smem:[#allocation140_spill]] %s2628_s4  ;;  %s2666_s26 = sld [smem:[#allocation10 + $0xac]]  ;;  %v293_v2 = vsel %vm242_vm1, %v291_v34, %v292_v54  ;;  %v222_v44 = vsel %vm161_vm0, %v220_v35, %v221_v32  ;;  %v932_v25 = vmul.f32 %v931_v49, %v2802_v63  ;;  %v784_v35 = vmul.f32 %v783_v53, %v2802_v63 }
  0xf9   :  { %4073 = sst [smem:[#allocation141_spill]] %s2630_s16  ;;  %s2647_s16 = sld [smem:[#allocation10 + $0x8f]]  ;;  %v433_v3 = vpop.permute.xlu1 %432  ;;  %v715_v45 = vmul.f32 %v714_v41, %v2841_v26  ;;  %v529_v24 = vmul.f32 %v528_v42, %v2841_v26  ;;  %v362_v21 = vpop.permute.xlu0 %361  ;;  %v753_v40 = vmul.f32 %v752_v43, %v2841_v26  ;;  %v295_v28 = vadd.f32 %v293_v2, %v214_v9 }
  0xfa   :  { %4057 = sst [smem:[#allocation136_spill]] %s2602_s20  ;;  %s2674_s27 = sld [smem:[#allocation10 + $0xa3]]  ;;  %v434_v27 = vrot.slane %v433_v3, 2  ;;  %v363_v17 = vrot.slane %v362_v21, 2  ;;  %v567_v41 = vmul.f32 %v566_v0, %v2841_v26  ;;  %v935_v42 = vmul.f32 %v934_v50, %v2797_v6 }
  0xfb   :  { %4077 = sst [smem:[#allocation142_spill]] %s2638_s6  ;;  %s2676_s11 = sld [smem:[#allocation10 + $0xa8]]  ;;  %v224_v48 = vadd.f32 %v222_v44, %v2466_v36  ;;  %v716_v61 = vadd.f32 %v715_v45, %v712_v18  ;;  %v605_v43 = vmul.f32 %v604_v47, %v2841_v26  ;;  %v530_v11 = vadd.f32 %v529_v24, %v526_v37 }
  0xfc   :  { %4079 = sst [smem:[#allocation143_spill]] %s2640_s9  ;;  %s2658_s9 = sld [smem:[#allocation10 + $0x9e]]  ;;  %v435_v8 = vsel %vm404_vm3, %v433_v3, %v434_v27  ;;  %v364_v49 = vsel %vm323_vm2, %v362_v21, %v363_v17  ;;  %v901_v0 = vmul.f32 %v900_v58, %v2841_v26  ;;  %v754_v30 = vadd.f32 %v753_v40, %v750_v10 }
  0xfd   :  { %s4089_s4 = sld [smem:[#allocation131_spill]]  ;;  %s4090_s23 = sld [smem:[#allocation132_spill]]  ;;  %v437_v23 = vadd.f32 %v435_v8, %v356_v15  ;;  %v301_v22 = vpop.permute.xlu1 %300  ;;  %v230_v50 = vpop.permute.xlu0 %229  ;;  %v898_v36 = vadd.f32 %v897_v5, %v894_v19  ;;  %v939_v33 = vmul.f32 %v938_v60, %v2841_v26  ;;  %v568_v31 = vadd.f32 %v567_v41, %v564_v14 }
  0xfe   :  { %4085 = sst [smem:[#allocation144_spill]] %s2666_s26  ;;  %s2682_s19 = sld [smem:[#allocation10 + $0x68]]  ;;  %v302_v29 = vrot.slane %v301_v22, 2  ;;  %v231_v47 = vrot.slane %v230_v50, 2  ;;  %v936_v20 = vadd.f32 %v935_v42, %v932_v25  ;;  %v366_v34 = vadd.f32 %v364_v49, %v285_v16 }
  0xff   :  { %s2684_s2 = sld [smem:[#allocation10 + $0x6d]]  ;;  %s4093_s8 = sld [smem:[#allocation134_spill]]  ;;  %v2881_v9 = vmax.f32 %v437_v23, 0.0  ;;  %v606_v58 = vadd.f32 %v605_v43, %v602_v46  ;;  %v902_v54 = vadd.f32 %v901_v0, %v898_v36 }
 0x100   :  { %4087 = sst [smem:[#allocation145_spill]] %s2674_s27  ;;  %s2692_s17 = sld [smem:[#allocation10 + $0x72]]  ;;  %v303_v18 = vsel %vm242_vm1, %v301_v22, %v302_v29  ;;  %v232_v60 = vsel %vm161_vm0, %v230_v50, %v231_v47  ;;  %v940_v32 = vadd.f32 %v939_v33, %v936_v20 }
 0x101   :  { %4088 = sst [smem:[#allocation146_spill]] %s2676_s11  ;;  %s2694_s3 = sld [smem:[#allocation10 + $0x77]]  ;;  %v443_v38 = vpop.permute.xlu1 %442  ;;  %v719_v39 = vmul.f32 %v718_v52, %v2881_v9  ;;  %v372_v10 = vpop.permute.xlu0 %371  ;;  %v533_v16 = vmul.f32 %v532_v55, %v2881_v9  ;;  %v757_v15 = vmul.f32 %v756_v56, %v2881_v9  ;;  %v571_v53 = vmul.f32 %v570_v57, %v2881_v9 }
 0x102   :  { %s4099_s5 = sld [smem:[#allocation138_spill]]  ;;  %s4100_s14 = sld [smem:[#allocation139_spill]]  ;;  %v444_v37 = vrot.slane %v443_v38, 2  ;;  %v373_v2 = vrot.slane %v372_v10, 2  ;;  %v609_v14 = vmul.f32 %v608_v59, %v2881_v9  ;;  %v305_v45 = vadd.f32 %v303_v18, %v224_v48 }
 0x103   :  { %s2700_s22 = sld [smem:[#allocation10 + $0x8b]]  ;;  %s2702_s29 = sld [smem:[#allocation10 + $0xae]]  ;;  %v234_v24 = vadd.f32 %v232_v60, %v2499_v51  ;;  %v720_v59 = vadd.f32 %v719_v39, %v716_v61  ;;  %v534_v41 = vadd.f32 %v533_v16, %v530_v11  ;;  %v758_v51 = vadd.f32 %v757_v15, %v754_v30 }
 0x104   :  { %s4103_s25 = sld [smem:[#allocation140_spill]]  ;;  %s2710_s12 = sld [smem:[#allocation10 + $0x95]]  ;;  %v445_v55 = vsel %vm404_vm3, %v443_v38, %v444_v37  ;;  %v374_v57 = vsel %vm323_vm2, %v372_v10, %v373_v2  ;;  %v572_v42 = vadd.f32 %v571_v53, %v568_v31  ;;  %v610_v23 = vadd.f32 %v609_v14, %v606_v58 }
 0x105   :  { %4092 = sst [smem:[#allocation131_spill]] %s2684_s2  ;;  %s2708_s24 = sld [smem:[#allocation10 + $0x90]]  ;;  %v447_v27 = vadd.f32 %v445_v55, %v366_v34  ;;  %v382_v21 = vpop.permute.xlu1 %381  ;;  %v311_v17 = vpop.permute.xlu0 %310  ;;  %v376_v8 = vadd.f32 %v374_v57, %v295_v28 }
 0x106   :  { %4097 = sst [smem:[#allocation132_spill]] %s2692_s17  ;;  %s2720_s20 = sld [smem:[#allocation10 + $0x9a]]  ;;  %v383_v25 = vrot.slane %v382_v21, 2  ;;  %v312_v43 = vrot.slane %v311_v17, 2 }
 0x107   :  { %4098 = sst [smem:[#allocation134_spill]] %s2694_s3  ;;  %s2722_s21 = sld [smem:[#allocation10 + $0x9f]]  ;;  %v2918_v48 = vmax.f32 %v447_v27, 0.0 }
 0x108   :  { %s2726_s13 = sld [smem:[#allocation10 + $0xb1]]  ;;  %s2738_s6 = sld [smem:[#allocation10 + $0xad]]  ;;  %v384_v11 = vsel %vm323_vm2, %v382_v21, %v383_v25  ;;  %v313_v50 = vsel %vm242_vm1, %v311_v17, %v312_v43 }
 0x109   :  { %4101 = sst [smem:[#allocation138_spill]] %s2700_s22  ;;  %s2750_s26 = sld [smem:[#allocation10 + $0xbb]]  ;;  %v1204_v1 = vstv %s2700_s22  ;;  %v392_v30 = vpop.permute.xlu1 %391  ;;  %v453_v20 = vpop.permute.xlu0 %452  ;;  %v386_v15 = vadd.f32 %v384_v11, %v305_v45  ;;  %v315_v53 = vadd.f32 %v313_v50, %v234_v24 }
 0x10a   :  { %4102 = sst [smem:[#allocation139_spill]] %s2702_s29  ;;  %s2742_s10 = sld [smem:[#allocation10 + $0xb6]]  ;;  %v393_v31 = vrot.slane %v392_v30, 2  ;;  %v454_v60 = vrot.slane %v453_v20, 2 }
 0x10b   :  { %4105 = sst [smem:[#allocation140_spill]] %s2708_s24  ;;  %s2774_s27 = sld [smem:[#allocation10 + $0xc5]] }
 0x10c   :  { %4107 = sst [smem:[#allocation147_spill]] %s2710_s12  ;;  %s2766_s11 = sld [smem:[#allocation10 + $0xc0]]  ;;  %v394_v2 = vsel %vm323_vm2, %v392_v30, %v393_v31 }
 0x10d   :  { %4108 = sst [smem:[#allocation148_spill]] %s2720_s20  ;;  %s2780_s29 = sld [smem:[#allocation10 + $0xb3]]  ;;  %v463_v21 = vpop.permute.xlu0 %462 }
 0x10e   :  { %4109 = sst [smem:[#allocation149_spill]] %s2722_s21  ;;  %s4144_s12 = sld [smem:[#allocation42_spill]] }
 0x10f   :  { %4110 = sst [smem:[#allocation150_spill]] %s2726_s13  ;;  %v1322_v4 = vstv %s2750_s26  ;;  %s4151_s20 = sld [smem:[#allocation65_spill]] }
 0x110   :  { %4111 = sst [smem:[#allocation151_spill]] %s2738_s6  ;;  %v1318_v12 = vstv %s2742_s10  ;;  %s4147_s6 = sld [smem:[#allocation56_spill]] }
 0x111   :  { %4112 = sst [smem:[#allocation152_spill]] %s2742_s10  ;;  %v1330_v62 = vstv %s2774_s27  ;;  %s4154_s10 = sld [smem:[#allocation52_spill]] }
 0x112   :  { %4113 = sst [smem:[#allocation153_spill]] %s2750_s26  ;;  %v1326_v13 = vstv %s2766_s11  ;;  %s4153_s26 = sld [smem:[#allocation51_spill]] }
 0x113   :  { %4114 = sst [smem:[#allocation154_spill]] %s2766_s11  ;;  %v1390_v7 = vstv %s2780_s29  ;;  %s4155_s11 = sld [smem:[#allocation53_spill]] }
 0x114   :  { %4115 = sst [smem:[#allocation155_spill]] %s2774_s27  ;;  %s4145_s27 = sld [smem:[#allocation58_spill]]  ;;  %v4148_v19 = vstv %s4144_s12 }
 0x115   :  { %4116 = sst [smem:[#allocation156_spill]] %s2780_s29  ;;  %s4146_s29 = sld [smem:[#allocation54_spill]]  ;;  %v787_v52 = vmul.f32 %v4148_v19, %v2797_v6  ;;  %v4160_v0 = vstv %s4151_s20 }
 0x116   :  { %v4152_v40 = vstv %s4147_s6  ;;  %s4156_s13 = sld [smem:[#allocation55_spill]]  ;;  %s4157_s21 = sld [smem:[#allocation57_spill]]  ;;  %v795_v29 = vmul.f32 %v4160_v0, %v2881_v9 }
 0x117   :  { %v943_v46 = vmul.f32 %v4152_v40, %v2881_v9  ;;  %s4158_s12 = sld [smem:[#allocation48_spill]]  ;;  %v788_v22 = vadd.f32 %v787_v52, %v784_v35  ;;  %v4163_v33 = vstv %s4154_s10  ;;  %v455_v52 = vsel %vm404_vm3, %v453_v20, %v454_v60  ;;  %s4174_s10 = sld [smem:[#allocation60_spill]] }
 0x118   :  { %v4162_v36 = vstv %s4153_s26  ;;  %v537_v47 = vmul.f32 %v4163_v33, %v2918_v48  ;;  %s4165_s6 = sld [smem:[#allocation64_spill]]  ;;  %v457_v27 = vadd.f32 %v455_v52, %v376_v8  ;;  %s4173_s26 = sld [smem:[#allocation59_spill]]  ;;  %v396_v40 = vadd.f32 %v394_v2, %v315_v53 }
 0x119   :  { %v944_v61 = vadd.f32 %v943_v46, %v940_v32  ;;  %v723_v28 = vmul.f32 %v4162_v36, %v2918_v48  ;;  %v4164_v34 = vstv %s4155_s11  ;;  %s4171_s20 = sld [smem:[#allocation80_spill]]  ;;  %s4175_s11 = sld [smem:[#allocation61_spill]]  ;;  %v464_v46 = vrot.slane %v463_v21, 2 }
 0x11a   :  { %v4149_v44 = vstv %s4145_s27  ;;  %s4159_s27 = sld [smem:[#allocation50_spill]]  ;;  %v761_v58 = vmul.f32 %v4164_v34, %v2918_v48  ;;  %v538_v55 = vadd.f32 %v537_v47, %v534_v41  ;;  %s4185_s3 = sld [smem:[#allocation67_spill]] }
 0x11b   :  { %v791_v3 = vmul.f32 %v4149_v44, %v2841_v26  ;;  %v4150_v56 = vstv %s4146_s29  ;;  %s4161_s29 = sld [smem:[#allocation62_spill]]  ;;  %v473_v44 = vpop.permute.xlu1 %472  ;;  %s4187_s30 = sld [smem:[#allocation69_spill]] }
 0x11c   :  { %v905_v5 = vmul.f32 %v4150_v56, %v2881_v9  ;;  %v4167_v38 = vstv %s4157_s21  ;;  %v474_v57 = vrot.slane %v473_v44, 2  ;;  %v762_v45 = vadd.f32 %v761_v58, %v758_v51  ;;  %s4177_s21 = sld [smem:[#allocation66_spill]]  ;;  %s4190_s24 = sld [smem:[#allocation73_spill]] }
 0x11d   :  { %v792_v18 = vadd.f32 %v791_v3, %v788_v22  ;;  %v613_v39 = vmul.f32 %v4167_v38, %v2918_v48  ;;  %v4168_v32 = vstv %s4158_s12  ;;  %v724_v3 = vadd.f32 %v723_v28, %v720_v59  ;;  %s4178_s12 = sld [smem:[#allocation88_spill]]  ;;  %s2989_s17 = sld [smem:[#allocation10 + $0xb8]] }
 0x11e   :  { %v906_v49 = vadd.f32 %v905_v5, %v902_v54  ;;  %v4166_v54 = vstv %s4156_s13  ;;  %v636_v37 = vmul.f32 %v4168_v32, %v2802_v63  ;;  %v4172_v56 = vstv %s4165_s6  ;;  %s4176_s13 = sld [smem:[#allocation63_spill]]  ;;  %s4183_s6 = sld [smem:[#allocation78_spill]] }
 0x11f   :  { %v575_v35 = vmul.f32 %v4166_v54, %v2918_v48  ;;  %v947_v5 = vmul.f32 %v4172_v56, %v2918_v48  ;;  %v614_v25 = vadd.f32 %v613_v39, %v610_v23  ;;  %v2954_v59 = vmax.f32 %v457_v27, 0.0  ;;  %s3067_s22 = sld [smem:[#allocation10 + $0xb7]]  ;;  %s4261_s1 = sld [smem:[#allocation39_spill]] }
 0x120   :  { %v4169_v10 = vstv %s4159_s27  ;;  %v475_v41 = vsel %vm404_vm3, %v473_v44, %v474_v57  ;;  %s4179_s27 = sld [smem:[#allocation75_spill]]  ;;  %v796_v8 = vadd.f32 %v795_v29, %v792_v18  ;;  %v4180_v43 = vstv %s4171_s20  ;;  %s4188_s20 = sld [smem:[#allocation71_spill]] }
 0x121   :  { %v639_v16 = vmul.f32 %v4169_v10, %v2797_v6  ;;  %v4170_v14 = vstv %s4161_s29  ;;  %v576_v24 = vadd.f32 %v575_v35, %v572_v42  ;;  %v799_v22 = vmul.f32 %v4180_v43, %v2918_v48  ;;  %s4181_s29 = sld [smem:[#allocation99_spill]] }
 0x122   :  { %v909_v19 = vmul.f32 %v4170_v14, %v2918_v48  ;;  %v477_v51 = vadd.f32 %v475_v41, %v396_v40  ;;  %v465_v42 = vsel %vm404_vm3, %v463_v21, %v464_v46  ;;  %v948_v0 = vadd.f32 %v947_v5, %v944_v61  ;;  %s4255_s2 = sld [smem:[#allocation91_spill]] }
 0x123   :  { %v640_v11 = vadd.f32 %v639_v16, %v636_v37  ;;  %v467_v50 = vadd.f32 %v465_v42, %v386_v15  ;;  %v4182_v23 = vstv %s4173_s26  ;;  %v4184_v30 = vstv %s4174_s10  ;;  %s4192_s26 = sld [smem:[#allocation68_spill]]  ;;  %s4194_s10 = sld [smem:[#allocation70_spill]] }
 0x124   :  { %v910_v17 = vadd.f32 %v909_v19, %v906_v49  ;;  %v727_v49 = vmul.f32 %v4182_v23, %v2954_v59  ;;  %v541_v36 = vmul.f32 %v4184_v30, %v2954_v59  ;;  %v4186_v29 = vstv %s4175_s11  ;;  %s4196_s11 = sld [smem:[#allocation76_spill]] }
 0x125   :  { %v765_v28 = vmul.f32 %v4186_v29, %v2954_v59  ;;  %v2970_v33 = vmax.f32 %v477_v51, 0.0  ;;  %v4189_v47 = vstv %s4176_s13  ;;  %v4191_v31 = vstv %s4177_s21  ;;  %s4198_s13 = sld [smem:[#allocation72_spill]]  ;;  %4199 = sst [smem:[#allocation20_spill]] %s2989_s17 }
 0x126   :  { %v579_v61 = vmul.f32 %v4189_v47, %v2954_v59  ;;  %v643_v20 = vmul.f32 %v4191_v31, %v2841_v26  ;;  %v4193_v34 = vstv %s4178_s12  ;;  %v2981_v54 = vmax.f32 %v467_v50, 0.0  ;;  %s4202_s21 = sld [smem:[#allocation74_spill]]  ;;  %s4204_s12 = sld [smem:[#allocation81_spill]] }
 0x127   :  { %v647_v58 = vmul.f32 %v4193_v34, %v2881_v9  ;;  %v4195_v35 = vstv %s4179_s27  ;;  %v800_v60 = vadd.f32 %v799_v22, %v796_v8  ;;  %v4197_v38 = vstv %s4181_s29  ;;  %s4209_s27 = sld [smem:[#allocation77_spill]] }
 0x128   :  { %v617_v18 = vmul.f32 %v4195_v35, %v2954_v59  ;;  %v651_v39 = vmul.f32 %v4197_v38, %v2918_v48  ;;  %v728_v32 = vadd.f32 %v727_v49, %v724_v3  ;;  %v542_v37 = vadd.f32 %v541_v36, %v538_v55  ;;  %s4213_s29 = sld [smem:[#allocation85_spill]] }
 0x129   :  { %v766_v10 = vadd.f32 %v765_v28, %v762_v45  ;;  %v4200_v16 = vstv %s4183_s6  ;;  %v4201_v53 = vstv %s4185_s3  ;;  %v4203_v14 = vstv %s4187_s30  ;;  %s4211_s3 = sld [smem:[#allocation83_spill]]  ;;  %s4212_s30 = sld [smem:[#allocation79_spill]] }
 0x12a   :  { %v913_v15 = vmul.f32 %v4200_v16, %v2954_v59  ;;  %v731_v2 = vmul.f32 %v4201_v53, %v2981_v54  ;;  %v545_v19 = vmul.f32 %v4203_v14, %v2981_v54  ;;  %v4205_v52 = vstv %s4188_s20  ;;  %s4216_s6 = sld [smem:[#allocation89_spill]]  ;;  %s4217_s20 = sld [smem:[#allocation95_spill]] }
 0x12b   :  { %v769_v44 = vmul.f32 %v4205_v52, %v2981_v54  ;;  %v4206_v56 = vstv %s4190_s24  ;;  %v4207_v3 = vstv %s4192_s26  ;;  %v4208_v27 = vstv %s4194_s10  ;;  %s3018_s24 = sld [smem:[#allocation10 + $0xbd]]  ;;  %s4222_s26 = sld [smem:[#allocation87_spill]] }
 0x12c   :  { %v583_v5 = vmul.f32 %v4206_v56, %v2981_v54  ;;  %v735_v55 = vmul.f32 %v4207_v3, %v2970_v33  ;;  %v549_v57 = vmul.f32 %v4208_v27, %v2970_v33  ;;  %v580_v21 = vadd.f32 %v579_v61, %v576_v24  ;;  %s4225_s10 = sld [smem:[#allocation102_spill]] }
 0x12d   :  { %v4210_v45 = vstv %s4196_s11  ;;  %v732_v46 = vadd.f32 %v731_v2, %v728_v32  ;;  %v546_v41 = vadd.f32 %v545_v19, %v542_v37  ;;  %v4214_v8 = vstv %s4198_s13  ;;  %s4226_s11 = smov 127   ;;  %s4227_s13 = sld [smem:[#allocation82_spill]] }
 0x12e   :  { %v621_v40 = vmul.f32 %v4210_v45, %v2981_v54  ;;  %v773_v43 = vmul.f32 %v4214_v8, %v2970_v33  ;;  %v618_v22 = vadd.f32 %v617_v18, %v614_v25  ;;  %v770_v51 = vadd.f32 %v769_v44, %v766_v10 }
 0x12f   :  { %v584_v42 = vadd.f32 %v583_v5, %v580_v21  ;;  %v4218_v24 = vstv %s4202_s21  ;;  %v4219_v23 = vstv %s4204_s12  ;;  %v736_v30 = vadd.f32 %v735_v55, %v732_v46  ;;  %s4229_s21 = sld [smem:[#allocation84_spill]]  ;;  %s3047_s12 = sld [smem:[#allocation10 + $0xb2]] }
 0x130   :  { %v587_v50 = vmul.f32 %v4218_v24, %v2970_v33  ;;  %v917_v49 = vmul.f32 %v4219_v23, %v2981_v54  ;;  %v550_v36 = vadd.f32 %v549_v57, %v546_v41  ;;  %v622_v29 = vadd.f32 %v621_v40, %v618_v22 }
 0x131   :  { %4215 = sst [smem:[#allocation21_spill]] %s3018_s24  ;;  %v914_v28 = vadd.f32 %v913_v15, %v910_v17  ;;  %v4220_v47 = vstv %s4209_s27  ;;  %v4221_v61 = vstv %s4211_s3  ;;  %v4223_v34 = vstv %s4212_s30  ;;  %738 = vrot.lane.b32.xlu1 %v736_v30, %s4226_s11  ;;  %s4233_s3 = sld [smem:[#allocation103_spill]] }
 0x132   :  { %v625_v25 = vmul.f32 %v4220_v47, %v2970_v33  ;;  %v921_v31 = vmul.f32 %v4221_v61, %v2970_v33  ;;  %v951_v35 = vmul.f32 %v4223_v34, %v2954_v59  ;;  %v4224_v18 = vstv %s4213_s29  ;;  %552 = vrot.lane.b32.xlu0 %v550_v36, %s4226_s11  ;;  %s4231_s27 = sld [smem:[#allocation93_spill]]  ;;  %s4235_s30 = sld [smem:[#allocation105_spill]] }
 0x133   :  { %v955_v38 = vmul.f32 %v4224_v18, %v2981_v54  ;;  %v918_v17 = vadd.f32 %v917_v49, %v914_v28  ;;  %v4228_v32 = vstv %s4216_s6  ;;  %v4230_v10 = vstv %s4217_s20  ;;  %s4236_s29 = sld [smem:[#allocation96_spill]]  ;;  %s4240_s20 = sld [smem:[#allocation110_spill]] }
 0x134   :  { %v803_v37 = vmul.f32 %v4228_v32, %v2954_v59  ;;  %v807_v16 = vmul.f32 %v4230_v10, %v2981_v54  ;;  %v1394_v15 = vstv %s2989_s17  ;;  %v774_v53 = vadd.f32 %v773_v43, %v770_v51  ;;  %s4238_s6 = sld [smem:[#allocation104_spill]]  ;;  %s4241_s17 = smov 126  }
 0x135   :  { %v588_v2 = vadd.f32 %v587_v50, %v584_v42  ;;  %v952_v14 = vadd.f32 %v951_v35, %v948_v0  ;;  %v644_v19 = vadd.f32 %v643_v20, %v640_v11  ;;  %v626_v52 = vadd.f32 %v625_v25, %v622_v29 }
 0x136   :  { %v4232_v44 = vstv %s4222_s26  ;;  %v804_v5 = vadd.f32 %v803_v37, %v800_v60  ;;  %v4234_v3 = vstv %s4225_s10  ;;  %v4237_v21 = vstv %s4227_s13  ;;  %776 = vrot.lane.b32.xlu1 %v774_v53, %s4241_s17  ;;  %s4242_s26 = sld [smem:[#allocation86_spill]]  ;;  %s4243_s10 = sld [smem:[#allocation90_spill]] }
 0x137   :  { %v959_v56 = vmul.f32 %v4232_v44, %v2970_v33  ;;  %v655_v55 = vmul.f32 %v4234_v3, %v2954_v59  ;;  %v956_v27 = vadd.f32 %v955_v38, %v952_v14  ;;  %v648_v57 = vadd.f32 %v647_v58, %v644_v19  ;;  %590 = vrot.lane.b32.xlu0 %v588_v2, %s4241_s17  ;;  %s4245_s13 = sld [smem:[#allocation111_spill]] }
 0x138   :  { %v1080_v45 = vmul.f32 %v4237_v21, %v2802_v63  ;;  %v4239_v0 = vstv %s4229_s21  ;;  %v922_v20 = vadd.f32 %v921_v31, %v918_v17  ;;  %v808_v60 = vadd.f32 %v807_v16, %v804_v5  ;;  %s4247_s21 = sld [smem:[#allocation100_spill]] }
 0x139   :  { %v1083_v11 = vmul.f32 %v4239_v0, %v2797_v6  ;;  %v4244_v40 = vstv %s4231_s27  ;;  %v1398_v58 = vstv %s3018_s24  ;;  %v652_v41 = vadd.f32 %v651_v39, %v648_v57  ;;  %s4251_s27 = sld [smem:[#allocation114_spill]]  ;;  %s4253_s24 = sld [smem:[#allocation112_spill]] }
 0x13a   :  { %v1087_v46 = vmul.f32 %v4244_v40, %v2841_v26  ;;  %v4246_v8 = vstv %s4233_s3  ;;  %v4248_v51 = vstv %s4235_s30  ;;  %v960_v24 = vadd.f32 %v959_v56, %v956_v27  ;;  %s4254_s3 = sld [smem:[#allocation113_spill]]  ;;  %s4257_s30 = sld [smem:[#allocation92_spill]] }
 0x13b   :  { %v659_v43 = vmul.f32 %v4246_v8, %v2981_v54  ;;  %v1084_v22 = vadd.f32 %v1083_v11, %v1080_v45  ;;  %v1091_v42 = vmul.f32 %v4248_v51, %v2881_v9  ;;  %v4249_v50 = vstv %s4236_s29  ;;  %s4259_s29 = smov 125   ;;  %924 = vrot.lane.b32.xlu0 %v922_v20, %s4226_s11 }
 0x13c   :  { %v811_v23 = vmul.f32 %v4249_v50, %v2970_v33  ;;  %v4250_v49 = vstv %s4238_s6  ;;  %v4252_v36 = vstv %s4240_s20  ;;  %v656_v29 = vadd.f32 %v655_v55, %v652_v41  ;;  %628 = vrot.lane.b32.xlu1 %v626_v52, %s4259_s29  ;;  %s4260_s6 = sld [smem:[#allocation116_spill]]  ;;  %s4264_s20 = sld [smem:[#allocation117_spill]] }
 0x13d   :  { %v663_v30 = vmul.f32 %v4250_v49, %v2970_v33  ;;  %v1095_v39 = vmul.f32 %v4252_v36, %v2918_v48  ;;  %v1088_v28 = vadd.f32 %v1087_v46, %v1084_v22  ;;  %v4256_v47 = vstv %s4242_s26  ;;  %s4265_s26 = sld [smem:[#allocation120_spill]] }
 0x13e   :  { %v970_v25 = vmul.f32 %v4256_v47, %v2802_v63  ;;  %v4258_v61 = vstv %s4243_s10  ;;  %v812_v34 = vadd.f32 %v811_v23, %v808_v60  ;;  %v4262_v35 = vstv %s4245_s13  ;;  %s4270_s10 = sld [smem:[#allocation118_spill]]  ;;  %s4272_s13 = sld [smem:[#allocation124_spill]] }
 0x13f   :  { %v973_v31 = vmul.f32 %v4258_v61, %v2797_v6  ;;  %v1099_v18 = vmul.f32 %v4262_v35, %v2954_v59  ;;  %v4263_v38 = vstv %s4247_s21  ;;  %v1352_v32 = vstv %s3047_s12  ;;  %s4273_s21 = sld [smem:[#allocation94_spill]]  ;;  %s1709_s12 = sld [smem:[#allocation10 + $0x5]] }
 0x140   :  { %v977_v17 = vmul.f32 %v4263_v38, %v2841_v26  ;;  %v660_v37 = vadd.f32 %v659_v43, %v656_v29  ;;  %v1092_v10 = vadd.f32 %v1091_v42, %v1088_v28  ;;  %v4266_v53 = vstv %s4251_s27  ;;  %s4275_s27 = sld [smem:[#allocation97_spill]]  ;;  %962 = vrot.lane.b32.xlu1 %v960_v24, %s4241_s17  ;;  %814 = vrot.lane.b32.xlu0 %v812_v34, %s4259_s29 }
 0x141   :  { %v974_v16 = vadd.f32 %v973_v31, %v970_v25  ;;  %v981_v2 = vmul.f32 %v4266_v53, %v2881_v9  ;;  %v4267_v14 = vstv %s4253_s24  ;;  %v4268_v52 = vstv %s4254_s3  ;;  %s4279_s24 = sld [smem:[#allocation108_spill]]  ;;  %s4281_s3 = sld [smem:[#allocation125_spill]] }
 0x142   :  { %v1103_v19 = vmul.f32 %v4267_v14, %v2981_v54  ;;  %v1107_v44 = vmul.f32 %v4268_v52, %v2970_v33  ;;  %v4269_v56 = vstv %s4255_s2  ;;  %v4271_v3 = vstv %s4257_s30  ;;  %s4277_s2 = sld [smem:[#allocation119_spill]]  ;;  %s4282_s30 = sld [smem:[#allocation128_spill]] }
 0x143   :  { %v822_v5 = vmul.f32 %v4269_v56, %v2802_v63  ;;  %v825_v55 = vmul.f32 %v4271_v3, %v2797_v6  ;;  %v1096_v27 = vadd.f32 %v1095_v39, %v1092_v10  ;;  %v978_v57 = vadd.f32 %v977_v17, %v974_v16 }
 0x144   :  { %v4274_v21 = vstv %s4260_s6  ;;  %v4276_v0 = vstv %s4261_s1  ;;  %v4278_v20 = vstv %s4264_s20  ;;  %v4280_v46 = vstv %s4265_s26  ;;  %s4284_s1 = sld [smem:[#allocation126_spill]]  ;;  %s4286_s6 = sld [smem:[#allocation130_spill]] }
 0x145   :  { %v985_v45 = vmul.f32 %v4274_v21, %v2918_v48  ;;  %v829_v11 = vmul.f32 %v4276_v0, %v2841_v26  ;;  %v989_v60 = vmul.f32 %v4278_v20, %v2954_v59  ;;  %v826_v40 = vadd.f32 %v825_v55, %v822_v5  ;;  %s4289_s20 = sld [smem:[#allocation98_spill]]  ;;  %s4290_s26 = sld [smem:[#allocation101_spill]] }
 0x146   :  { %v833_v41 = vmul.f32 %v4280_v46, %v2881_v9  ;;  %v1356_v8 = vstv %s3067_s22  ;;  %v664_v43 = vadd.f32 %v663_v30, %v660_v37  ;;  %v1100_v22 = vadd.f32 %v1099_v18, %v1096_v27  ;;  %s486_s22 = sld [smem:[#allocation10]] }
 0x147   :  { %v982_v51 = vadd.f32 %v981_v2, %v978_v57  ;;  %v4283_v42 = vstv %s4270_s10  ;;  %v830_v50 = vadd.f32 %v829_v11, %v826_v40  ;;  %v4285_v23 = vstv %s4272_s13  ;;  %s4293_s10 = smov 124   ;;  %s4294_s13 = sld [smem:[#allocation127_spill]] }
 0x148   :  { %v993_v24 = vmul.f32 %v4283_v42, %v2981_v54  ;;  %v837_v49 = vmul.f32 %v4285_v23, %v2918_v48  ;;  %v4287_v36 = vstv %s4273_s21  ;;  %v4288_v29 = vstv %s4275_s27  ;;  %666 = vrot.lane.b32.xlu1 %v664_v43, %s4293_s10  ;;  %s4296_s21 = sld [smem:[#allocation121_spill]]  ;;  %s4300_s27 = sld [smem:[#allocation106_spill]] }
 0x149   :  { %v1266_v39 = vmul.f32 %v4287_v36, %v2802_v63  ;;  %v1269_v28 = vmul.f32 %v4288_v29, %v2797_v6  ;;  %v1104_v30 = vadd.f32 %v1103_v19, %v1100_v22  ;;  %v986_v47 = vadd.f32 %v985_v45, %v982_v51 }
 0x14a   :  { %v4291_v25 = vstv %s4277_s2  ;;  %v4292_v31 = vstv %s4279_s24  ;;  %v834_v35 = vadd.f32 %v833_v41, %v830_v50  ;;  %v4295_v18 = vstv %s4281_s3  ;;  %s4303_s2 = sld [smem:[#allocation107_spill]]  ;;  %s4306_s24 = sld [smem:[#allocation133_spill]] }
 0x14b   :  { %v997_v61 = vmul.f32 %v4291_v25, %v2970_v33  ;;  %v1273_v34 = vmul.f32 %v4292_v31, %v2841_v26  ;;  %v841_v38 = vmul.f32 %v4295_v18, %v2954_v59  ;;  %v1270_v17 = vadd.f32 %v1269_v28, %v1266_v39  ;;  %s4308_s3 = sld [smem:[#allocation129_spill]] }
 0x14c   :  { %v4297_v37 = vstv %s4282_s30  ;;  %v1108_v16 = vadd.f32 %v1107_v44, %v1104_v30  ;;  %v990_v53 = vadd.f32 %v989_v60, %v986_v47  ;;  %v4298_v2 = vstv %s4284_s1  ;;  %s4314_s30 = sld [smem:[#allocation115_spill]]  ;;  %s4347_s1 = sld [smem:[#allocation144_spill]] }
 0x14d   :  { %v1277_v10 = vmul.f32 %v4297_v37, %v2881_v9  ;;  %v845_v14 = vmul.f32 %v4298_v2, %v2981_v54  ;;  %v4299_v19 = vstv %s4286_s6  ;;  %v838_v56 = vadd.f32 %v837_v49, %v834_v35  ;;  %s4351_s6 = sld [smem:[#allocation148_spill]] }
 0x14e   :  { %v1281_v52 = vmul.f32 %v4299_v19, %v2918_v48  ;;  %v1274_v5 = vadd.f32 %v1273_v34, %v1270_v17  ;;  %v4301_v3 = vstv %s4289_s20  ;;  %v4302_v27 = vstv %s4290_s26  ;;  %1110 = vrot.lane.b32.xlu0 %v1108_v16, %s4226_s11  ;;  %s4355_s26 = sld [smem:[#allocation142_spill]]  ;;  %s3358_s20 = sld [smem:[#allocation10 + $0x37]] }
 0x14f   :  { %v1118_v55 = vmul.f32 %v4301_v3, %v2802_v63  ;;  %v1121_v57 = vmul.f32 %v4302_v27, %v2797_v6  ;;  %v994_v44 = vadd.f32 %v993_v24, %v990_v53  ;;  %v4304_v21 = vstv %s4294_s13  ;;  %s4359_s13 = sld [smem:[#allocation143_spill]] }
 0x150   :  { %v849_v45 = vmul.f32 %v4304_v21, %v2970_v33  ;;  %v4305_v0 = vstv %s4089_s4  ;;  %v4307_v20 = vstv %s4296_s21  ;;  %v842_v40 = vadd.f32 %v841_v38, %v838_v56  ;;  %s4313_s4 = sld [smem:[#allocation109_spill]]  ;;  %s3276_s21 = sld [smem:[#allocation10 + $0xc2]] }
 0x151   :  { %v1285_v11 = vmul.f32 %v4305_v0, %v2954_v59  ;;  %v1125_v60 = vmul.f32 %v4307_v20, %v2841_v26  ;;  %v1278_v46 = vadd.f32 %v1277_v10, %v1274_v5  ;;  %v1122_v41 = vadd.f32 %v1121_v57, %v1118_v55 }
 0x152   :  { %v4309_v43 = vstv %s4093_s8  ;;  %v998_v51 = vadd.f32 %v997_v61, %v994_v44  ;;  %v4310_v42 = vstv %s4090_s23  ;;  %v4311_v50 = vstv %s2612_s28  ;;  %s4318_s8 = sld [smem:[#allocation135_spill]]  ;;  %s4326_s28 = sld [smem:[#allocation123_spill]] }
 0x153   :  { %v1129_v22 = vmul.f32 %v4309_v43, %v2881_v9  ;;  %v1289_v24 = vmul.f32 %v4310_v42, %v2981_v54  ;;  %v1133_v23 = vmul.f32 %v4311_v50, %v2918_v48  ;;  %v4312_v49 = vstv %s4300_s27  ;;  %s4332_s23 = sld [smem:[#allocation131_spill]]  ;;  %s4360_s27 = sld [smem:[#allocation149_spill]] }
 0x154   :  { %v1156_v36 = vmul.f32 %v4312_v49, %v2802_v63  ;;  %v846_v39 = vadd.f32 %v845_v14, %v842_v40  ;;  %v1282_v29 = vadd.f32 %v1281_v52, %v1278_v46  ;;  %v1126_v28 = vadd.f32 %v1125_v60, %v1122_v41  ;;  %1000 = vrot.lane.b32.xlu1 %v998_v51, %s4259_s29 }
 0x155   :  { %v4315_v30 = vstv %s4303_s2  ;;  %v4316_v25 = vstv %s4306_s24  ;;  %v4317_v31 = vstv %s4099_s5  ;;  %v4319_v35 = vstv %s4308_s3  ;;  %s4335_s5 = sld [smem:[#allocation132_spill]]  ;;  %s3278_s2 = sld [smem:[#allocation10 + $0xbc]] }
 0x156   :  { %v1159_v47 = vmul.f32 %v4315_v30, %v2797_v6  ;;  %v1293_v61 = vmul.f32 %v4316_v25, %v2970_v33  ;;  %v1137_v34 = vmul.f32 %v4317_v31, %v2954_v59  ;;  %v1163_v18 = vmul.f32 %v4319_v35, %v2841_v26  ;;  %s4362_s3 = sld [smem:[#allocation139_spill]]  ;;  %s3380_s24 = sld [smem:[#allocation10 + $0x50]] }
 0x157   :  { %v4320_v38 = vstv %s4103_s25  ;;  %v850_v37 = vadd.f32 %v849_v45, %v846_v39  ;;  %v1286_v10 = vadd.f32 %v1285_v11, %v1282_v29  ;;  %v1130_v16 = vadd.f32 %v1129_v22, %v1126_v28  ;;  %s4325_s25 = sld [smem:[#allocation122_spill]] }
 0x158   :  { %v1167_v17 = vmul.f32 %v4320_v38, %v2881_v9  ;;  %v1160_v53 = vadd.f32 %v1159_v47, %v1156_v36  ;;  %v4321_v2 = vstv %s2620_s7  ;;  %v4322_v19 = vstv %s2647_s16  ;;  %s4330_s7 = sld [smem:[#allocation141_spill]]  ;;  %s3310_s16 = sld [smem:[#allocation10 + $0xc7]] }
 0x159   :  { %v1141_v14 = vmul.f32 %v4321_v2, %v2981_v54  ;;  %v1171_v52 = vmul.f32 %v4322_v19, %v2918_v48  ;;  %v4323_v56 = vstv %s4313_s4  ;;  %v4324_v3 = vstv %s4314_s30  ;;  %852 = vrot.lane.b32.xlu0 %v850_v37, %s4293_s10  ;;  %s3386_s4 = sld [smem:[#allocation10 + $0x5a]]  ;;  %s3389_s30 = sld [smem:[#allocation10 + $0x4b]] }
 0x15a   :  { %v1008_v5 = vmul.f32 %v4323_v56, %v2802_v63  ;;  %v1011_v55 = vmul.f32 %v4324_v3, %v2797_v6  ;;  %v1290_v27 = vadd.f32 %v1289_v24, %v1286_v10  ;;  %v1134_v57 = vadd.f32 %v1133_v23, %v1130_v16 }
 0x15b   :  { %v1164_v44 = vadd.f32 %v1163_v18, %v1160_v53  ;;  %v4327_v21 = vstv %s4318_s8  ;;  %v4328_v0 = vstv %s4100_s14  ;;  %v4329_v20 = vstv %s2649_s15  ;;  %s4337_s14 = sld [smem:[#allocation140_spill]]  ;;  %s4340_s15 = sld [smem:[#allocation136_spill]] }
 0x15c   :  { %v1015_v45 = vmul.f32 %v4327_v21, %v2841_v26  ;;  %v1145_v11 = vmul.f32 %v4328_v0, %v2970_v33  ;;  %v1175_v60 = vmul.f32 %v4329_v20, %v2954_v59  ;;  %v1012_v40 = vadd.f32 %v1011_v55, %v1008_v5  ;;  %s3292_s8 = sld [smem:[#allocation10 + $0xc1]] }
 0x15d   :  { %v4331_v46 = vstv %s2664_s0  ;;  %v1294_v43 = vadd.f32 %v1293_v61, %v1290_v27  ;;  %v1138_v22 = vadd.f32 %v1137_v34, %v1134_v57  ;;  %v1168_v51 = vadd.f32 %v1167_v17, %v1164_v44  ;;  %s4341_s0 = sld [smem:[#allocation137_spill]] }
 0x15e   :  { %v1019_v41 = vmul.f32 %v4331_v46, %v2881_v9  ;;  %v4334_v42 = vstv %s2656_s18  ;;  %v1016_v50 = vadd.f32 %v1015_v45, %v1012_v40  ;;  %v4336_v23 = vstv %s2682_s19  ;;  %s4344_s18 = sld [smem:[#allocation134_spill]]  ;;  %s4345_s19 = sld [smem:[#allocation147_spill]] }
 0x15f   :  { %v1179_v24 = vmul.f32 %v4334_v42, %v2981_v54  ;;  %v1023_v49 = vmul.f32 %v4336_v23, %v2918_v48  ;;  %v4338_v36 = vstv %s4325_s25  ;;  %v4339_v29 = vstv %s4326_s28  ;;  %1296 = vrot.lane.b32.xlu1 %v1294_v43, %s4226_s11  ;;  %s4369_s28 = sld [smem:[#allocation145_spill]]  ;;  %s3395_s25 = sld [smem:[#allocation11 + $0x1]] }
 0x160   :  { %v1194_v39 = vmul.f32 %v4338_v36, %v2802_v63  ;;  %v1197_v28 = vmul.f32 %v4339_v29, %v2797_v6  ;;  %v1142_v30 = vadd.f32 %v1141_v14, %v1138_v22  ;;  %v1172_v47 = vadd.f32 %v1171_v52, %v1168_v51 }
 0x161   :  { %v4342_v25 = vstv %s2658_s9  ;;  %v4343_v31 = vstv %s4330_s7  ;;  %v1020_v35 = vadd.f32 %v1019_v41, %v1016_v50  ;;  %v4346_v18 = vstv %s4332_s23  ;;  %s4350_s9 = sld [smem:[#allocation150_spill]]  ;;  %s4370_s7 = sld [smem:[#allocation146_spill]] }
 0x162   :  { %v1183_v61 = vmul.f32 %v4342_v25, %v2970_v33  ;;  %v1201_v34 = vmul.f32 %v4343_v31, %v2841_v26  ;;  %v1027_v38 = vmul.f32 %v4346_v18, %v2954_v59  ;;  %v1198_v17 = vadd.f32 %v1197_v28, %v1194_v39  ;;  %s4374_s23 = sld [smem:[#allocation151_spill]] }
 0x163   :  { %v1205_v37 = vmul.f32 %v1204_v1, %v2881_v9  ;;  %v1146_v10 = vadd.f32 %v1145_v11, %v1142_v30  ;;  %v1176_v16 = vadd.f32 %v1175_v60, %v1172_v47  ;;  %v4348_v53 = vstv %s4335_s5  ;;  %s3414_s5 = sld [smem:[#allocation10 + $0x82]] }
 0x164   :  { %v1031_v2 = vmul.f32 %v4348_v53, %v2981_v54  ;;  %v4349_v14 = vstv %s4337_s14  ;;  %v1024_v52 = vadd.f32 %v1023_v49, %v1020_v35  ;;  %v1202_v56 = vadd.f32 %v1201_v34, %v1198_v17  ;;  %s3417_s14 = sld [smem:[#allocation10 + $0x87]] }
 0x165   :  { %v1209_v19 = vmul.f32 %v4349_v14, %v2918_v48  ;;  %v4352_v5 = vstv %s4340_s15  ;;  %v4354_v55 = vstv %s4341_s0  ;;  %1148 = vrot.lane.b32.xlu0 %v1146_v10, %s4241_s17  ;;  %v1180_v27 = vadd.f32 %v1179_v24, %v1176_v16  ;;  %s3328_s15 = sld [smem:[#allocation10 + $0xc6]]  ;;  %s1710_s0 = sld [smem:[#allocation10 + $0xa]] }
 0x166   :  { %v1304_v3 = vmul.f32 %v4352_v5, %v2802_v63  ;;  %v1307_v1 = vmul.f32 %v4354_v55, %v2797_v6  ;;  %v4356_v57 = vstv %s4344_s18  ;;  %v4357_v21 = vstv %s4345_s19  ;;  %s1748_s18 = sld [smem:[#allocation10 + $0x28]]  ;;  %s1749_s19 = sld [smem:[#allocation10 + $0x2d]] }
 0x167   :  { %v1035_v44 = vmul.f32 %v4356_v57, %v2970_v33  ;;  %v1213_v45 = vmul.f32 %v4357_v21, %v2954_v59  ;;  %v4358_v0 = vstv %s4347_s1  ;;  %v1028_v20 = vadd.f32 %v1027_v38, %v1024_v52  ;;  %s1711_s1 = sld [smem:[#allocation10 + $0xf]] }
 0x168   :  { %v1311_v11 = vmul.f32 %v4358_v0, %v2841_v26  ;;  %v1206_v60 = vadd.f32 %v1205_v37, %v1202_v56  ;;  %v1308_v40 = vadd.f32 %v1307_v1, %v1304_v3  ;;  %v4364_v46 = vstv %s4350_s9  ;;  %s1750_s9 = sld [smem:[#allocation10 + $0x32]] }
 0x169   :  { %v1315_v41 = vmul.f32 %v4364_v46, %v2881_v9  ;;  %v1184_v43 = vadd.f32 %v1183_v61, %v1180_v27  ;;  %v4365_v22 = vstv %s4351_s6  ;;  %v1319_v42 = vmul.f32 %v1318_v12, %v2918_v48  ;;  %s3356_s6 = sld [smem:[#allocation10 + $0x14]] }
 0x16a   :  { %v1217_v51 = vmul.f32 %v4365_v22, %v2981_v54  ;;  %v4366_v24 = vstv %s4355_s26  ;;  %v1032_v23 = vadd.f32 %v1031_v2, %v1028_v20  ;;  %v1210_v49 = vadd.f32 %v1209_v19, %v1206_v60  ;;  %s3360_s26 = sld [smem:[#allocation10 + $0x19]] }
 0x16b   :  { %v1380_v50 = vmul.f32 %v4366_v24, %v2802_v63  ;;  %v1312_v36 = vadd.f32 %v1311_v11, %v1308_v40  ;;  %v4371_v39 = vstv %s4359_s13  ;;  %1186 = vrot.lane.b32.xlu1 %v1184_v43, %s4259_s29  ;;  %v4372_v28 = vstv %s4360_s27  ;;  %s3362_s13 = sld [smem:[#allocation10 + $0x3c]]  ;;  %s3366_s27 = sld [smem:[#allocation10 + $0x41]] }
 0x16c   :  { %v1383_v29 = vmul.f32 %v4371_v39, %v2797_v6  ;;  %v1221_v12 = vmul.f32 %v4372_v28, %v2970_v33  ;;  %v1323_v30 = vmul.f32 %v1322_v4, %v2954_v59  ;;  %v4373_v47 = vstv %s4362_s3  ;;  %s3384_s3 = sld [smem:[#allocation10 + $0x55]] }
 0x16d   :  { %v1387_v25 = vmul.f32 %v4373_v47, %v2841_v26  ;;  %v1391_v61 = vmul.f32 %v1390_v7, %v2881_v9  ;;  %v1036_v31 = vadd.f32 %v1035_v44, %v1032_v23  ;;  %v1214_v34 = vadd.f32 %v1213_v45, %v1210_v49 }
 0x16e   :  { %v1316_v35 = vadd.f32 %v1315_v41, %v1312_v36  ;;  %v1384_v18 = vadd.f32 %v1383_v29, %v1380_v50  ;;  %v1327_v38 = vmul.f32 %v1326_v13, %v2981_v54  ;;  %v1395_v4 = vmul.f32 %v1394_v15, %v2918_v48 }
 0x16f   :  { %v4375_v17 = vstv %s4369_s28  ;;  %v4377_v7 = vstv %s4370_s7  ;;  %1038 = vrot.lane.b32.xlu0 %v1036_v31, %s4293_s10  ;;  %v1218_v16 = vadd.f32 %v1217_v51, %v1214_v34  ;;  %v4378_v14 = vstv %s4374_s23  ;;  %s3398_s28 = sld [smem:[#allocation10 + $0x78]]  ;;  %s3406_s7 = sld [smem:[#allocation10 + $0x5f]] }
 0x170   :  { %v1342_v37 = vmul.f32 %v4375_v17, %v2802_v63  ;;  %v1345_v10 = vmul.f32 %v4377_v7, %v2797_v6  ;;  %v1320_v53 = vadd.f32 %v1319_v42, %v1316_v35  ;;  %v1388_v2 = vadd.f32 %v1387_v25, %v1384_v18  ;;  %s3408_s23 = sld [smem:[#allocation10 + $0x7d]] }
 0x171   :  { %v1349_v13 = vmul.f32 %v4378_v14, %v2841_v26  ;;  %v1402_v15 = vstv %s3276_s21  ;;  %v1353_v52 = vmul.f32 %v1352_v32, %v2881_v9  ;;  %v1360_v56 = vstv %s3278_s2  ;;  %s3364_s21 = sld [smem:[#allocation10 + $0x1e]] }
 0x172   :  { %v1346_v19 = vadd.f32 %v1345_v10, %v1342_v37  ;;  %v1222_v5 = vadd.f32 %v1221_v12, %v1218_v16  ;;  %v1324_v3 = vadd.f32 %v1323_v30, %v1320_v53  ;;  %v1392_v55 = vadd.f32 %v1391_v61, %v1388_v2  ;;  %s3370_s2 = sld [smem:[#allocation10 + $0x46]] }
 0x173   :  { %v1399_v1 = vmul.f32 %v1398_v58, %v2954_v59  ;;  %v1357_v57 = vmul.f32 %v1356_v8, %v2918_v48  ;;  %v1364_v44 = vstv %s3292_s8  ;;  %v1331_v45 = vmul.f32 %v1330_v62, %v2970_v33  ;;  %s3392_s8 = sld [smem:[#allocation10 + $0x23]] }
 0x174   :  { %v1350_v27 = vadd.f32 %v1349_v13, %v1346_v19  ;;  %1224 = vrot.lane.b32.xlu1 %v1222_v5, %s4293_s10  ;;  %v1328_v21 = vadd.f32 %v1327_v38, %v1324_v3  ;;  %v1396_v32 = vadd.f32 %v1395_v4, %v1392_v55  ;;  %v1403_v0 = vmul.f32 %v1402_v15, %v2981_v54 }
 0x175   :  { %v1406_v11 = vstv %s3310_s16  ;;  %v1361_v60 = vmul.f32 %v1360_v56, %v2954_v59  ;;  %v1365_v8 = vmul.f32 %v1364_v44, %v2981_v54  ;;  %v1368_v22 = vstv %s3328_s15  ;;  %s3412_s16 = sld [smem:[#allocation10 + $0x64]]  ;;  %s3421_s15 = sld [smem:[#allocation10 + $0x69]] }
 0x176   :  { %v1354_v20 = vadd.f32 %v1353_v52, %v1350_v27  ;;  %v1332_v58 = vadd.f32 %v1331_v45, %v1328_v21  ;;  %v1400_v40 = vadd.f32 %v1399_v1, %v1396_v32  ;;  %v1407_v43 = vmul.f32 %v1406_v11, %v2970_v33 }
 0x177   :  { %v1369_v24 = vmul.f32 %v1368_v22, %v2970_v33  ;;  %v487_v23 = vstv %s486_s22  ;;  %v490_v49 = vstv %s1709_s12  ;;  %v494_v36 = vstv %s1710_s0  ;;  %s3423_s22 = sld [smem:[#allocation10 + $0x8c]]  ;;  %s3426_s12 = sld [smem:[#allocation11]] }
 0x178   :  { %v1358_v46 = vadd.f32 %v1357_v57, %v1354_v20  ;;  %1334 = vrot.lane.b32.xlu0 %v1332_v58, %s4241_s17  ;;  %v1404_v41 = vadd.f32 %v1403_v0, %v1400_v40  ;;  %v673_v39 = vstv %s1748_s18  ;;  %v676_v29 = vstv %s1749_s19  ;;  %s3432_s0 = sld [smem:[#allocation10 + $0x6e]]  ;;  %s3452_s18 = sld [smem:[#allocation10 + $0x91]] }
 0x179   :  { %v491_v28 = vmul.f32 %v490_v49, %v2797_v6  ;;  %v488_v12 = vmul.f32 %v487_v23, %v2802_v63  ;;  %v498_v30 = vstv %s1711_s1  ;;  %v680_v47 = vstv %s1750_s9  ;;  %s3468_s19 = sld [smem:[#allocation10 + $0x73]]  ;;  %s3470_s1 = sld [smem:[#allocation10 + $0x96]] }
 0x17a   :  { %v1362_v51 = vadd.f32 %v1361_v60, %v1358_v46  ;;  %v1408_v62 = vadd.f32 %v1407_v43, %v1404_v41  ;;  %v495_v25 = vmul.f32 %v494_v36, %v2841_v26  ;;  %v677_v61 = vmul.f32 %v676_v29, %v2797_v6  ;;  %s3475_s9 = sld [smem:[#allocation10 + $0xa0]] }
 0x17b   :  { %v674_v34 = vmul.f32 %v673_v39, %v2802_v63  ;;  %v502_v35 = vstv %s3356_s6  ;;  %v684_v38 = vstv %s3358_s20  ;;  %v499_v4 = vmul.f32 %v498_v30, %v2881_v9  ;;  %s3482_s6 = sld [smem:[#allocation10 + $0xa5]]  ;;  %s3484_s20 = sld [smem:[#allocation10 + $0xaa]] }
 0x17c   :  { %v1366_v42 = vadd.f32 %v1365_v8, %v1362_v51  ;;  %1410 = vrot.lane.b32.xlu1 %v1408_v62, %s4293_s10  ;;  %v492_v17 = vadd.f32 %v491_v28, %v488_v12  ;;  %v681_v37 = vmul.f32 %v680_v47, %v2841_v26  ;;  %v506_v7 = vstv %s3360_s26  ;;  %s3493_s26 = sld [smem:[#allocation10 + $0x9b]] }
 0x17d   :  { %v688_v10 = vstv %s3362_s13  ;;  %v503_v16 = vmul.f32 %v502_v35, %v2918_v48  ;;  %v685_v2 = vmul.f32 %v684_v38, %v2881_v9  ;;  %v678_v14 = vadd.f32 %v677_v61, %v674_v34  ;;  %s3495_s13 = sld [smem:[#allocation10 + $0xaf]] }
 0x17e   :  { %v1370_v50 = vadd.f32 %v1369_v24, %v1366_v42  ;;  %v496_v53 = vadd.f32 %v495_v25, %v492_v17  ;;  %v510_v13 = vstv %s3364_s21  ;;  %v692_v52 = vstv %s3366_s27  ;;  %s3502_s21 = sld [smem:[#allocation13]]  ;;  %s3504_s27 = sld [smem:[#allocation13 + $0x5]] }
 0x17f   :  { %v507_v56 = vmul.f32 %v506_v7, %v2954_v59  ;;  %v689_v3 = vmul.f32 %v688_v10, %v2918_v48  ;;  %v682_v55 = vadd.f32 %v681_v37, %v678_v14  ;;  %v696_v1 = vstv %s3370_s2  ;;  %s3507_s2 = sld [smem:[#allocation10 + $0xb4]] }
 0x180   :  { %1372 = vrot.lane.b32.xlu0 %v1370_v50, %s4259_s29  ;;  %v500_v5 = vadd.f32 %v499_v4, %v496_v53  ;;  %v511_v27 = vmul.f32 %v510_v13, %v2981_v54  ;;  %v693_v44 = vmul.f32 %v692_v52, %v2954_v59  ;;  %v697_v11 = vmul.f32 %v696_v1, %v2981_v54 }
 0x181   :  { %v686_v21 = vadd.f32 %v685_v2, %v682_v55  ;;  %v514_v60 = vstv %s3392_s8  ;;  %v859_v58 = vstv %s3380_s24  ;;  %v700_v40 = vstv %s3389_s30  ;;  %s3510_s24 = sld [smem:[#allocation11 + $0x2]]  ;;  %s3530_s30 = sld [smem:[#allocation10 + $0xbe]] }
 0x182   :  { %v504_v57 = vadd.f32 %v503_v16, %v500_v5  ;;  %v862_v8 = vstv %s3384_s3  ;;  %v866_v41 = vstv %s3386_s4  ;;  %v704_v43 = vstv %s3395_s25  ;;  %s3517_s3 = sld [smem:[#allocation10 + $0xb9]]  ;;  %s3520_s4 = sld [smem:[#allocation11 + $0x3]] }
 0x183   :  { %v690_v20 = vadd.f32 %v689_v3, %v686_v21  ;;  %v1045_v62 = vstv %s3398_s28  ;;  %v1048_v42 = vstv %s3408_s23  ;;  %v515_v24 = vmul.f32 %v514_v60, %v2970_v33  ;;  %s3552_s8 = sld [smem:[#allocation10 + $0xc3]]  ;;  %s3561_s25 = sld [smem:[#allocation13 + $0xa]] }
 0x184   :  { %v508_v0 = vadd.f32 %v507_v56, %v504_v57  ;;  %v870_v50 = vstv %s3406_s7  ;;  %v874_v23 = vstv %s3412_s16  ;;  %v1052_v49 = vstv %s3414_s5  ;;  %s3566_s28 = sld [smem:[#allocation11 + $0x4]]  ;;  %s3568_s7 = sld [smem:[#allocation13 + $0x2]] }
 0x185   :  { %v694_v22 = vadd.f32 %v693_v44, %v690_v20  ;;  %v860_v29 = vmul.f32 %v859_v58, %v2802_v63  ;;  %v863_v28 = vmul.f32 %v862_v8, %v2797_v6  ;;  %v878_v47 = vstv %s3421_s15  ;;  %s3570_s23 = sld [smem:[#allocation13 + $0x7]]  ;;  %s3574_s16 = sld [smem:[#allocation13 + $0xc]] }
 0x186   :  { %v512_v46 = vadd.f32 %v511_v27, %v508_v0  ;;  %v1056_v25 = vstv %s3417_s14  ;;  %v1060_v61 = vstv %s3423_s22  ;;  %v701_v34 = vmul.f32 %v700_v40, %v2970_v33  ;;  %s3576_s5 = sld [smem:[#allocation13 + $0x11]]  ;;  %s3578_s14 = sld [smem:[#allocation13 + $0x16]] }
 0x187   :  { %v698_v36 = vadd.f32 %v697_v11, %v694_v22  ;;  %v518_v35 = vstv %s3426_s12  ;;  %v867_v4 = vmul.f32 %v866_v41, %v2841_v26  ;;  %v871_v37 = vmul.f32 %v870_v50, %v2881_v9  ;;  %s3580_s15 = sld [smem:[#allocation13 + $0xf]]  ;;  %s3584_s22 = sld [smem:[#allocation13 + $0x1]] }
 0x188   :  { %v516_v30 = vadd.f32 %v515_v24, %v512_v46  ;;  %v875_v7 = vmul.f32 %v874_v23, %v2918_v48  ;;  %v882_v10 = vstv %s3432_s0  ;;  %v864_v13 = vadd.f32 %v863_v28, %v860_v29  ;;  %s3586_s12 = sld [smem:[#allocation13 + $0x6]]  ;;  %s3589_s0 = sld [smem:[#allocation13 + $0xb]] }
 0x189   :  { %v702_v53 = vadd.f32 %v701_v34, %v698_v36  ;;  %v1046_v5 = vmul.f32 %v1045_v62, %v2802_v63  ;;  %v1049_v3 = vmul.f32 %v1048_v42, %v2797_v6  ;;  %v879_v1 = vmul.f32 %v878_v47, %v2954_v59 }
 0x18a   :  { %v519_v52 = vadd.f32 %v518_v35, %v516_v30  ;;  %v868_v55 = vadd.f32 %v867_v4, %v864_v13  ;;  %v1053_v11 = vmul.f32 %v1052_v49, %v2841_v26  ;;  %v1057_v60 = vmul.f32 %v1056_v25, %v2881_v9 }
 0x18b   :  { %v705_v20 = vadd.f32 %v704_v43, %v702_v53  ;;  %v1064_v58 = vstv %s3452_s18  ;;  %v1050_v8 = vadd.f32 %v1049_v3, %v1046_v5  ;;  %v883_v43 = vmul.f32 %v882_v10, %v2981_v54  ;;  %s3591_s18 = sld [smem:[#allocation13 + $0x10]] }
 0x18c   :  { %v872_v46 = vadd.f32 %v871_v37, %v868_v55  ;;  %v1061_v22 = vmul.f32 %v1060_v61, %v2918_v48  ;;  %v886_v23 = vstv %s3468_s19  ;;  %v1065_v49 = vmul.f32 %v1064_v58, %v2954_v59  ;;  %s3593_s19 = sld [smem:[#allocation13 + $0x15]] }
 0x18d   :  { %v1054_v24 = vadd.f32 %v1053_v11, %v1050_v8  ;;  %v1068_v36 = vstv %s3470_s1  ;;  %v1231_v61 = vstv %s3475_s9  ;;  %v1234_v34 = vstv %s3482_s6  ;;  %s3595_s1 = sld [smem:[#allocation13 + $0x4]]  ;;  %s3599_s9 = sld [smem:[#allocation13 + $0x9]] }
 0x18e   :  { %v876_v42 = vadd.f32 %v875_v7, %v872_v46  ;;  %v1238_v35 = vstv %s3484_s20  ;;  %v887_v7 = vmul.f32 %v886_v23, %v2970_v33  ;;  %v1072_v10 = vstv %s3493_s26  ;;  %s3601_s6 = sld [smem:[#allocation13 + $0xe]]  ;;  %s3606_s20 = sld [smem:[#allocation13 + $0x13]] }
 0x18f   :  { %v1058_v47 = vadd.f32 %v1057_v60, %v1054_v24  ;;  %v1242_v53 = vstv %s3495_s13  ;;  %v1232_v13 = vmul.f32 %v1231_v61, %v2802_v63  ;;  %v1425_v55 = vstv %s3504_s27  ;;  %s3608_s26 = sld [smem:[#allocation13 + $0x18]]  ;;  %s3611_s13 = sld [smem:[#allocation13 + $0x3]] }
 0x190   :  { %v880_v28 = vadd.f32 %v879_v1, %v876_v42  ;;  %v1250_v8 = vstv %s3517_s3  ;;  %s3617_s27 = sld [smem:[#allocation13 + $0xd]]  ;;  %s3646_s3 = sld [smem:[#allocation13 + $0x14]] }
 0x191   :  { %v1062_v4 = vadd.f32 %v1061_v22, %v1058_v47  ;;  %v1251_v24 = vmul.f32 %v1250_v8, %v2954_v59  ;;  %v1455_v8 = vstv %s3591_s18 }
 0x1a3   :  { %v3374_v31 = vpop.permute.xlu1 %738 }
 0x1a4   :  { %v3378_v18 = vpop.permute.xlu0 %552  ;;  %v740_v17 = vrot.slane %v3374_v31, 2 }
 0x1a5   :  { %v554_v39 = vrot.slane %v3378_v18, 2 }
 0x1a6   :  { %v741_v44 = vsel %vm161_vm0, %v3374_v31, %v740_v17  ;;  %v1069_v17 = vmul.f32 %v1068_v36, %v2981_v54 }
 0x1a7   :  { %v555_v2 = vsel %vm161_vm0, %v3378_v18, %v554_v39  ;;  %v743_v41 = vadd.f32 %v741_v44, %v705_v20  ;;  %v1246_v44 = vstv %s3507_s2  ;;  %v1243_v20 = vmul.f32 %v1242_v53, %v2881_v9  ;;  %s3623_s2 = sld [smem:[#allocation13 + $0x12]] }
 0x1a8   :  { %v3402_v15 = vpop.permute.xlu1 %776  ;;  %v557_v21 = vadd.f32 %v555_v2, %v519_v52  ;;  %v1235_v52 = vmul.f32 %v1234_v34, %v2797_v6  ;;  %v1073_v6 = vmul.f32 %v1072_v10, %v2970_v33 }
 0x1a9   :  { %v3404_v19 = vpop.permute.xlu0 %590  ;;  %v778_v56 = vrot.slane %v3402_v15, 2 }
 0x1aa   :  { %v592_v38 = vrot.slane %v3404_v19, 2  ;;  %v1236_v11 = vadd.f32 %v1235_v52, %v1232_v13 }
 0x1ab   :  { %v779_v40 = vsel %vm242_vm1, %v3402_v15, %v778_v56 }
 0x1ac   :  { %v593_v18 = vsel %vm242_vm1, %v3404_v19, %v592_v38  ;;  %v781_v50 = vadd.f32 %v779_v40, %v743_v41  ;;  %v884_v38 = vadd.f32 %v883_v43, %v880_v28 }
 0x1ad   :  { %v3430_v32 = vpop.permute.xlu0 %924  ;;  %v595_v31 = vadd.f32 %v593_v18, %v557_v21  ;;  %v1422_v18 = vstv %s3502_s21  ;;  %v890_v21 = vstv %s3510_s24  ;;  %s3615_s21 = sld [smem:[#allocation13 + $0x8]]  ;;  %s3625_s24 = sld [smem:[#allocation13 + $0x17]] }
 0x1ae   :  { %v3428_v45 = vpop.permute.xlu1 %628  ;;  %v926_v56 = vrot.slane %v3430_v32, 2  ;;  %v888_v1 = vadd.f32 %v887_v7, %v884_v38 }
 0x1af   :  { %v630_v14 = vrot.slane %v3428_v45, 2 }
 0x1b0   :  { %v927_v40 = vsel %vm161_vm0, %v3430_v32, %v926_v56  ;;  %v891_v41 = vadd.f32 %v890_v21, %v888_v1  ;;  %v1473_v21 = vstv %s3570_s23 }
 0x1b1   :  { %v631_v19 = vsel %vm323_vm2, %v3428_v45, %v630_v14  ;;  %v1066_v14 = vadd.f32 %v1065_v49, %v1062_v4 }
 0x1b2   :  { %v3441_v51 = vpop.permute.xlu1 %962  ;;  %v815_v12 = vpop.permute.xlu0 %814  ;;  %v633_v62 = vadd.f32 %v631_v19, %v595_v31 }
 0x1b3   :  { %v816_v0 = vrot.slane %v815_v12, 2  ;;  %v964_v63 = vrot.slane %v3441_v51, 2 }
 0x1b5   :  { %v817_v15 = vsel %vm323_vm2, %v815_v12, %v816_v0  ;;  %v1239_v0 = vmul.f32 %v1238_v35, %v2841_v26  ;;  %v965_v9 = vsel %vm242_vm1, %v3441_v51, %v964_v63  ;;  %v1433_v63 = vstv %s3580_s15 }
 0x1b6   :  { %v819_v25 = vadd.f32 %v817_v15, %v781_v50  ;;  %v929_v15 = vadd.f32 %v927_v40, %v891_v41  ;;  %v1254_v50 = vstv %s3530_s30  ;;  %v1451_v40 = vstv %s3589_s0 }
 0x1b7   :  { %v1240_v22 = vadd.f32 %v1239_v0, %v1236_v11  ;;  %v1481_v0 = vstv %s3576_s5  ;;  %v1485_v11 = vstv %s3578_s14  ;;  %v1459_v41 = vstv %s3593_s19 }
 0x1b9   :  { %v1244_v36 = vadd.f32 %v1243_v20, %v1240_v22  ;;  %v1529_v22 = vstv %s3601_s6 }
 0x1ba   :  { %v667_v16 = vpop.permute.xlu1 %666 }
 0x1bb   :  { %v668_v27 = vrot.slane %v667_v16, 2 }
 0x1bd   :  { %v669_v45 = vsel %vm404_vm3, %v667_v16, %v668_v27  ;;  %v1070_v27 = vadd.f32 %v1069_v17, %v1066_v14 }
 0x1be   :  { %v671_v30 = vadd.f32 %v669_v45, %v633_v62  ;;  %v1076_v45 = vstv %s3520_s4  ;;  %v1247_v62 = vmul.f32 %v1246_v44, %v2918_v48 }
 0x1bf   :  { %v1074_v43 = vadd.f32 %v1073_v6, %v1070_v27  ;;  %v1477_v6 = vstv %s3574_s16  ;;  %s4381_s16 = sld [smem:[#allocation157_spill]] }
 0x1c0   :  { %v3480_v57 = vpop.permute.xlu0 %1110  ;;  %v3526_v2 = vmax.f32 %v671_v30, 0.0  ;;  %v1248_v59 = vadd.f32 %v1247_v62, %v1244_v36  ;;  %v1255_v30 = vmul.f32 %v1254_v50, %v2981_v54  ;;  %v1258_v54 = vstv %s3552_s8  ;;  %s4380_s8 = sld [smem:[#allocation158_spill]] }
 0x1c1   :  { %v1112_v31 = vrot.slane %v3480_v57, 2  ;;  %v1077_v28 = vadd.f32 %v1076_v45, %v1074_v43  ;;  %v1259_v53 = vmul.f32 %v1258_v54, %v2970_v33  ;;  %v1470_v33 = vstv %s3568_s7 }
 0x1c2   :  { %v1423_v58 = vmul.f32 %v1422_v18, %v3526_v2 }
 0x1c3   :  { %v1113_v23 = vsel %vm161_vm0, %v3480_v57, %v1112_v31 }
 0x1c6   :  { %v1001_v39 = vpop.permute.xlu1 %1000 }
 0x1c7   :  { %v1002_v46 = vrot.slane %v1001_v39, 2 }
 0x1c9   :  { %v1003_v49 = vsel %vm323_vm2, %v1001_v39, %v1002_v46  ;;  %v1115_v39 = vadd.f32 %v1113_v23, %v1077_v28  ;;  %v1503_v28 = vstv %s3617_s27 }
 0x1cb   :  { %v853_v29 = vpop.permute.xlu0 %852 }
 0x1cc   :  { %v854_v12 = vrot.slane %v853_v29, 2 }
 0x1ce   :  { %v855_v37 = vsel %vm404_vm3, %v853_v29, %v854_v12  ;;  %v967_v29 = vadd.f32 %v965_v9, %v929_v15  ;;  %v1522_v9 = vstv %s3595_s1 }
 0x1cf   :  { %v857_v16 = vadd.f32 %v855_v37, %v819_v25  ;;  %v1252_v25 = vadd.f32 %v1251_v24, %v1248_v59  ;;  %v1471_v59 = vmul.f32 %v1470_v33, %v3526_v2 }
 0x1d0   :  { %v1005_v12 = vadd.f32 %v1003_v49, %v967_v29  ;;  %v1496_v49 = vstv %s3611_s13  ;;  %v1499_v29 = vstv %s3615_s21 }
 0x1d1   :  { %v3533_v5 = vmax.f32 %v857_v16, 0.0  ;;  %v3535_v3 = vpop.permute.xlu1 %1296  ;;  %v1256_v17 = vadd.f32 %v1255_v30, %v1252_v25  ;;  %v1429_v16 = vstv %s3561_s25  ;;  %v1507_v30 = vstv %s3623_s2 }
 0x1d2   :  { %v1298_v13 = vrot.slane %v3535_v3, 2 }
 0x1d3   :  { %v1426_v60 = vmul.f32 %v1425_v55, %v3533_v5  ;;  %v1260_v18 = vadd.f32 %v1259_v53, %v1256_v17  ;;  %v1262_v55 = vstv %s3566_s28  ;;  %v1474_v23 = vmul.f32 %v1473_v21, %v3533_v5 }
 0x1d4   :  { %v1497_v53 = vmul.f32 %v1496_v49, %v3526_v2 }
 0x1d5   :  { %v3554_v26 = vadd.f32 %v1426_v60, %v1423_v58  ;;  %v1444_v60 = vstv %s3584_s22  ;;  %v1447_v58 = vstv %s3586_s12  ;;  %v1263_v31 = vadd.f32 %v1262_v55, %v1260_v18 }
 0x1d6   :  { %v1437_v18 = vstv %s3646_s3 }
 0x1d7   :  { %v1149_v19 = vpop.permute.xlu0 %1148 }
 0x1d8   :  { %v1150_v42 = vrot.slane %v1149_v19, 2 }
 0x1da   :  { %v1151_v47 = vsel %vm242_vm1, %v1149_v19, %v1150_v42  ;;  %v1299_v19 = vsel %vm161_vm0, %v3535_v3, %v1298_v13  ;;  %v1533_v42 = vstv %s3606_s20 }
 0x1db   :  { %v1153_v35 = vadd.f32 %v1151_v47, %v1115_v39  ;;  %v1301_v62 = vadd.f32 %v1299_v19, %v1263_v31  ;;  %v1511_v47 = vstv %s3625_s24 }
 0x1dd   :  { %v1187_v32 = vpop.permute.xlu1 %1186 }
 0x1de   :  { %v1188_v51 = vrot.slane %v1187_v32, 2 }
 0x1e0   :  { %v1189_v61 = vsel %vm323_vm2, %v1187_v32, %v1188_v51  ;;  %v1537_v32 = vstv %s3608_s26  ;;  %v1448_v51 = vmul.f32 %v1447_v58, %v3533_v5 }
 0x1e1   :  { %v1039_v48 = vpop.permute.xlu0 %1038  ;;  %v1191_v7 = vadd.f32 %v1189_v61, %v1153_v35  ;;  %v1500_v35 = vmul.f32 %v1499_v29, %v3533_v5 }
 0x1e2   :  { %v1040_v57 = vrot.slane %v1039_v48, 2 }
 0x1e3   :  { %v1501_v33 = vadd.f32 %v1500_v35, %v1497_v53 }
 0x1e4   :  { %v1041_v34 = vsel %vm404_vm3, %v1039_v48, %v1040_v57 }
 0x1e5   :  { %v1043_v38 = vadd.f32 %v1041_v34, %v1005_v12  ;;  %v1445_v12 = vmul.f32 %v1444_v60, %v3526_v2  ;;  %v1475_v34 = vadd.f32 %v1474_v23, %v1471_v59 }
 0x1e6   :  { %v1225_v4 = vpop.permute.xlu1 %1224 }
 0x1e7   :  { %v1226_v37 = vrot.slane %v1225_v4, 2  ;;  %v3597_v10 = vmax.f32 %v1043_v38, 0.0  ;;  %v1449_v17 = vadd.f32 %v1448_v51, %v1445_v12 }
 0x1e9   :  { %v1227_v14 = vsel %vm404_vm3, %v1225_v4, %v1226_v37  ;;  %v1430_v1 = vmul.f32 %v1429_v16, %v3597_v10  ;;  %v1478_v39 = vmul.f32 %v1477_v6, %v3597_v10  ;;  %v1452_v25 = vmul.f32 %v1451_v40, %v3597_v10  ;;  %v1549_v40 = vld [vmem:[%s4380_s8 + $0x8] sm:$0xff] }
 0x1ea   :  { %v1229_v52 = vadd.f32 %v1227_v14, %v1191_v7  ;;  %v1335_v56 = vpop.permute.xlu0 %1334  ;;  %v1523_v7 = vmul.f32 %v1522_v9, %v3526_v2  ;;  %v1530_v16 = vmul.f32 %v1529_v22, %v3597_v10  ;;  %v1504_v14 = vmul.f32 %v1503_v28, %v3597_v10  ;;  %1937 = vmatprep.subr.msk.mxu0 %vm1567_vm4, %v1549_v40 }
 0x1eb   :  { %v1336_v44 = vrot.slane %v1335_v56, 2  ;;  %v1431_v20 = vadd.f32 %v1430_v1, %v3554_v26  ;;  %v1525_v26 = vstv %s3599_s9 }
 0x1ec   :  { %v3620_v27 = vmax.f32 %v1229_v52, 0.0  ;;  %v1526_v54 = vmul.f32 %v1525_v26, %v3533_v5  ;;  %v1479_v52 = vadd.f32 %v1478_v39, %v1475_v34 }
 0x1ed   :  { %v1337_v45 = vsel %vm242_vm1, %v1335_v56, %v1336_v44  ;;  %v1453_v56 = vadd.f32 %v1452_v25, %v1449_v17 }
 0x1ee   :  { %v1411_v46 = vpop.permute.xlu1 %1410  ;;  %v1434_v43 = vmul.f32 %v1433_v63, %v3620_v27  ;;  %v1339_v36 = vadd.f32 %v1337_v45, %v1301_v62  ;;  %v1482_v4 = vmul.f32 %v1481_v0, %v3620_v27  ;;  %v1456_v37 = vmul.f32 %v1455_v8, %v3620_v27 }
 0x1ef   :  { %v1412_v24 = vrot.slane %v1411_v46, 2  ;;  %v1527_v55 = vadd.f32 %v1526_v54, %v1523_v7  ;;  %v1534_v5 = vmul.f32 %v1533_v42, %v3620_v27  ;;  %v1508_v1 = vmul.f32 %v1507_v30, %v3620_v27  ;;  %v1548_v27 = vld [vmem:[%s4380_s8] sm:$0xff] }
 0x1f0   :  { %v1435_v15 = vadd.f32 %v1434_v43, %v1431_v20  ;;  %v1483_v44 = vadd.f32 %v1482_v4, %v1479_v52  ;;  %v1457_v63 = vadd.f32 %v1456_v37, %v1453_v56  ;;  %v1505_v20 = vadd.f32 %v1504_v14, %v1501_v33  ;;  %1574 = vmatpush1.xpose.msra.mxu0 %v1548_v27 }
 0x1f1   :  { %v1413_v61 = vsel %vm404_vm3, %v1411_v46, %v1412_v24  ;;  %v1531_v0 = vadd.f32 %v1530_v16, %v1527_v55  ;;  %v1441_v43 = vstv %s4381_s16 }
 0x1f2   :  { %v1373_v3 = vpop.permute.xlu0 %1372  ;;  %v1509_v46 = vadd.f32 %v1508_v1, %v1505_v20 }
 0x1f3   :  { %v1374_v50 = vrot.slane %v1373_v3, 2 }
 0x1f5   :  { %v1375_v48 = vsel %vm323_vm2, %v1373_v3, %v1374_v50  ;;  %v2075_v3 = vmov 1983009808  }
 0x1f6   :  { %v1377_v57 = vadd.f32 %v1375_v48, %v1339_v36  ;;  %v1559_v42 = vunpack.c.l.s4 %v2075_v3 }
 0x1f8   :  { %v1415_v38 = vadd.f32 %v1413_v61, %v1377_v57  ;;  %v1560_v28 = vunpack.c.0.s8 %v1559_v42 }
 0x1fa   :  { %v1420_v13 = vmax.f32 %v1415_v38, 0.0 }
 0x1fc   :  { %v1486_v21 = vmul.f32 %v1485_v11, %v1420_v13  ;;  %v1460_v6 = vmul.f32 %v1459_v41, %v1420_v13  ;;  %v1438_v19 = vmul.f32 %v1437_v18, %v1420_v13  ;;  %v1538_v10 = vmul.f32 %v1537_v32, %v1420_v13 }
 0x1fd   :  { %v1512_v58 = vmul.f32 %v1511_v47, %v1420_v13  ;;  %v1535_v11 = vadd.f32 %v1534_v5, %v1531_v0  ;;  %v1561_v32 = vlaneseq }
 0x1fe   :  { %v1487_v2 = vadd.f32 %v1486_v21, %v1483_v44  ;;  %v1461_v60 = vadd.f32 %v1460_v6, %v1457_v63  ;;  %v1439_v31 = vadd.f32 %v1438_v19, %v1435_v15 }
 0x1ff   :  { %v1539_v8 = vadd.f32 %v1538_v10, %v1535_v11  ;;  %v1513_v41 = vadd.f32 %v1512_v58, %v1509_v46  ;;  %v1562_v48 = vshrl.u32 %v1561_v32, 7 }
 0x200   :  { %1489 = vrot.lane.b32.xlu1 %v1487_v2, %s4241_s17  ;;  %1463 = vrot.lane.b32.xlu0 %v1461_v60, %s4226_s11  ;;  %v1442_v62 = vadd.f32 %v1441_v43, %v1439_v31 }
 0x201   :  { %v1563_v39 = vsub.s32 %v1560_v28, %v1562_v48 }
 0x204   :  { %1541 = vrot.lane.b32.xlu1 %v1539_v8, %s4293_s10  ;;  %1515 = vrot.lane.b32.xlu0 %v1513_v41, %s4259_s29  ;;  %s4382_s29 = sld [smem:[#allocation159_spill]]  ;;  %s2076_s10 = smov [#allocation14]  }
 0x205   :  { %s1651_s5 = sshll.u32 %s2076_s10, 4  ;;  %s1652_s5 = int_to_ptr.vmem [resolvable:$true] %s1651_s5 }
 0x206   :  { %s2033_s14 = scalar_lea.vmem %s1652_s5, 32  ;;  %p2038_p6 = scmp.lt.s32.totalorder %s1652_s5, %s1652_s5 }
 0x207   :  { %p2034_p5 = scmp.ne.s32.totalorder %s1652_s5, %s2033_s14  ;;  %p2039_p7 = scmp.lt.s32.totalorder %s2033_s14, %s2033_s14 }
 0x209   :  { %p2040_p8 = por %p2039_p7, %p2038_p6 }
 0x20a   :  { %v1936_v34 = vld [vmem:[%s4382_s29] ss:$0 sm:$0xff] }
 0x20b   :  { %p2041_p9 = pnand %p2040_p8, %p2034_p5 }
 0x272   :  { %v1490_v45 = vpop.permute.xlu1 %1489  ;;  %v1464_v9 = vpop.permute.xlu0 %1463 }
 0x273   :  { %v1491_v26 = vrot.slane %v1490_v45, 2  ;;  %v1465_v22 = vrot.slane %v1464_v9, 2 }
 0x275   :  { %v1466_v15 = vsel %vm161_vm0, %v1464_v9, %v1465_v22  ;;  %v1492_v49 = vsel %vm242_vm1, %v1490_v45, %v1491_v26 }
 0x276   :  { %v1468_v24 = vadd.f32 %v1466_v15, %v1442_v62  ;;  %v1542_v50 = vpop.permute.xlu1 %1541  ;;  %v1516_v23 = vpop.permute.xlu0 %1515 }
 0x277   :  { %v1543_v36 = vrot.slane %v1542_v50, 2  ;;  %v1517_v51 = vrot.slane %v1516_v23, 2 }
 0x278   :  { %v1494_v29 = vadd.f32 %v1492_v49, %v1468_v24 }
 0x279   :  { %v1518_v59 = vsel %vm323_vm2, %v1516_v23, %v1517_v51  ;;  %v1544_v47 = vsel %vm404_vm3, %v1542_v50, %v1543_v36 }
 0x27a   :  { %v1520_v30 = vadd.f32 %v1518_v59, %v1494_v29 }
 0x27c   :  { %v1546_v57 = vadd.f32 %v1544_v47, %v1520_v30 }
 0x27e   :  { %v1547_v12 = vmax.f32 %v1546_v57, 0.0 }
 0x280   :  { %v1564_v25 = vrot.slane %v1547_v12, %v1563_v39 }
 0x282   :  { %v1565_v61 = vcombine.high %v1564_v25, %v1564_v25 }
 0x284   :  { %1938 = vmatprep.mubr.msk.f32.mxu0 %vm1567_vm4, %v1565_v61 }
 0x285   :  { %1638 = vmatmul.mubr.f32.vlgmr.msra.gmra.mrb[0].mxu0 %v1564_v25 }
 0x358   :  { %v1639_v54 = vpop.f32.mrb[0].mxu0 }
 0x359   :  { %v1640_v35 = vadd.f32 %v1936_v34, %v1639_v54  ;;  %v1641_v38 = vpop.f32.mrb[1].mxu0 }
 0x35b   :  { %1644 = vst.msk [vmem:[#allocation14] sm:$0x3] %vm1643_vm5, %v1640_v35 }
 0x35c   :  { %2044 = shalt.err (!%p2041_p9)
}
 0x35d   :  { %s4383_s12 = sld [smem:[#allocation160_spill]] }
 0x363   :  { %s2045_s0 = scalar_lea.hbm %s4383_s12, 32 }
 0x364   :  { %p2046_p10 = scmp.ne.s32.totalorder %s4383_s12, %s2045_s0  ;;  %p2049_p11 = scmp.lt.u32.totalorder %s2045_s0, %s4383_s12 }
 0x366   :  { %p2051_p12 = pnand %p2049_p11, %p2046_p10 }
 0x368   :  { %2054 = shalt.err (!%p2051_p12)
}
 0x369   :  { %1654 = dma.vmem_to_hbm [thread:$0]  %s1652_s5, 32, %s4383_s12, [#allocation5]  }
 0x36a   :  { %2063 = dma.done.wait [#allocation5], 32  }
 0x36b   :  { %2064 = vsyncadd [#allocation5], 4294967264 }
 0x36c   :  { %1658 = vsyncpa [#allocation4], 1 }
 0x36d   :  { %1659 = vsyncpa [#allocation5], 1 }
 0x36e   :  { %1660 = vsyncpa [#allocation6], 1 }
 0x36f   :  { %1661 = vsyncpa [#allocation9], 1 }
 0x370   :  { %1662 = vsyncpa [#allocation12], 1 }

</bundles_post_ra>
